<compile_context>
chip_gen: v5e
topology: v5e:2x2
jax: 0.10.0
libtpu: 0.0.40
codegen_flags: <defaults>
</compile_context>

<pallas_src>
import jax
import jax.numpy as jnp
from jax.experimental import pallas as pl
from jax.experimental.pallas import tpu as pltpu

# exact f32 matmuls in both the kernel and the plain-JAX reference
jax.config.update("jax_default_matmul_precision", "highest")

# ---- small, deterministic problem sizes ------------------------------------
N = 64      # number of nodes
F = 16      # n_feat
HG = 8      # n_hidden_graph (graph learner hidden dim)
H = 32      # n_hidden (GCN hidden dim)
C = 8       # n_classes
LAMB1 = 0.1
LAMB2 = 0.01

SLAB = 128                       # lane-dense packed output width
_PAD = SLAB - (N + HG + C + 1)   # zero padding lanes
assert _PAD >= 0


def glcn_kernel(a_ref,                                    # SMEM (1, HG) attention vec
                x_ref, wcat_ref, mask_ref, bcat_ref, w2_ref,   # VMEM inputs (mask int8)
                out_ref):                                 # VMEM (N, 128) packed output
    x = x_ref[...]                                        # (N, F)

    # -------- fused first-stage matmul:  x @ [Wg | W1] ------------------------
    xw_all = jnp.dot(x, wcat_ref[...], preferred_element_type=jnp.float32)  # (N, HG+H)
    h = xw_all[:, :HG]                                    # graph-learner features (N, HG)
    ht = h.T                                              # (HG, N)  tiny XLU transpose

    # s_ij = sum_d a_d * |h_id - h_jd|   (unrolled over the small hidden dim)
    s = a_ref[0, 0] * jnp.abs(h[:, 0:1] - ht[0:1, :])     # init from d=0 (no zeros pass)
    for d in range(1, HG):
        s = s + a_ref[0, d] * jnp.abs(h[:, d:d + 1] - ht[d:d + 1, :])
    s = jnp.maximum(s, 0.0)                               # ReLU

    # masked row-softmax over existing edges -> learned adjacency
    mask = mask_ref[...] != 0                             # int8 compare, no f32 convert
    s_m = jnp.where(mask, s, -1e30)
    m = jnp.max(s_m, axis=-1, keepdims=True)
    e = jnp.where(mask, jnp.exp(s_m - m), 0.0)            # exact zero on non-edges
    denom = jnp.maximum(jnp.sum(e, axis=-1, keepdims=True), 1e-12)
    adj = e / denom                                       # exact divide (full f32)

    # -------- fused second-stage matmul: adj @ [h | x@W1] ---------------------
    ah_all = jnp.dot(adj, xw_all, preferred_element_type=jnp.float32)        # (N, HG+H)
    ah = ah_all[:, :HG]                                   # adj @ h  (regularizer)
    bcat = bcat_ref[...]                                  # (1, H+C) fused bias
    h1 = jnp.maximum(ah_all[:, HG:] + bcat[:, :H], 0.0)   # GCN layer 1 (N, H)
    hw = jnp.dot(h1, w2_ref[...], preferred_element_type=jnp.float32)        # (N, C)
    z = jnp.dot(adj, hw, preferred_element_type=jnp.float32) + bcat[:, H:]   # (N, C)

    # -------- regularizers (transpose-free, gram-free) ------------------------
    sq_col = jnp.sum(h * h, axis=-1, keepdims=True)       # (N, 1)  ||h_i||^2
    sq_row = jnp.sum(ht * ht, axis=0, keepdims=True)      # (1, N)  same, lane layout
    rowsum = jnp.sum(adj, axis=-1, keepdims=True)         # (N, 1)
    colsum = jnp.sum(adj, axis=0, keepdims=True)          # (1, N)
    deg_term = 0.5 * (jnp.sum(rowsum * sq_col) + jnp.sum(colsum * sq_row))
    cross_term = jnp.sum(h * ah)                          # == sum(a_sym * h h^T)
    loss1 = (deg_term - cross_term) / float(N * N)        # trace(h^T L h) / N^2
    loss2 = jnp.sum(adj * adj) / float(N * N)             # ||A||_F^2 / N^2
    loss = LAMB1 * loss1 + LAMB2 * loss2

    # -------- single lane-dense packed store: [adj | h | z | loss | pad] ------
    loss_col = jnp.full((N, 1), loss, jnp.float32)
    pad = jnp.zeros((N, _PAD), jnp.float32)
    out_ref[...] = jnp.concatenate([adj, h, z, loss_col, pad], axis=-1)   # (N, 128)


@jax.jit
def glcn_forward(x, adj_mask, params):
    a, wg, w1, b1, w2, b2 = (params[k] for k in ("a", "wg", "w1", "b1", "w2", "b2"))
    wcat = jnp.concatenate([wg, w1], axis=1)              # (F, HG+H) fused weight
    bcat = jnp.concatenate([b1, b2], axis=1)              # (1, H+C)  fused bias
    mask_i8 = adj_mask.astype(jnp.int8)                   # 4x smaller N^2 DMA

    vmem = pl.BlockSpec(memory_space=pltpu.MemorySpace.VMEM)
    smem = pl.BlockSpec(memory_space=pltpu.MemorySpace.SMEM)

    cost = pl.CostEstimate(flops=520_000, transcendentals=4_200,
                           bytes_accessed=45_000)

    slab = pl.pallas_call(
        glcn_kernel,
        out_shape=jax.ShapeDtypeStruct((N, SLAB), jnp.float32),
        in_specs=[smem, vmem, vmem, vmem, vmem, vmem],
        out_specs=vmem,
        cost_estimate=cost,
    )(a, x, wcat, mask_i8, bcat, w2)

    adj_new = slab[:, :N]
    new_x = slab[:, N:N + HG]
    z = slab[:, N + HG:N + HG + C]
    loss = slab[0, N + HG + C]
    adjs = {"final": adj_new}
    others = {"loss": loss, "new_x": new_x}
    return z, adjs, others


def glcn_reference(x, adj_mask, params):
    """Plain-JAX reference for a sanity check (mirrors the torch module)."""
    a, wg, w1, b1, w2, b2 = (params[k] for k in ("a", "wg", "w1", "b1", "w2", "b2"))
    h = x @ wg
    diff = jnp.abs(h[:, None, :] - h[None, :, :])                 # (N, N, HG)
    s = jnp.maximum(jnp.einsum("ijd,d->ij", diff, a[0]), 0.0)
    mask = adj_mask > 0.5
    s_m = jnp.where(mask, s, -1e30)
    m = jnp.max(s_m, axis=-1, keepdims=True)
    e = jnp.where(mask, jnp.exp(s_m - m), 0.0)
    adj = e / jnp.maximum(e.sum(-1, keepdims=True), 1e-12)
    h1 = jnp.maximum(adj @ (x @ w1) + b1, 0.0)
    z = adj @ (h1 @ w2) + b2
    a_sym = 0.5 * (adj + adj.T)
    deg = a_sym.sum(-1, keepdims=True)
    sq = (h * h).sum(-1, keepdims=True)
    loss1 = (jnp.sum(deg * sq) - jnp.sum(a_sym * (h @ h.T))) / float(N * N)
    loss2 = jnp.sum(adj * adj) / float(N * N)
    return z, adj, LAMB1 * loss1 + LAMB2 * loss2


def init_params(key):
    k = jax.random.split(key, 6)
    xavier = lambda kk, shape: (jax.random.normal(kk, shape, jnp.float32)
                                * jnp.sqrt(2.0 / (shape[0] + shape[1])))
    return {
        "a": xavier(k[0], (1, HG)),       # attention vector of OneLayerNN, stored (1, HG)
        "wg": xavier(k[1], (F, HG)),      # OneLayerNN linear weight
        "w1": xavier(k[2], (F, H)),       # GCN layer 1
        "b1": 0.01 * jax.random.normal(k[3], (1, H), jnp.float32),
        "w2": xavier(k[4], (H, C)),       # GCN layer 2 (output / n_classes)
        "b2": 0.01 * jax.random.normal(k[5], (1, C), jnp.float32),
    }


if __name__ == "__main__":
    key = jax.random.PRNGKey(0)
    kx, kmask, kparam = jax.random.split(key, 3)

    x = jax.random.normal(kx, (N, F), jnp.float32)

    # random symmetric adjacency mask with self loops (dense stand-in for the
    # torch sparse COO adjacency whose indices() the module consumes)
    rnd = jax.random.uniform(kmask, (N, N))
    adj_mask = (rnd < 0.1).astype(jnp.float32)
    adj_mask = jnp.maximum(adj_mask, adj_mask.T)
    adj_mask = jnp.maximum(adj_mask, jnp.eye(N, dtype=jnp.float32))

    params = init_params(kparam)

    z, adjs, others = glcn_forward(x, adj_mask, params)
    jax.block_until_ready((z, adjs["final"], others["loss"], others["new_x"]))

    # sanity check against plain-JAX reference (exact divide now -> tight tols)
    z_ref, adj_ref_arr, loss_ref_val = glcn_reference(x, adj_mask, params)
    assert z.shape == (N, C) and adjs["final"].shape == (N, N)
    assert others["new_x"].shape == (N, HG)
    assert bool(jnp.all(jnp.isfinite(z))) and bool(jnp.isfinite(others["loss"]))
    assert jnp.allclose(z, z_ref, rtol=1e-3, atol=1e-3)
    assert jnp.allclose(adjs["final"], adj_ref_arr, rtol=1e-3, atol=1e-3)
    assert jnp.allclose(others["loss"], loss_ref_val, rtol=1e-3, atol=1e-3)

    print("KERNEL_OK")
</pallas_src>

<mosaic_0001>
module attributes {stable_mosaic.version = 11 : i64} {
  func.func @glcn_kernel(%arg0: memref<1x8xf32, #tpu.memory_space<smem>>, %arg1: memref<64x16xf32, #tpu.memory_space<vmem>>, %arg2: memref<16x40xf32, #tpu.memory_space<vmem>>, %arg3: memref<64x64xi8, #tpu.memory_space<vmem>>, %arg4: memref<1x40xf32, #tpu.memory_space<vmem>>, %arg5: memref<32x8xf32, #tpu.memory_space<vmem>>, %arg6: memref<64x128xf32, #tpu.memory_space<vmem>>) attributes {dimension_semantics = [], scalar_prefetch = 0 : i64, scratch_operands = 0 : i64, tpu.core_type = #tpu.core_type<tc>} {
    %c0 = arith.constant 0 : index
    %c0_0 = arith.constant 0 : index
    %0 = vector.load %arg1[%c0, %c0_0] : memref<64x16xf32, #tpu.memory_space<vmem>>, vector<64x16xf32>
    %c0_1 = arith.constant 0 : index
    %c0_2 = arith.constant 0 : index
    %1 = vector.load %arg2[%c0_1, %c0_2] : memref<16x40xf32, #tpu.memory_space<vmem>>, vector<16x40xf32>
    %cst = arith.constant dense<0.000000e+00> : vector<64x40xf32>
    %2 = tpu.matmul %0, %1, %cst {dimension_numbers = #tpu.dot_dimension_numbers<[1], [0], [0], [1], [0, 0, 1, 1], [], []>, precision = #tpu.contract_precision<fp32>} : vector<64x16xf32>, vector<16x40xf32>, vector<64x40xf32> -> vector<64x40xf32>
    %3 = vector.extract_strided_slice %2 {offsets = [0, 0], sizes = [64, 8], strides = [1, 1]} : vector<64x40xf32> to vector<64x8xf32>
    %4 = tpu.transpose %3, [1, 0] : vector<64x8xf32> -> vector<8x64xf32>
    %c0_3 = arith.constant 0 : index
    %c0_4 = arith.constant 0 : index
    %5 = memref.load %arg0[%c0_3, %c0_4] : memref<1x8xf32, #tpu.memory_space<smem>>
    %6 = vector.extract_strided_slice %3 {offsets = [0, 0], sizes = [64, 1], strides = [1, 1]} : vector<64x8xf32> to vector<64x1xf32>
    %7 = vector.extract_strided_slice %4 {offsets = [0, 0], sizes = [1, 64], strides = [1, 1]} : vector<8x64xf32> to vector<1x64xf32>
    %8 = vector.broadcast %6 : vector<64x1xf32> to vector<64x64xf32>
    %9 = vector.broadcast %7 : vector<1x64xf32> to vector<64x64xf32>
    %10 = arith.subf %8, %9 : vector<64x64xf32>
    %11 = math.absf %10 : vector<64x64xf32>
    %12 = vector.broadcast %5 : f32 to vector<64x64xf32>
    %13 = arith.mulf %12, %11 : vector<64x64xf32>
    %c0_5 = arith.constant 0 : index
    %c1 = arith.constant 1 : index
    %14 = memref.load %arg0[%c0_5, %c1] : memref<1x8xf32, #tpu.memory_space<smem>>
    %15 = vector.extract_strided_slice %3 {offsets = [0, 1], sizes = [64, 1], strides = [1, 1]} : vector<64x8xf32> to vector<64x1xf32>
    %16 = vector.extract_strided_slice %4 {offsets = [1, 0], sizes = [1, 64], strides = [1, 1]} : vector<8x64xf32> to vector<1x64xf32>
    %17 = vector.broadcast %15 : vector<64x1xf32> to vector<64x64xf32>
    %18 = vector.broadcast %16 : vector<1x64xf32> to vector<64x64xf32>
    %19 = arith.subf %17, %18 : vector<64x64xf32>
    %20 = math.absf %19 : vector<64x64xf32>
    %21 = vector.broadcast %14 : f32 to vector<64x64xf32>
    %22 = arith.mulf %21, %20 : vector<64x64xf32>
    %23 = arith.addf %13, %22 : vector<64x64xf32>
    %c0_6 = arith.constant 0 : index
    %c2 = arith.constant 2 : index
    %24 = memref.load %arg0[%c0_6, %c2] : memref<1x8xf32, #tpu.memory_space<smem>>
    %25 = vector.extract_strided_slice %3 {offsets = [0, 2], sizes = [64, 1], strides = [1, 1]} : vector<64x8xf32> to vector<64x1xf32>
    %26 = vector.extract_strided_slice %4 {offsets = [2, 0], sizes = [1, 64], strides = [1, 1]} : vector<8x64xf32> to vector<1x64xf32>
    %27 = vector.broadcast %25 : vector<64x1xf32> to vector<64x64xf32>
    %28 = vector.broadcast %26 : vector<1x64xf32> to vector<64x64xf32>
    %29 = arith.subf %27, %28 : vector<64x64xf32>
    %30 = math.absf %29 : vector<64x64xf32>
    %31 = vector.broadcast %24 : f32 to vector<64x64xf32>
    %32 = arith.mulf %31, %30 : vector<64x64xf32>
    %33 = arith.addf %23, %32 : vector<64x64xf32>
    %c0_7 = arith.constant 0 : index
    %c3 = arith.constant 3 : index
    %34 = memref.load %arg0[%c0_7, %c3] : memref<1x8xf32, #tpu.memory_space<smem>>
    %35 = vector.extract_strided_slice %3 {offsets = [0, 3], sizes = [64, 1], strides = [1, 1]} : vector<64x8xf32> to vector<64x1xf32>
    %36 = vector.extract_strided_slice %4 {offsets = [3, 0], sizes = [1, 64], strides = [1, 1]} : vector<8x64xf32> to vector<1x64xf32>
    %37 = vector.broadcast %35 : vector<64x1xf32> to vector<64x64xf32>
    %38 = vector.broadcast %36 : vector<1x64xf32> to vector<64x64xf32>
    %39 = arith.subf %37, %38 : vector<64x64xf32>
    %40 = math.absf %39 : vector<64x64xf32>
    %41 = vector.broadcast %34 : f32 to vector<64x64xf32>
    %42 = arith.mulf %41, %40 : vector<64x64xf32>
    %43 = arith.addf %33, %42 : vector<64x64xf32>
    %c0_8 = arith.constant 0 : index
    %c4 = arith.constant 4 : index
    %44 = memref.load %arg0[%c0_8, %c4] : memref<1x8xf32, #tpu.memory_space<smem>>
    %45 = vector.extract_strided_slice %3 {offsets = [0, 4], sizes = [64, 1], strides = [1, 1]} : vector<64x8xf32> to vector<64x1xf32>
    %46 = vector.extract_strided_slice %4 {offsets = [4, 0], sizes = [1, 64], strides = [1, 1]} : vector<8x64xf32> to vector<1x64xf32>
    %47 = vector.broadcast %45 : vector<64x1xf32> to vector<64x64xf32>
    %48 = vector.broadcast %46 : vector<1x64xf32> to vector<64x64xf32>
    %49 = arith.subf %47, %48 : vector<64x64xf32>
    %50 = math.absf %49 : vector<64x64xf32>
    %51 = vector.broadcast %44 : f32 to vector<64x64xf32>
    %52 = arith.mulf %51, %50 : vector<64x64xf32>
    %53 = arith.addf %43, %52 : vector<64x64xf32>
    %c0_9 = arith.constant 0 : index
    %c5 = arith.constant 5 : index
    %54 = memref.load %arg0[%c0_9, %c5] : memref<1x8xf32, #tpu.memory_space<smem>>
    %55 = vector.extract_strided_slice %3 {offsets = [0, 5], sizes = [64, 1], strides = [1, 1]} : vector<64x8xf32> to vector<64x1xf32>
    %56 = vector.extract_strided_slice %4 {offsets = [5, 0], sizes = [1, 64], strides = [1, 1]} : vector<8x64xf32> to vector<1x64xf32>
    %57 = vector.broadcast %55 : vector<64x1xf32> to vector<64x64xf32>
    %58 = vector.broadcast %56 : vector<1x64xf32> to vector<64x64xf32>
    %59 = arith.subf %57, %58 : vector<64x64xf32>
    %60 = math.absf %59 : vector<64x64xf32>
    %61 = vector.broadcast %54 : f32 to vector<64x64xf32>
    %62 = arith.mulf %61, %60 : vector<64x64xf32>
    %63 = arith.addf %53, %62 : vector<64x64xf32>
    %c0_10 = arith.constant 0 : index
    %c6 = arith.constant 6 : index
    %64 = memref.load %arg0[%c0_10, %c6] : memref<1x8xf32, #tpu.memory_space<smem>>
    %65 = vector.extract_strided_slice %3 {offsets = [0, 6], sizes = [64, 1], strides = [1, 1]} : vector<64x8xf32> to vector<64x1xf32>
    %66 = vector.extract_strided_slice %4 {offsets = [6, 0], sizes = [1, 64], strides = [1, 1]} : vector<8x64xf32> to vector<1x64xf32>
    %67 = vector.broadcast %65 : vector<64x1xf32> to vector<64x64xf32>
    %68 = vector.broadcast %66 : vector<1x64xf32> to vector<64x64xf32>
    %69 = arith.subf %67, %68 : vector<64x64xf32>
    %70 = math.absf %69 : vector<64x64xf32>
    %71 = vector.broadcast %64 : f32 to vector<64x64xf32>
    %72 = arith.mulf %71, %70 : vector<64x64xf32>
    %73 = arith.addf %63, %72 : vector<64x64xf32>
    %c0_11 = arith.constant 0 : index
    %c7 = arith.constant 7 : index
    %74 = memref.load %arg0[%c0_11, %c7] : memref<1x8xf32, #tpu.memory_space<smem>>
    %75 = vector.extract_strided_slice %3 {offsets = [0, 7], sizes = [64, 1], strides = [1, 1]} : vector<64x8xf32> to vector<64x1xf32>
    %76 = vector.extract_strided_slice %4 {offsets = [7, 0], sizes = [1, 64], strides = [1, 1]} : vector<8x64xf32> to vector<1x64xf32>
    %77 = vector.broadcast %75 : vector<64x1xf32> to vector<64x64xf32>
    %78 = vector.broadcast %76 : vector<1x64xf32> to vector<64x64xf32>
    %79 = arith.subf %77, %78 : vector<64x64xf32>
    %80 = math.absf %79 : vector<64x64xf32>
    %81 = vector.broadcast %74 : f32 to vector<64x64xf32>
    %82 = arith.mulf %81, %80 : vector<64x64xf32>
    %83 = arith.addf %73, %82 : vector<64x64xf32>
    %cst_12 = arith.constant 0.000000e+00 : f32
    %84 = vector.broadcast %cst_12 : f32 to vector<64x64xf32>
    %85 = arith.maximumf %83, %84 : vector<64x64xf32>
    %c0_13 = arith.constant 0 : index
    %c0_14 = arith.constant 0 : index
    %86 = vector.load %arg3[%c0_13, %c0_14] : memref<64x64xi8, #tpu.memory_space<vmem>>, vector<64x64xi8>
    %c0_i8 = arith.constant 0 : i8
    %87 = vector.broadcast %c0_i8 : i8 to vector<64x64xi8>
    %88 = arith.cmpi ne, %86, %87 : vector<64x64xi8>
    %cst_15 = arith.constant -1.000000e+30 : f32
    %89 = vector.broadcast %cst_15 : f32 to vector<64x64xf32>
    %90 = arith.select %88, %85, %89 : vector<64x64xi1>, vector<64x64xf32>
    %cst_16 = arith.constant dense<0xFF800000> : vector<64xf32>
    %91 = vector.multi_reduction <maximumf>, %90, %cst_16 [1] : vector<64x64xf32> to vector<64xf32>
    %92 = vector.shape_cast %91 : vector<64xf32> to vector<64x1xf32>
    %93 = vector.broadcast %92 : vector<64x1xf32> to vector<64x64xf32>
    %94 = arith.subf %90, %93 : vector<64x64xf32>
    %95 = math.exp %94 : vector<64x64xf32>
    %cst_17 = arith.constant 0.000000e+00 : f32
    %96 = vector.broadcast %cst_17 : f32 to vector<64x64xf32>
    %97 = arith.select %88, %95, %96 : vector<64x64xi1>, vector<64x64xf32>
    %cst_18 = arith.constant dense<0.000000e+00> : vector<64xf32>
    %98 = vector.multi_reduction <add>, %97, %cst_18 [1] : vector<64x64xf32> to vector<64xf32>
    %99 = vector.shape_cast %98 : vector<64xf32> to vector<64x1xf32>
    %cst_19 = arith.constant 9.99999996E-13 : f32
    %100 = vector.broadcast %cst_19 : f32 to vector<64x1xf32>
    %101 = arith.maximumf %99, %100 : vector<64x1xf32>
    %102 = vector.broadcast %101 : vector<64x1xf32> to vector<64x64xf32>
    %103 = arith.divf %97, %102 : vector<64x64xf32>
    %cst_20 = arith.constant dense<0.000000e+00> : vector<64x40xf32>
    %104 = tpu.matmul %103, %2, %cst_20 {dimension_numbers = #tpu.dot_dimension_numbers<[1], [0], [0], [1], [0, 0, 1, 1], [], []>, precision = #tpu.contract_precision<fp32>} : vector<64x64xf32>, vector<64x40xf32>, vector<64x40xf32> -> vector<64x40xf32>
    %105 = vector.extract_strided_slice %104 {offsets = [0, 0], sizes = [64, 8], strides = [1, 1]} : vector<64x40xf32> to vector<64x8xf32>
    %c0_21 = arith.constant 0 : index
    %c0_22 = arith.constant 0 : index
    %106 = vector.load %arg4[%c0_21, %c0_22] : memref<1x40xf32, #tpu.memory_space<vmem>>, vector<1x40xf32>
    %107 = vector.extract_strided_slice %104 {offsets = [0, 8], sizes = [64, 32], strides = [1, 1]} : vector<64x40xf32> to vector<64x32xf32>
    %108 = vector.extract_strided_slice %106 {offsets = [0, 0], sizes = [1, 32], strides = [1, 1]} : vector<1x40xf32> to vector<1x32xf32>
    %109 = vector.broadcast %108 : vector<1x32xf32> to vector<64x32xf32>
    %110 = arith.addf %107, %109 : vector<64x32xf32>
    %cst_23 = arith.constant 0.000000e+00 : f32
    %111 = vector.broadcast %cst_23 : f32 to vector<64x32xf32>
    %112 = arith.maximumf %110, %111 : vector<64x32xf32>
    %c0_24 = arith.constant 0 : index
    %c0_25 = arith.constant 0 : index
    %113 = vector.load %arg5[%c0_24, %c0_25] : memref<32x8xf32, #tpu.memory_space<vmem>>, vector<32x8xf32>
    %cst_26 = arith.constant dense<0.000000e+00> : vector<64x8xf32>
    %114 = tpu.matmul %112, %113, %cst_26 {dimension_numbers = #tpu.dot_dimension_numbers<[1], [0], [0], [1], [0, 0, 1, 1], [], []>, precision = #tpu.contract_precision<fp32>} : vector<64x32xf32>, vector<32x8xf32>, vector<64x8xf32> -> vector<64x8xf32>
    %cst_27 = arith.constant dense<0.000000e+00> : vector<64x8xf32>
    %115 = tpu.matmul %103, %114, %cst_27 {dimension_numbers = #tpu.dot_dimension_numbers<[1], [0], [0], [1], [0, 0, 1, 1], [], []>, precision = #tpu.contract_precision<fp32>} : vector<64x64xf32>, vector<64x8xf32>, vector<64x8xf32> -> vector<64x8xf32>
    %116 = vector.extract_strided_slice %106 {offsets = [0, 32], sizes = [1, 8], strides = [1, 1]} : vector<1x40xf32> to vector<1x8xf32>
    %117 = vector.broadcast %116 : vector<1x8xf32> to vector<64x8xf32>
    %118 = arith.addf %115, %117 : vector<64x8xf32>
    %119 = arith.mulf %3, %3 : vector<64x8xf32>
    %cst_28 = arith.constant dense<0.000000e+00> : vector<64xf32>
    %120 = vector.multi_reduction <add>, %119, %cst_28 [1] : vector<64x8xf32> to vector<64xf32>
    %121 = vector.shape_cast %120 : vector<64xf32> to vector<64x1xf32>
    %122 = arith.mulf %4, %4 : vector<8x64xf32>
    %cst_29 = arith.constant dense<0.000000e+00> : vector<64xf32>
    %123 = vector.multi_reduction <add>, %122, %cst_29 [0] : vector<8x64xf32> to vector<64xf32>
    %124 = vector.shape_cast %123 : vector<64xf32> to vector<1x64xf32>
    %cst_30 = arith.constant dense<0.000000e+00> : vector<64xf32>
    %125 = vector.multi_reduction <add>, %103, %cst_30 [1] : vector<64x64xf32> to vector<64xf32>
    %126 = vector.shape_cast %125 : vector<64xf32> to vector<64x1xf32>
    %cst_31 = arith.constant dense<0.000000e+00> : vector<64xf32>
    %127 = vector.multi_reduction <add>, %103, %cst_31 [0] : vector<64x64xf32> to vector<64xf32>
    %128 = vector.shape_cast %127 : vector<64xf32> to vector<1x64xf32>
    %129 = arith.mulf %126, %121 : vector<64x1xf32>
    %130 = vector.shape_cast %129 : vector<64x1xf32> to vector<1x64x1xf32>
    %cst_32 = arith.constant dense<0.000000e+00> : vector<1xf32>
    %131 = vector.multi_reduction <add>, %130, %cst_32 [1, 2] : vector<1x64x1xf32> to vector<1xf32>
    %132 = vector.shape_cast %131 : vector<1xf32> to vector<1x1x1xf32>
    %133 = vector.extract %132[0, 0, 0] : f32 from vector<1x1x1xf32>
    %134 = arith.mulf %128, %124 : vector<1x64xf32>
    %135 = vector.shape_cast %134 : vector<1x64xf32> to vector<1x1x64xf32>
    %cst_33 = arith.constant dense<0.000000e+00> : vector<1xf32>
    %136 = vector.multi_reduction <add>, %135, %cst_33 [1, 2] : vector<1x1x64xf32> to vector<1xf32>
    %137 = vector.shape_cast %136 : vector<1xf32> to vector<1x1x1xf32>
    %138 = vector.extract %137[0, 0, 0] : f32 from vector<1x1x1xf32>
    %139 = arith.addf %133, %138 : f32
    %cst_34 = arith.constant 5.000000e-01 : f32
    %140 = arith.mulf %cst_34, %139 : f32
    %141 = arith.mulf %3, %105 : vector<64x8xf32>
    %142 = vector.shape_cast %141 : vector<64x8xf32> to vector<1x64x8xf32>
    %cst_35 = arith.constant dense<0.000000e+00> : vector<1xf32>
    %143 = vector.multi_reduction <add>, %142, %cst_35 [1, 2] : vector<1x64x8xf32> to vector<1xf32>
    %144 = vector.shape_cast %143 : vector<1xf32> to vector<1x1x1xf32>
    %145 = vector.extract %144[0, 0, 0] : f32 from vector<1x1x1xf32>
    %146 = arith.subf %140, %145 : f32
    %cst_36 = arith.constant 4.096000e+03 : f32
    %147 = arith.divf %146, %cst_36 : f32
    %148 = arith.mulf %103, %103 : vector<64x64xf32>
    %149 = vector.shape_cast %148 : vector<64x64xf32> to vector<1x64x64xf32>
    %cst_37 = arith.constant dense<0.000000e+00> : vector<1xf32>
    %150 = vector.multi_reduction <add>, %149, %cst_37 [1, 2] : vector<1x64x64xf32> to vector<1xf32>
    %151 = vector.shape_cast %150 : vector<1xf32> to vector<1x1x1xf32>
    %152 = vector.extract %151[0, 0, 0] : f32 from vector<1x1x1xf32>
    %cst_38 = arith.constant 4.096000e+03 : f32
    %153 = arith.divf %152, %cst_38 : f32
    %cst_39 = arith.constant 1.000000e-01 : f32
    %154 = arith.mulf %cst_39, %147 : f32
    %cst_40 = arith.constant 0.00999999977 : f32
    %155 = arith.mulf %cst_40, %153 : f32
    %156 = arith.addf %154, %155 : f32
    %157 = vector.broadcast %156 : f32 to vector<64x1xf32>
    %cst_41 = arith.constant 0.000000e+00 : f32
    %158 = vector.broadcast %cst_41 : f32 to vector<64x47xf32>
    %159 = tpu.concatenate %103, %3, %118, %157, %158 in 1 : vector<64x64xf32>, vector<64x8xf32>, vector<64x8xf32>, vector<64x1xf32>, vector<64x47xf32> -> vector<64x128xf32>
    %c0_42 = arith.constant 0 : index
    %c0_43 = arith.constant 0 : index
    %160 = vector.load %arg6[%c0_42, %c0_43] : memref<64x128xf32, #tpu.memory_space<vmem>>, vector<64x128xf32>
    tpu.vector_store %arg6[%c0_42, %c0_43], %159 {strides = array<i32>} : memref<64x128xf32, #tpu.memory_space<vmem>>, vector<64x128xf32>,
    return
  }
}

</mosaic_0001>

<bundles_post_ra>
// kernel: glcn_forward.1
= control target key start
LH: loop header
LB: loop body
LE: loop exit
PB: predicated region body
PF: predicated region fallthrough
CT: control target
= control target key end

     0   :  { %11 = vsyncpa [#allocation3], 0  ;;  %s3169_s24 = smov [#allocation2]   ;;  %s4758_s0 = inlined_call_operand.vmem [shape: f32[1,8], index: 0, kind: input, shape index: {}]   ;;  %s4759_s1 = inlined_call_operand.vmem [shape: f32[64,16], index: 1, kind: input, shape index: {}]   ;;  %s4760_s2 = inlined_call_operand.vmem [shape: f32[16,40], index: 2, kind: input, shape index: {}]   ;;  %s4761_s3 = inlined_call_operand.vmem [shape: s8[64,64], index: 3, kind: input, shape index: {}]   ;;  %s4762_s4 = inlined_call_operand.vmem [shape: f32[1,40], index: 4, kind: input, shape index: {}]   ;;  %s4763_s5 = inlined_call_operand.vmem [shape: f32[32,8], index: 5, kind: input, shape index: {}]   ;;  %s4764_s6 = inlined_call_operand.vmem [shape: f32[64,128], index: 6, kind: output, shape index: {}]  }
   0x1   :  { %s17_s23 = sshll.u32 %s4758_s0, 4  ;;  %s18_s23 = int_to_ptr.vmem [resolvable:$true] %s17_s23 }
   0x2   :  { %20 = dma.vmem_to_smem %s18_s23, 16, %s3169_s24, [#allocation3]  }
   0x3   :  { %3167 = dma.done.wait [#allocation3], 16  }
   0x4   :  { %3168 = vsyncadd [#allocation3], 4294967280 }
   0x5   :  { %35 = sfence }
   0x6   :  { %v47_v0 = vld [vmem:[%s4760_s2 + $0x8] sm:$0xff]  ;;  %v46_v1 = vld [vmem:[%s4760_s2] sm:$0xff]  ;;  %vm48_vm0 = vcmask 130048   ;;  %v40_v9 = vld [vmem:[%s4759_s1 + $0x10] sm:$0xff]  ;;  %s481_s20 = sld [smem:[#allocation2]]  ;;  %vm1095_vm4 = vcmask 523264  }
   0x7   :  { %v38_v2 = vld [vmem:[%s4759_s1] sm:$0xff]  ;;  %v87_v3 = vand.u32 4294901760, %v47_v0  ;;  %v89_v4 = vand.u32 4294901760, %v46_v1  ;;  %v39_v6 = vld [vmem:[%s4759_s1 + $0x8] sm:$0xff]  ;;  %v56_v17 = vsel %vm48_vm0, %v40_v9, 0  ;;  %v41_v27 = vld [vmem:[%s4759_s1 + $0x18] sm:$0xff] }
   0x8   :  { %v50_v5 = vsel %vm48_vm0, %v38_v2, 0  ;;  %v53_v8 = vsel %vm48_vm0, %v39_v6, 0  ;;  %v3246_v23 = vand.u32 4294901760, %v56_v17  ;;  %v59_v30 = vsel %vm48_vm0, %v41_v27, 0  ;;  %v42_v34 = vld [vmem:[%s4759_s1 + $0x20] sm:$0xff]  ;;  %v43_v41 = vld [vmem:[%s4759_s1 + $0x28] sm:$0xff] }
   0x9   :  { %v3235_v7 = vand.u32 4294901760, %v50_v5  ;;  %v171_v10 = vsub.f32 %v47_v0, %v87_v3  ;;  %88 = vmatpush.msra.mxu0 %v87_v3  ;;  %v177_v11 = vsub.f32 %v46_v1, %v89_v4  ;;  %291 = vmatpush.msra.mxu3 %v87_v3  ;;  %v3241_v12 = vand.u32 4294901760, %v53_v8  ;;  %v44_v48 = vld [vmem:[%s4759_s1 + $0x30] sm:$0xff]  ;;  %v45_v55 = vld [vmem:[%s4759_s1 + $0x38] sm:$0xff]  ;;  %s3024_s21 = sld [smem:[#allocation2 + $0x1]]  ;;  %s3178_s0 = smov 8  }
   0xa   :  { %v108_v29 = vsub.f32 %v56_v17, %v3246_v23  ;;  %v3254_v33 = vand.u32 4294901760, %v59_v30  ;;  %v62_v37 = vsel %vm48_vm0, %v42_v34, 0  ;;  %v65_v44 = vsel %vm48_vm0, %v43_v41, 0  ;;  %s3025_s22 = sld [smem:[#allocation2 + $0x2]]  ;;  %s3181_s14 = smov 96  }
   0xb   :  { %v92_v13 = vsub.f32 %v50_v5, %v3235_v7  ;;  %231 = vmatpush.msra.mxu2 %v171_v10  ;;  %90 = vmatpush.msra.mxu0 %v89_v4  ;;  %v172_v14 = vand.u32 4294901760, %v171_v10  ;;  %v178_v15 = vand.u32 4294901760, %v177_v11  ;;  %v100_v16 = vsub.f32 %v53_v8, %v3241_v12  ;;  %s3026_s23 = sld [smem:[#allocation2 + $0x3]]  ;;  %s3183_s15 = smov 72  }
   0xc   :  { %293 = vmatpush.msra.mxu3 %v89_v4  ;;  %v109_v32 = vand.u32 4294901760, %v108_v29  ;;  %v116_v36 = vsub.f32 %v59_v30, %v3254_v33  ;;  %v123_v40 = vand.u32 4294901760, %v62_v37  ;;  %v131_v47 = vand.u32 4294901760, %v65_v44  ;;  %s3662_s24 = sld [smem:[#allocation2 + $0x4]] }
   0xd   :  { %v93_v18 = vand.u32 4294901760, %v92_v13  ;;  %234 = vmatpush.msra.mxu2 %v177_v11  ;;  %v173_v19 = vsub.f32 %v171_v10, %v172_v14  ;;  %v179_v20 = vsub.f32 %v177_v11, %v178_v15  ;;  %360 = vmatpush.msrb.mxu0 %v172_v14  ;;  %v101_v22 = vand.u32 4294901760, %v100_v16  ;;  %s3679_s25 = sld [smem:[#allocation2 + $0x5]] }
   0xe   :  { %237 = vmatmul.f32.vlgmr.msra.gmra.mxu2 %v92_v13  ;;  %v110_v35 = vsub.f32 %v108_v29, %v109_v32  ;;  %v117_v39 = vand.u32 4294901760, %v116_v36  ;;  %v124_v43 = vsub.f32 %v62_v37, %v123_v40  ;;  %v132_v50 = vsub.f32 %v65_v44, %v131_v47  ;;  %s3029_s26 = sld [smem:[#allocation2 + $0x6]] }
   0xf   :  { %v94_v21 = vsub.f32 %v92_v13, %v93_v18  ;;  %297 = vmatmul.f32.vlgmr.msra.gmra.mxu3 %v93_v18  ;;  %v174_v24 = vand.u32 4294901760, %v173_v19  ;;  %v180_v25 = vand.u32 4294901760, %v179_v20  ;;  %364 = vmatpush.msrb.mxu0 %v178_v15  ;;  %v102_v28 = vsub.f32 %v100_v16, %v101_v22  ;;  %s3030_s27 = sld [smem:[#allocation2 + $0x7]] }
  0x10   :  { %v111_v38 = vand.u32 4294901760, %v110_v35  ;;  %v118_v42 = vsub.f32 %v116_v36, %v117_v39  ;;  %v125_v46 = vand.u32 4294901760, %v124_v43  ;;  %v68_v51 = vsel %vm48_vm0, %v44_v48, 0 }
  0x11   :  { %v95_v26 = vand.u32 4294901760, %v94_v21  ;;  %175 = vmatpush.msra.mxu1 %v174_v24  ;;  %v103_v31 = vand.u32 4294901760, %v102_v28  ;;  %v133_v53 = vand.u32 4294901760, %v132_v50  ;;  %v139_v54 = vand.u32 4294901760, %v68_v51 }
  0x12   :  { %v119_v45 = vand.u32 4294901760, %v118_v42  ;;  %v126_v49 = vsub.f32 %v124_v43, %v125_v46  ;;  %v71_v58 = vsel %vm48_vm0, %v45_v55, 0  ;;  %v3170_v14 = vmov 4  }
  0x13   :  { %96 = vmatmul.f32.vlgmr.msra.gmra.mxu0 %v95_v26  ;;  %181 = vmatpush.msra.mxu1 %v180_v25  ;;  %v134_v56 = vsub.f32 %v132_v50, %v133_v53  ;;  %v140_v57 = vsub.f32 %v68_v51, %v139_v54  ;;  %v147_v61 = vand.u32 4294901760, %v71_v58  ;;  %v4768_v15 = vmov 2  }
  0x14   :  { %183 = vmatmul.f32.vlgmr.msra.gmra.mxu1 %v3235_v7  ;;  %v127_v52 = vand.u32 4294901760, %v126_v49  ;;  %3061 = vset.pattern.permute.xlu2 %v3170_v14  ;;  %v4767_v42 = vmov 5   ;;  %v4771_v44 = vmov 1  }
  0x15   :  { %413 = vmatpush.msrb.mxu1 %v87_v3  ;;  %v135_v59 = vand.u32 4294901760, %v134_v56  ;;  %v141_v60 = vand.u32 4294901760, %v140_v57  ;;  %v148_v63 = vsub.f32 %v71_v58, %v147_v61  ;;  %3059 = vset.pattern.permute.xlu1 %v4768_v15 }
  0x16   :  { %242 = vmatmul.f32.gmra.mxu2 %v100_v16  ;;  %v4769_v16 = vmov 0  }
  0x17   :  { %303 = vmatmul.f32.gmra.mxu3 %v101_v22  ;;  %415 = vmatpush.msrb.mxu1 %v89_v4  ;;  %v142_v62 = vsub.f32 %v140_v57, %v141_v60  ;;  %v149_v1 = vand.u32 4294901760, %v148_v63 }
  0x18   :  { %3057 = vset.pattern.permute.xlu0 %v4769_v16 }
  0x19   :  { %v143_v0 = vand.u32 4294901760, %v142_v62  ;;  %v150_v2 = vsub.f32 %v148_v63, %v149_v1  ;;  %v3177_v62 = vmov 7  }
  0x1b   :  { %104 = vmatmul.f32.gmra.mxu0 %v103_v31  ;;  %v151_v3 = vand.u32 4294901760, %v150_v2 }
  0x1c   :  { %187 = vmatmul.f32.gmra.mxu1 %v3241_v12 }
  0x1e   :  { %247 = vmatmul.f32.gmra.mxu2 %v108_v29 }
  0x1f   :  { %309 = vmatmul.f32.gmra.mxu3 %v109_v32 }
  0x23   :  { %112 = vmatmul.f32.gmra.mxu0 %v111_v38 }
  0x24   :  { %191 = vmatmul.f32.gmra.mxu1 %v3246_v23 }
  0x26   :  { %252 = vmatmul.f32.gmra.mxu2 %v116_v36 }
  0x27   :  { %315 = vmatmul.f32.gmra.mxu3 %v117_v39 }
  0x2b   :  { %120 = vmatmul.f32.gmra.mxu0 %v119_v45 }
  0x2c   :  { %195 = vmatmul.f32.gmra.mxu1 %v3254_v33 }
  0x2e   :  { %257 = vmatmul.f32.gmra.mxu2 %v124_v43  ;;  %v4766_v43 = vmov 3  }
  0x2f   :  { %321 = vmatmul.f32.gmra.mxu3 %v125_v46 }
  0x33   :  { %128 = vmatmul.f32.gmra.mxu0 %v127_v52 }
  0x34   :  { %199 = vmatmul.f32.gmra.mxu1 %v123_v40 }
  0x36   :  { %262 = vmatmul.f32.gmra.mxu2 %v132_v50 }
  0x37   :  { %327 = vmatmul.f32.gmra.mxu3 %v133_v53 }
  0x3b   :  { %136 = vmatmul.f32.gmra.mxu0 %v135_v59 }
  0x3c   :  { %203 = vmatmul.f32.gmra.mxu1 %v131_v47 }
  0x3e   :  { %267 = vmatmul.f32.gmra.mxu2 %v140_v57 }
  0x3f   :  { %333 = vmatmul.f32.gmra.mxu3 %v141_v60 }
  0x43   :  { %144 = vmatmul.f32.gmra.mxu0 %v143_v0 }
  0x44   :  { %207 = vmatmul.f32.gmra.mxu1 %v139_v54 }
  0x46   :  { %272 = vmatmul.f32.gmra.mxu2 %v148_v63 }
  0x47   :  { %339 = vmatmul.f32.gmra.mxu3 %v149_v1 }
  0x4b   :  { %152 = vmatmul.f32.gmra.mxu0 %v151_v3 }
  0x4c   :  { %211 = vmatmul.f32.gmra.mxu1 %v147_v61 }
  0x53   :  { %366 = vmatmul.f32.vlgmr.msrb.gmra.mxu0 %v3235_v7 }
  0x54   :  { %417 = vmatmul.f32.vlgmr.msrb.gmra.mxu1 %v3235_v7 }
  0x5b   :  { %370 = vmatmul.f32.gmra.mxu0 %v3241_v12 }
  0x5c   :  { %421 = vmatmul.f32.gmra.mxu1 %v3241_v12 }
  0x63   :  { %374 = vmatmul.f32.gmra.mxu0 %v3246_v23 }
  0x64   :  { %425 = vmatmul.f32.gmra.mxu1 %v3246_v23 }
  0x6b   :  { %378 = vmatmul.f32.gmra.mxu0 %v3254_v33 }
  0x6c   :  { %429 = vmatmul.f32.gmra.mxu1 %v3254_v33 }
  0x73   :  { %382 = vmatmul.f32.gmra.mxu0 %v123_v40 }
  0x74   :  { %433 = vmatmul.f32.gmra.mxu1 %v123_v40 }
  0x7b   :  { %386 = vmatmul.f32.gmra.mxu0 %v131_v47 }
  0x7c   :  { %437 = vmatmul.f32.gmra.mxu1 %v131_v47 }
  0x83   :  { %390 = vmatmul.f32.gmra.mxu0 %v139_v54 }
  0x84   :  { %441 = vmatmul.f32.gmra.mxu1 %v139_v54  ;;  %v4765_v54 = vmov 6  }
  0x8b   :  { %394 = vmatmul.f32.gmra.mxu0 %v147_v61 }
  0x8c   :  { %445 = vmatmul.f32.gmra.mxu1 %v147_v61 }
  0x90   :  { %v97_v4 = vpop.f32.mrf.mxu0 }
  0x91   :  { %v184_v5 = vpop.f32.mrf.mxu1  ;;  %v238_v18 = vpop.f32.mrf.mxu2 }
  0x92   :  { %v298_v20 = vpop.f32.mrf.mxu3  ;;  %v185_v24 = vadd.f32 %v184_v5, %v97_v4 }
  0x94   :  { %v239_v28 = vadd.f32 %v238_v18, %v185_v24 }
  0x96   :  { %v299_v30 = vadd.f32 %v298_v20, %v239_v28 }
  0x98   :  { %v105_v6 = vpop.f32.mrf.mxu0 }
  0x99   :  { %v188_v7 = vpop.f32.mrf.mxu1  ;;  %v243_v23 = vpop.f32.mrf.mxu2 }
  0x9a   :  { %v304_v25 = vpop.f32.mrf.mxu3  ;;  %v189_v36 = vadd.f32 %v188_v7, %v105_v6 }
  0x9c   :  { %v244_v40 = vadd.f32 %v243_v23, %v189_v36 }
  0x9e   :  { %v305_v45 = vadd.f32 %v304_v25, %v244_v40 }
  0xa0   :  { %v113_v8 = vpop.f32.mrf.mxu0 }
  0xa1   :  { %v192_v9 = vpop.f32.mrf.mxu1  ;;  %v248_v29 = vpop.f32.mrf.mxu2 }
  0xa2   :  { %v310_v33 = vpop.f32.mrf.mxu3  ;;  %v193_v47 = vadd.f32 %v192_v9, %v113_v8 }
  0xa4   :  { %v249_v51 = vadd.f32 %v248_v29, %v193_v47 }
  0xa6   :  { %v311_v56 = vadd.f32 %v310_v33, %v249_v51 }
  0xa8   :  { %v3284_v10 = vpop.f32.mrf.mxu0 }
  0xa9   :  { %v3286_v11 = vpop.f32.mrf.mxu1  ;;  %v3312_v37 = vpop.f32.mrf.mxu2 }
  0xaa   :  { %v3314_v41 = vpop.f32.mrf.mxu3  ;;  %v197_v9 = vadd.f32 %v3286_v11, %v3284_v10 }
  0xac   :  { %v254_v25 = vadd.f32 %v3312_v37, %v197_v9 }
  0xb0   :  { %v3288_v12 = vpop.f32.mrf.mxu0 }
  0xb1   :  { %v3290_v13 = vpop.f32.mrf.mxu1  ;;  %v258_v48 = vpop.f32.mrf.mxu2 }
  0xb2   :  { %v322_v52 = vpop.f32.mrf.mxu3 }
  0xb8   :  { %v3295_v17 = vpop.f32.mrf.mxu0 }
  0xb9   :  { %v3297_v19 = vpop.f32.mrf.mxu1  ;;  %v263_v58 = vpop.f32.mrf.mxu2 }
  0xba   :  { %v328_v60 = vpop.f32.mrf.mxu3  ;;  %v205_v4 = vadd.f32 %v3297_v19, %v3295_v17  ;;  %v201_v17 = vadd.f32 %v3290_v13, %v3288_v12  ;;  %v317_v13 = vadd.f32 %v3314_v41, %v254_v25 }
  0xbc   :  { %v264_v8 = vadd.f32 %v263_v58, %v205_v4  ;;  %v259_v28 = vadd.f32 %v258_v48, %v201_v17 }
  0xc0   :  { %v3299_v21 = vpop.f32.mrf.mxu0 }
  0xc1   :  { %v3301_v22 = vpop.f32.mrf.mxu1  ;;  %v268_v1 = vpop.f32.mrf.mxu2 }
  0xc2   :  { %v209_v2 = vadd.f32 %v3301_v22, %v3299_v21  ;;  %v334_v5 = vpop.f32.mrf.mxu3  ;;  %v329_v22 = vadd.f32 %v328_v60, %v264_v8 }
  0xc4   :  { %v269_v7 = vadd.f32 %v268_v1, %v209_v2 }
  0xc6   :  { %v335_v19 = vadd.f32 %v334_v5, %v269_v7 }
  0xc8   :  { %v3303_v26 = vpop.f32.mrf.mxu0 }
  0xc9   :  { %v3305_v27 = vpop.f32.mrf.mxu1  ;;  %v273_v20 = vpop.f32.mrf.mxu2 }
  0xca   :  { %v213_v18 = vadd.f32 %v3305_v27, %v3303_v26  ;;  %v340_v10 = vpop.f32.mrf.mxu3  ;;  %v323_v26 = vadd.f32 %v322_v52, %v259_v28 }
  0xcc   :  { %v274_v29 = vadd.f32 %v273_v20, %v213_v18 }
  0xce   :  { %v341_v27 = vadd.f32 %v340_v10, %v274_v29 }
  0xd0   :  { %v367_v31 = vpop.f32.mrf.mxu0 }
  0xd1   :  { %v368_v32 = vadd.f32 %v367_v31, %v299_v30  ;;  %v418_v34 = vpop.f32.mrf.mxu1 }
  0xd3   :  { %v3307_v35 = vadd.f32 %v418_v34, %v368_v32 }
  0xd5   :  { %4823 = vst [vmem:[#allocation5_spill] sm:$0xff] %v3307_v35  ;;  %751 = vperm.xlu2 %3061, %v3307_v35   ;;  %617 = vperm.xlu1 %3059, %v3307_v35  }
  0xd6   :  { %484 = vperm.xlu0 %3057, %v3307_v35  }
  0xd8   :  { %v371_v38 = vpop.f32.mrf.mxu0 }
  0xd9   :  { %v422_v39 = vpop.f32.mrf.mxu1  ;;  %v372_v49 = vadd.f32 %v371_v38, %v305_v45 }
  0xdb   :  { %v3322_v53 = vadd.f32 %v422_v39, %v372_v49 }
  0xdd   :  { %3062 = vset.pattern.permute.xlu2 %v4767_v42  ;;  %3060 = vset.pattern.permute.xlu1 %v4766_v43  ;;  %4824 = vst [vmem:[#allocation6_spill] sm:$0xff] %v3322_v53 }
  0xde   :  { %3058 = vset.pattern.permute.xlu0 %v4771_v44  ;;  %818 = vperm.xlu2 %3062, %v3307_v35  }
  0xdf   :  { %684 = vperm.xlu1 %3060, %v3307_v35   ;;  %550 = vperm.xlu0 %3058, %v3307_v35  }
  0xe0   :  { %v375_v46 = vpop.f32.mrf.mxu0 }
  0xe1   :  { %v426_v50 = vpop.f32.mrf.mxu1  ;;  %v376_v59 = vadd.f32 %v375_v46, %v311_v56 }
  0xe3   :  { %v3330_v61 = vadd.f32 %v426_v50, %v376_v59 }
  0xe5   :  { %4825 = vst [vmem:[#allocation7_spill] sm:$0xff] %v3330_v61  ;;  %v3426_v58 = vand.u32 4294901760, %v3330_v61 }
  0xe6   :  { %3065 = vset.pattern.permute.xlu2 %v4769_v16 }
  0xe7   :  { %3063 = vset.pattern.permute.xlu1 %v4765_v54  ;;  %3067 = vset.pattern.permute.xlu0 %v4768_v15  ;;  %v1456_v2 = vsub.f32 %v3330_v61, %v3426_v58 }
  0xe8   :  { %489 = vperm.xlu2 %3065, %v3322_v53   ;;  %885 = vperm.xlu1 %3063, %v3307_v35   ;;  %v379_v55 = vpop.f32.mrf.mxu0 }
  0xe9   :  { %621 = vperm.xlu0 %3067, %v3322_v53   ;;  %v430_v57 = vpop.f32.mrf.mxu1  ;;  %v380_v32 = vadd.f32 %v379_v55, %v317_v13  ;;  %v1457_v18 = vand.u32 4294901760, %v1456_v2 }
  0xeb   :  { %v3375_v40 = vadd.f32 %v430_v57, %v380_v32 }
  0xed   :  { %4829 = vst [vmem:[#allocation11_spill] sm:$0xff] %v3375_v40  ;;  %v3412_v52 = vand.u32 4294901760, %v3375_v40 }
  0xf0   :  { %3068 = vset.pattern.permute.xlu2 %v4766_v43  ;;  %3064 = vset.pattern.permute.xlu1 %v3177_v62  ;;  %v383_v63 = vpop.f32.mrf.mxu0 }
  0xf1   :  { %3073 = vset.pattern.permute.xlu0 %v4769_v16  ;;  %688 = vperm.xlu2 %3068, %v3322_v53   ;;  %v434_v0 = vpop.f32.mrf.mxu1  ;;  %v384_v33 = vadd.f32 %v383_v63, %v323_v26  ;;  %v1450_v63 = vsub.f32 %v3375_v40, %v3412_v52 }
  0xf2   :  { %952 = vperm.xlu1 %3064, %v3307_v35   ;;  %494 = vperm.xlu0 %3073, %v3330_v61  }
  0xf3   :  { %v3377_v41 = vadd.f32 %v434_v0, %v384_v33  ;;  %v3438_v0 = vand.u32 4294901760, %v3322_v53  ;;  %v1451_v7 = vand.u32 4294901760, %v1450_v63 }
  0xf5   :  { %4830 = vst [vmem:[#allocation12_spill] sm:$0xff] %v3377_v41  ;;  %v3404_v49 = vand.u32 4294901760, %v3377_v41 }
  0xf7   :  { %v3423_v57 = vsub.f32 %v3377_v41, %v3404_v49 }
  0xf8   :  { %v387_v3 = vpop.f32.mrf.mxu0 }
  0xf9   :  { %3069 = vset.pattern.permute.xlu2 %v3170_v14  ;;  %v438_v6 = vpop.f32.mrf.mxu1  ;;  %v388_v11 = vadd.f32 %v387_v3, %v329_v22  ;;  %v3450_v3 = vand.u32 4294901760, %v3307_v35  ;;  %v1445_v4 = vand.u32 4294901760, %v3423_v57  ;;  %v1458_v22 = vsub.f32 %v1456_v2, %v1457_v18 }
  0xfa   :  { %3066 = vset.pattern.permute.xlu1 %v4771_v44  ;;  %3076 = vset.pattern.permute.xlu0 %v4766_v43 }
  0xfb   :  { %755 = vperm.xlu2 %3069, %v3322_v53   ;;  %554 = vperm.xlu1 %3066, %v3322_v53   ;;  %v3364_v30 = vadd.f32 %v438_v6, %v388_v11  ;;  %v1462_v6 = vsub.f32 %v3322_v53, %v3438_v0  ;;  %v1446_v9 = vsub.f32 %v3423_v57, %v1445_v4  ;;  %v1459_v28 = vand.u32 4294901760, %v1458_v22 }
  0xfc   :  { %692 = vperm.xlu0 %3076, %v3330_v61   ;;  %v1468_v17 = vsub.f32 %v3307_v35, %v3450_v3 }
  0xfd   :  { %4827 = vst [vmem:[#allocation9_spill] sm:$0xff] %v3364_v30  ;;  %v3373_v39 = vand.u32 4294901760, %v3364_v30  ;;  %v1463_v20 = vand.u32 4294901760, %v1462_v6 }
  0xff   :  { %v3399_v48 = vsub.f32 %v3364_v30, %v3373_v39  ;;  %v1464_v25 = vsub.f32 %v1462_v6, %v1463_v20 }
 0x100   :  { %v391_v21 = vpop.f32.mrf.mxu0 }
 0x101   :  { %v392_v23 = vadd.f32 %v391_v21, %v335_v19  ;;  %v442_v24 = vpop.f32.mrf.mxu1  ;;  %v1439_v56 = vand.u32 4294901760, %v3399_v48  ;;  %v1452_v19 = vsub.f32 %v1450_v63, %v1451_v7  ;;  %v1447_v21 = vand.u32 4294901760, %v1446_v9 }
 0x102   :  { %v1465_v10 = vand.u32 4294901760, %v1464_v25 }
 0x103   :  { %3070 = vset.pattern.permute.xlu2 %v4767_v42  ;;  %3072 = vset.pattern.permute.xlu1 %v3177_v62  ;;  %v3361_v12 = vadd.f32 %v442_v24, %v392_v23  ;;  %v1440_v1 = vsub.f32 %v3399_v48, %v1439_v56  ;;  %v1469_v23 = vand.u32 4294901760, %v1468_v17  ;;  %v1453_v24 = vand.u32 4294901760, %v1452_v19 }
 0x104   :  { %3080 = vset.pattern.permute.xlu0 %v3177_v62  ;;  %822 = vperm.xlu2 %3070, %v3322_v53  }
 0x105   :  { %956 = vperm.xlu1 %3072, %v3322_v53   ;;  %960 = vperm.xlu0 %3080, %v3330_v61   ;;  %4826 = vst [vmem:[#allocation8_spill] sm:$0xff] %v3361_v12  ;;  %v3367_v37 = vand.u32 4294901760, %v3361_v12  ;;  %v1441_v8 = vand.u32 4294901760, %v1440_v1  ;;  %v1470_v29 = vsub.f32 %v1468_v17, %v1469_v23 }
 0x107   :  { %v3388_v46 = vsub.f32 %v3361_v12, %v3367_v37  ;;  %v1471_v11 = vand.u32 4294901760, %v1470_v29 }
 0x108   :  { %v395_v31 = vpop.f32.mrf.mxu0 }
 0x109   :  { %v396_v34 = vadd.f32 %v395_v31, %v341_v27  ;;  %v446_v36 = vpop.f32.mrf.mxu1  ;;  %v1433_v51 = vand.u32 4294901760, %v3388_v46 }
 0x10b   :  { %v3369_v38 = vadd.f32 %v446_v36, %v396_v34  ;;  %v1434_v60 = vsub.f32 %v3388_v46, %v1433_v51 }
 0x10c   :  { %3071 = vset.pattern.permute.xlu2 %v4765_v54 }
 0x10d   :  { %4828 = vst [vmem:[#allocation10_spill] sm:$0xff] %v3369_v38  ;;  %3074 = vset.pattern.permute.xlu1 %v4771_v44  ;;  %3081 = vset.pattern.permute.xlu0 %v4769_v16  ;;  %v3382_v45 = vand.u32 4294901760, %v3369_v38  ;;  %v1435_v5 = vand.u32 4294901760, %v1434_v60 }
 0x10e   :  { %889 = vperm.xlu2 %3071, %v3322_v53   ;;  %558 = vperm.xlu1 %3074, %v3330_v61  }
 0x10f   :  { %499 = vperm.xlu0 %3081, %v3375_v40   ;;  %1337 = vmatpush.msrb.mxu2 %v3382_v45  ;;  %v3394_v47 = vsub.f32 %v3369_v38, %v3382_v45 }
 0x110   :  { %1588 = vmatpush.msra.mxu1 %v3382_v45 }
 0x111   :  { %1339 = vmatpush.msrb.mxu2 %v3367_v37  ;;  %1516 = vmatpush.msra.mxu0 %v3394_v47  ;;  %v1427_v50 = vand.u32 4294901760, %v3394_v47 }
 0x112   :  { %1590 = vmatpush.msra.mxu1 %v3367_v37 }
 0x113   :  { %1341 = vmatpush.msrb.mxu2 %v3373_v39  ;;  %1519 = vmatpush.msra.mxu0 %v3388_v46  ;;  %v1428_v55 = vsub.f32 %v3394_v47, %v1427_v50 }
 0x114   :  { %1592 = vmatpush.msra.mxu1 %v3373_v39 }
 0x115   :  { %1343 = vmatpush.msrb.mxu2 %v3404_v49  ;;  %1522 = vmatpush.msra.mxu0 %v3399_v48  ;;  %v1429_v59 = vand.u32 4294901760, %v1428_v55 }
 0x116   :  { %3093 = vset.pattern.permute.xlu2 %v3170_v14  ;;  %3075 = vset.pattern.permute.xlu1 %v4768_v15 }
 0x117   :  { %3083 = vset.pattern.permute.xlu0 %v4768_v15  ;;  %767 = vperm.xlu2 %3093, %v3377_v41  }
 0x118   :  { %625 = vperm.xlu1 %3075, %v3330_v61   ;;  %629 = vperm.xlu0 %3083, %v3375_v40  }
 0x119   :  { %1594 = vmatpush.msra.mxu1 %v3404_v49  ;;  %1345 = vmatpush.msrb.mxu2 %v3412_v52 }
 0x11a   :  { %1430 = vmatpush.msrb.mxu3 %v1429_v59  ;;  %1525 = vmatpush.msra.mxu0 %v3423_v57 }
 0x11b   :  { %1596 = vmatpush.msra.mxu1 %v3412_v52  ;;  %1347 = vmatpush.msrb.mxu2 %v3426_v58 }
 0x11c   :  { %1436 = vmatpush.msrb.mxu3 %v1435_v5  ;;  %1528 = vmatpush.msra.mxu0 %v1450_v63 }
 0x11d   :  { %1598 = vmatpush.msra.mxu1 %v3426_v58  ;;  %1349 = vmatpush.msrb.mxu2 %v3438_v0 }
 0x11e   :  { %1442 = vmatpush.msrb.mxu3 %v1441_v8  ;;  %1531 = vmatpush.msra.mxu0 %v1456_v2 }
 0x11f   :  { %1600 = vmatpush.msra.mxu1 %v3438_v0  ;;  %3110 = vset.pattern.permute.xlu2 %v4765_v54 }
 0x120   :  { %3077 = vset.pattern.permute.xlu1 %v3170_v14  ;;  %3087 = vset.pattern.permute.xlu0 %v4765_v54 }
 0x121   :  { %909 = vperm.xlu2 %3110, %v3361_v12   ;;  %759 = vperm.xlu1 %3077, %v3330_v61  }
 0x122   :  { %897 = vperm.xlu0 %3087, %v3375_v40   ;;  %1351 = vmatpush.msrb.mxu2 %v3450_v3 }
 0x123   :  { %1448 = vmatpush.msrb.mxu3 %v1447_v21  ;;  %1534 = vmatpush.msra.mxu0 %v1462_v6 }
 0x124   :  { %1602 = vmatpush.msra.mxu1 %v3450_v3  ;;  %1663 = vmatpush.msra.mxu2 %v1427_v50 }
 0x125   :  { %1454 = vmatpush.msrb.mxu3 %v1453_v24  ;;  %1537 = vmatpush.msra.mxu0 %v1468_v17 }
 0x126   :  { %1667 = vmatpush.msra.mxu2 %v1433_v51 }
 0x127   :  { %1460 = vmatpush.msrb.mxu3 %v1459_v28 }
 0x128   :  { %1671 = vmatpush.msra.mxu2 %v1439_v56 }
 0x129   :  { %1466 = vmatpush.msrb.mxu3 %v1465_v10  ;;  %3078 = vset.pattern.permute.xlu1 %v4767_v42 }
 0x12a   :  { %1675 = vmatpush.msra.mxu2 %v1445_v4  ;;  %3090 = vset.pattern.permute.xlu0 %v4771_v44 }
 0x12b   :  { %1472 = vmatpush.msrb.mxu3 %v1471_v11  ;;  %826 = vperm.xlu1 %3078, %v3330_v61  }
 0x12c   :  { %566 = vperm.xlu0 %3090, %v3377_v41   ;;  %1679 = vmatpush.msra.mxu2 %v1451_v7 }
 0x12d   :  { %1734 = vmatpush.msra.mxu3 %v3382_v45 }
 0x12e   :  { %1683 = vmatpush.msra.mxu2 %v1457_v18  ;;  %v1025_v18 = vld [vmem:[%s4761_s3] sm:$0xff] }
 0x12f   :  { %1736 = vmatpush.msra.mxu3 %v3367_v37  ;;  %v3561_v48 = vpop.permute.xlu2 %751  ;;  %vm1027_vm1 = vnez %v1025_v18 }
 0x130   :  { %1687 = vmatpush.msra.mxu2 %v1463_v20  ;;  %v3637_v22 = vsel %vm1027_vm1, 16843009, %v4769_v16 }
 0x131   :  { %1738 = vmatpush.msra.mxu3 %v3373_v39 }
 0x132   :  { %1691 = vmatpush.msra.mxu2 %v1469_v23  ;;  %v1033_v23 = vunpack.c.2.s8 %v3637_v22 }
 0x133   :  { %1740 = vmatpush.msra.mxu3 %v3404_v49  ;;  %3079 = vset.pattern.permute.xlu1 %v4765_v54 }
 0x134   :  { %3096 = vset.pattern.permute.xlu0 %v4769_v16  ;;  %893 = vperm.xlu1 %3079, %v3330_v61  }
 0x135   :  { %1742 = vmatpush.msra.mxu3 %v3412_v52  ;;  %509 = vperm.xlu0 %3096, %v3364_v30  }
 0x137   :  { %1744 = vmatpush.msra.mxu3 %v3426_v58 }
 0x138   :  { %v3569_v51 = vpop.permute.xlu2 %818 }
 0x139   :  { %1746 = vmatpush.msra.mxu3 %v3438_v0 }
 0x13b   :  { %1748 = vmatpush.msra.mxu3 %v3450_v3 }
 0x13c   :  { %3082 = vset.pattern.permute.xlu1 %v4771_v44 }
 0x13d   :  { %3098 = vset.pattern.permute.xlu0 %v4768_v15  ;;  %562 = vperm.xlu1 %3082, %v3375_v40  }
 0x13e   :  { %637 = vperm.xlu0 %3098, %v3364_v30  }
 0x142   :  { %v3577_v56 = vpop.permute.xlu2 %489 }
 0x145   :  { %3084 = vset.pattern.permute.xlu1 %v4766_v43 }
 0x146   :  { %3102 = vset.pattern.permute.xlu0 %v4765_v54  ;;  %696 = vperm.xlu1 %3084, %v3375_v40  }
 0x147   :  { %905 = vperm.xlu0 %3102, %v3364_v30   ;;  %449 = vxpose.xlu2.b32.start [1/8] (short) (narrow) %v3307_v35, 8  ;;  %v3503_v13 = vpop.permute.xlu1 %617 }
 0x148   :  { %v3512_v27 = vpop.permute.xlu0 %484 }
 0x14b   :  { %v3587_v60 = vpop.permute.xlu2 %688 }
 0x14e   :  { %3085 = vset.pattern.permute.xlu1 %v3170_v14 }
 0x14f   :  { %3105 = vset.pattern.permute.xlu0 %v4771_v44  ;;  %763 = vperm.xlu1 %3085, %v3375_v40  }
 0x150   :  { %574 = vperm.xlu0 %3105, %v3361_v12   ;;  %450 = vxpose.xlu2.b32.cont [2/8] (short) (narrow) %v3322_v53, 8 }
 0x151   :  { %v3510_v26 = vpop.permute.xlu1 %684  ;;  %v3521_v32 = vpop.permute.xlu0 %550 }
 0x155   :  { %v3595_v1 = vpop.permute.xlu2 %755 }
 0x157   :  { %3086 = vset.pattern.permute.xlu1 %v4767_v42 }
 0x158   :  { %3108 = vset.pattern.permute.xlu0 %v3170_v14  ;;  %451 = vxpose.xlu2.b32.cont [3/8] (short) (narrow) %v3330_v61, 8 }
 0x159   :  { %830 = vperm.xlu1 %3086, %v3375_v40   ;;  %775 = vperm.xlu0 %3108, %v3361_v12  }
 0x15a   :  { %v3519_v31 = vpop.permute.xlu1 %885 }
 0x15b   :  { %v3531_v34 = vpop.permute.xlu0 %621 }
 0x15e   :  { %v3603_v4 = vpop.permute.xlu2 %822 }
 0x160   :  { %452 = vxpose.xlu2.b32.cont [4/8] (short) (narrow) %v3375_v40, 8 }
 0x161   :  { %3088 = vset.pattern.permute.xlu1 %v3177_v62  ;;  %3109 = vset.pattern.permute.xlu0 %v4767_v42 }
 0x162   :  { %964 = vperm.xlu1 %3088, %v3375_v40   ;;  %842 = vperm.xlu0 %3109, %v3361_v12  }
 0x164   :  { %v3528_v33 = vpop.permute.xlu1 %952  ;;  %v3542_v37 = vpop.permute.xlu0 %494 }
 0x168   :  { %453 = vxpose.xlu2.b32.cont [5/8] (short) (narrow) %v3377_v41, 8  ;;  %v3612_v6 = vpop.permute.xlu2 %889 }
 0x16a   :  { %3089 = vset.pattern.permute.xlu1 %v4769_v16  ;;  %3116 = vset.pattern.permute.xlu0 %v3170_v14 }
 0x16b   :  { %504 = vperm.xlu1 %3089, %v3377_v41   ;;  %779 = vperm.xlu0 %3116, %v3369_v38  }
 0x16d   :  { %v3537_v36 = vpop.permute.xlu1 %554 }
 0x16e   :  { %v3552_v45 = vpop.permute.xlu0 %692 }
 0x170   :  { %454 = vxpose.xlu2.b32.cont [6/8] (short) (narrow) %v3364_v30, 8 }
 0x171   :  { %v3621_v9 = vpop.permute.xlu2 %767 }
 0x173   :  { %3091 = vset.pattern.permute.xlu1 %v4768_v15  ;;  %3117 = vset.pattern.permute.xlu0 %v3177_v62 }
 0x174   :  { %633 = vperm.xlu1 %3091, %v3377_v41   ;;  %968 = vperm.xlu0 %3117, %v3377_v41  }
 0x177   :  { %v3546_v39 = vpop.permute.xlu1 %956  ;;  %v3559_v47 = vpop.permute.xlu0 %960 }
 0x178   :  { %455 = vxpose.xlu2.b32.cont [7/8] (short) (narrow) %v3361_v12, 8 }
 0x17b   :  { %v3632_v20 = vpop.permute.xlu2 %909 }
 0x17c   :  { %3092 = vset.pattern.permute.xlu1 %v4766_v43  ;;  %980 = vperm.xlu0 %3117, %v3369_v38   ;;  %4835 = vst [vmem:[#allocation17_spill] sm:$0xff] %v3632_v20 }
 0x17d   :  { %700 = vperm.xlu1 %3092, %v3377_v41  }
 0x180   :  { %456 = vxpose.xlu2.b32.end [8/8] (short) (narrow) %v3369_v38, 8  ;;  %v3555_v46 = vpop.permute.xlu1 %558 }
 0x181   :  { %v3567_v50 = vpop.permute.xlu0 %499 }
 0x185   :  { %3094 = vset.pattern.permute.xlu1 %v4767_v42 }
 0x186   :  { %834 = vperm.xlu1 %3094, %v3377_v41  }
 0x18a   :  { %v3563_v49 = vpop.permute.xlu1 %625  ;;  %v3575_v55 = vpop.permute.xlu0 %629 }
 0x18e   :  { %3095 = vset.pattern.permute.xlu1 %v4765_v54 }
 0x18f   :  { %901 = vperm.xlu1 %3095, %v3377_v41  }
 0x193   :  { %v3571_v52 = vpop.permute.xlu1 %759 }
 0x194   :  { %v3583_v58 = vpop.permute.xlu0 %897 }
 0x197   :  { %3097 = vset.pattern.permute.xlu1 %v4771_v44  ;;  %v3675_v44 = vstv %s3024_s21 }
 0x198   :  { %570 = vperm.xlu1 %3097, %v3364_v30  }
 0x19d   :  { %v3579_v57 = vpop.permute.xlu1 %826 }
 0x19e   :  { %v3593_v0 = vpop.permute.xlu0 %566 }
 0x1a0   :  { %3099 = vset.pattern.permute.xlu1 %v4766_v43 }
 0x1a1   :  { %704 = vperm.xlu1 %3099, %v3364_v30  }
 0x1a6   :  { %v3585_v59 = vpop.permute.xlu1 %893 }
 0x1a7   :  { %v3601_v3 = vpop.permute.xlu0 %509 }
 0x1a8   :  { %4831 = vst [vmem:[#allocation13_spill] sm:$0xff] %v3601_v3  ;;  %v4840_v3 = vmov 0  }
 0x1a9   :  { %3100 = vset.pattern.permute.xlu1 %v3170_v14 }
 0x1aa   :  { %771 = vperm.xlu1 %3100, %v3364_v30  }
 0x1af   :  { %v3591_v63 = vpop.permute.xlu1 %562 }
 0x1b0   :  { %v3609_v5 = vpop.permute.xlu0 %637 }
 0x1b1   :  { %4832 = vst [vmem:[#allocation14_spill] sm:$0xff] %v3609_v5 }
 0x1b2   :  { %3101 = vset.pattern.permute.xlu1 %v4767_v42  ;;  %v1043_v42 = vpack.c.b16 %v1033_v23, %v1033_v23 }
 0x1b3   :  { %838 = vperm.xlu1 %3101, %v3364_v30  }
 0x1b8   :  { %v3599_v2 = vpop.permute.xlu1 %696 }
 0x1b9   :  { %v3618_v8 = vpop.permute.xlu0 %905 }
 0x1ba   :  { %4833 = vst [vmem:[#allocation15_spill] sm:$0xff] %v3618_v8 }
 0x1bb   :  { %3103 = vset.pattern.permute.xlu1 %v3177_v62 }
 0x1bc   :  { %972 = vperm.xlu1 %3103, %v3364_v30  }
 0x1c1   :  { %v3607_v14 = vpop.permute.xlu1 %763 }
 0x1c2   :  { %v3630_v19 = vpop.permute.xlu0 %574 }
 0x1c3   :  { %4834 = vst [vmem:[#allocation16_spill] sm:$0xff] %v3630_v19  ;;  %v3706_v19 = vstv %s3662_s24 }
 0x1c4   :  { %3104 = vset.pattern.permute.xlu1 %v4769_v16 }
 0x1c5   :  { %514 = vperm.xlu1 %3104, %v3361_v12  }
 0x1cb   :  { %v3615_v7 = vpop.permute.xlu1 %830  ;;  %v3644_v25 = vpop.permute.xlu0 %775 }
 0x1cc   :  { %4837 = vst [vmem:[#allocation19_spill] sm:$0xff] %v3644_v25 }
 0x1cd   :  { %3106 = vset.pattern.permute.xlu1 %v4768_v15 }
 0x1ce   :  { %641 = vperm.xlu1 %3106, %v3361_v12  }
 0x1d4   :  { %v3623_v17 = vpop.permute.xlu1 %964 }
 0x1d6   :  { %3107 = vset.pattern.permute.xlu1 %v4766_v43 }
 0x1d7   :  { %708 = vperm.xlu1 %3107, %v3361_v12  }
 0x1dd   :  { %v3634_v21 = vpop.permute.xlu1 %504 }
 0x1df   :  { %3112 = vset.pattern.permute.xlu1 %v4769_v16  ;;  %v3671_v16 = vstv %s481_s20 }
 0x1e0   :  { %519 = vperm.xlu1 %3112, %v3369_v38  }
 0x1e1   :  { %v3642_v24 = vpop.trf.xlu2 }
 0x1e2   :  { %4836 = vst [vmem:[#allocation18_spill] sm:$0xff] %v3642_v24  ;;  %v3647_v28 = vperm.slane %v3642_v24, 0  ;;  %v3650_v29 = vperm.slane %v3642_v24, 1  ;;  %v3653_v10 = vperm.slane %v3642_v24, 2  ;;  %v3656_v11 = vperm.slane %v3642_v24, 3  ;;  %3111 = vset.pattern.permute.xlu2 %v3177_v62 }
 0x1e3   :  { %v3660_v18 = vperm.slane %v3642_v24, 4  ;;  %v3669_v15 = vperm.slane %v3642_v24, 5  ;;  %v3688_v61 = vperm.slane %v3642_v24, 6  ;;  %v3693_v20 = vperm.slane %v3642_v24, 7  ;;  %v3703_v24 = vpop.permute.xlu0 %842 }
 0x1e4   :  { %v525_v54 = vsub.f32 %v3542_v37, %v3647_v28  ;;  %v584_v43 = vsub.f32 %v3555_v46, %v3650_v29  ;;  %v651_v62 = vsub.f32 %v3563_v49, %v3653_v10  ;;  %v718_v37 = vsub.f32 %v3552_v45, %v3656_v11  ;;  %4839 = vst [vmem:[#allocation20_spill] sm:$0xff] %v3703_v24 }
 0x1e5   :  { %v3683_v46 = vstv %s3025_s22  ;;  %v785_v40 = vsub.f32 %v3571_v52, %v3660_v18  ;;  %v4838_v49 = vmov 1   ;;  %v852_v45 = vsub.f32 %v3579_v57, %v3669_v15 }
 0x1e6   :  { %v3677_v30 = vpop.permute.xlu1 %633  ;;  %v533_v41 = vand.u32 2147483647, %v525_v54  ;;  %v592_v23 = vand.u32 2147483647, %v584_v43  ;;  %v659_v35 = vand.u32 2147483647, %v651_v62  ;;  %v1044_v54 = vpack.c.b8 %v1043_v42, %v1043_v42 }
 0x1e7   :  { %v3700_v52 = vstv %s3026_s23  ;;  %v860_v57 = vand.u32 2147483647, %v852_v45  ;;  %v986_v5 = vsub.f32 %v3559_v47, %v3693_v20  ;;  %v3719_v24 = vstv %s3029_s26 }
 0x1e8   :  { %3113 = vset.pattern.permute.xlu1 %v4838_v49  ;;  %v542_v53 = vmul.f32 %v3671_v16, %v533_v41  ;;  %v601_v43 = vmul.f32 %v3675_v44, %v592_v23  ;;  %v726_v41 = vand.u32 2147483647, %v718_v37  ;;  %v668_v42 = vmul.f32 %v3683_v46, %v659_v35 }
 0x1e9   :  { %578 = vperm.xlu1 %3113, %v3369_v38   ;;  %976 = vperm.xlu2 %3111, %v3361_v12   ;;  %v793_v49 = vand.u32 2147483647, %v785_v40  ;;  %v919_v12 = vsub.f32 %v3585_v59, %v3688_v61  ;;  %vm1057_vm2 = vnez %v1044_v54  ;;  %v3714_v37 = vstv %s3679_s25 }
 0x1ea   :  { %v609_v62 = vadd.f32 %v601_v43, %v542_v53  ;;  %v735_v8 = vmul.f32 %v3700_v52, %v726_v41  ;;  %v1065_v59 = vsel %vm1057_vm2, 16843009, %v4840_v3  ;;  %v527_v54 = vsub.f32 %v3634_v21, %v3647_v28 }
 0x1eb   :  { %v802_v40 = vmul.f32 %v3706_v19, %v793_v49  ;;  %v927_v43 = vand.u32 2147483647, %v919_v12  ;;  %v4841_v41 = vmov 2   ;;  %v4842_v45 = vmov 5  }
 0x1ec   :  { %v676_v23 = vadd.f32 %v668_v42, %v609_v62  ;;  %v869_v62 = vmul.f32 %v3714_v37, %v860_v57  ;;  %v994_v42 = vand.u32 2147483647, %v986_v5  ;;  %v3729_v49 = vstv %s3030_s27 }
 0x1ed   :  { %v936_v21 = vmul.f32 %v3719_v24, %v927_v43  ;;  %v583_v57 = vsub.f32 %v3537_v36, %v3650_v29  ;;  %v535_v5 = vand.u32 2147483647, %v527_v54  ;;  %v653_v25 = vsub.f32 %v3677_v30, %v3653_v10 }
 0x1ee   :  { %v743_v35 = vadd.f32 %v735_v8, %v676_v23  ;;  %v586_v8 = vsub.f32 %v3593_v0, %v3650_v29  ;;  %v1073_v23 = vunpack.c.0.s8 %v1065_v59  ;;  %v1003_v0 = vmul.f32 %v3729_v49, %v994_v42 }
 0x1ef   :  { %v3716_v53 = vpop.permute.xlu1 %700  ;;  %v591_v59 = vand.u32 2147483647, %v583_v57  ;;  %v544_v36 = vmul.f32 %v3671_v16, %v535_v5  ;;  %v650_v30 = vsub.f32 %v3531_v34, %v3653_v10  ;;  %v582_v57 = vsub.f32 %v3521_v32, %v3650_v29 }
 0x1f0   :  { %v810_v47 = vadd.f32 %v802_v40, %v743_v35  ;;  %v3739_v40 = vpop.permute.xlu0 %779  ;;  %vm3745_vm3 = vcmp.ne.s32.totalorder %v1073_v23, 0  ;;  %v661_v23 = vand.u32 2147483647, %v653_v25  ;;  %v649_v5 = vsub.f32 %v3503_v13, %v3653_v10 }
 0x1f1   :  { %3114 = vset.pattern.permute.xlu1 %v4841_v41  ;;  %3118 = vset.pattern.permute.xlu2 %v4842_v45  ;;  %v524_v41 = vsub.f32 %v3577_v56, %v3647_v28  ;;  %v594_v45 = vand.u32 2147483647, %v586_v8  ;;  %v4846_v8 = vmov 6   ;;  %v720_v34 = vsub.f32 %v3716_v53, %v3656_v11 }
 0x1f2   :  { %645 = vperm.xlu1 %3114, %v3369_v38   ;;  %846 = vperm.xlu2 %3118, %v3369_v38   ;;  %v877_v12 = vadd.f32 %v869_v62, %v810_v47  ;;  %v787_v32 = vsub.f32 %v3621_v9, %v3660_v18  ;;  %v658_v13 = vand.u32 2147483647, %v650_v30  ;;  %v784_v53 = vsub.f32 %v3595_v1, %v3660_v18 }
 0x1f3   :  { %v532_v56 = vand.u32 2147483647, %v524_v41  ;;  %v603_v42 = vmul.f32 %v3675_v44, %v594_v45  ;;  %v728_v9 = vand.u32 2147483647, %v720_v34 }
 0x1f4   :  { %v944_v35 = vadd.f32 %v936_v21, %v877_v12  ;;  %v4845_v12 = vmov 3   ;;  %v523_v21 = vsub.f32 %v3512_v27, %v3647_v28 }
 0x1f5   :  { %v541_v25 = vmul.f32 %v3671_v16, %v532_v56 }
 0x1f6   :  { %v1011_v47 = vadd.f32 %v1003_v0, %v944_v35  ;;  %v600_v35 = vmul.f32 %v3675_v44, %v591_v59  ;;  %v717_v0 = vsub.f32 %v3587_v60, %v3656_v11  ;;  %v531_v45 = vand.u32 2147483647, %v523_v21 }
 0x1f7   :  { %v716_v60 = vsub.f32 %v3510_v26, %v3656_v11  ;;  %v670_v21 = vmul.f32 %v3683_v46, %v661_v23  ;;  %v783_v23 = vsub.f32 %v3561_v48, %v3660_v18  ;;  %v985_v48 = vsub.f32 %v3546_v39, %v3693_v20 }
 0x1f8   :  { %v3743_v62 = vpop.permute.xlu1 %834  ;;  %v1019_v54 = vmax.f32 %v1011_v47, 0.0  ;;  %v590_v47 = vand.u32 2147483647, %v582_v57  ;;  %v540_v56 = vmul.f32 %v3671_v16, %v531_v45  ;;  %v3786_v57 = vpop.permute.xlu0 %968  ;;  %v608_v30 = vadd.f32 %v600_v35, %v541_v25 }
 0x1f9   :  { %v725_v1 = vand.u32 2147483647, %v717_v0  ;;  %v988_v26 = vsub.f32 %v3786_v57, %v3693_v20  ;;  %v3801_v25 = vmul.f32 %v3700_v52, %v728_v9 }
 0x1fa   :  { %3115 = vset.pattern.permute.xlu1 %v4845_v12  ;;  %3119 = vset.pattern.permute.xlu2 %v4846_v8  ;;  %v3761_v41 = vsel %vm3745_vm3, %v1019_v54, -1e+30  ;;  %v851_v54 = vsub.f32 %v3603_v4, %v3669_v15  ;;  %v599_v59 = vmul.f32 %v3675_v44, %v590_v47  ;;  %v657_v12 = vand.u32 2147483647, %v649_v5 }
 0x1fb   :  { %712 = vperm.xlu1 %3115, %v3369_v38   ;;  %913 = vperm.xlu2 %3119, %v3369_v38   ;;  %v1102_v27 = vsel %vm1095_vm4, %v3761_v41, -inf  ;;  %v611_v8 = vadd.f32 %v603_v42, %v544_v36  ;;  %v918_v4 = vsub.f32 %v3612_v6, %v3688_v61  ;;  %v667_v47 = vmul.f32 %v3683_v46, %v658_v13 }
 0x1fc   :  { %1103 = vmax.xlane.f32.xlu0 %v1102_v27  ;;  %v607_v45 = vadd.f32 %v599_v59, %v540_v56  ;;  %v792_v5 = vand.u32 2147483647, %v784_v53  ;;  %v859_v38 = vand.u32 2147483647, %v851_v54  ;;  %v666_v36 = vmul.f32 %v3683_v46, %v657_v12 }
 0x1fd   :  { %v724_v42 = vand.u32 2147483647, %v716_v60  ;;  %v3798_v34 = vadd.f32 %v670_v21, %v611_v8  ;;  %v3803_v6 = vand.u32 2147483647, %v787_v32  ;;  %v675_v35 = vadd.f32 %v667_v47, %v608_v30 }
 0x1fe   :  { %v734_v0 = vmul.f32 %v3700_v52, %v725_v1  ;;  %v926_v13 = vand.u32 2147483647, %v918_v4  ;;  %v1032_v53 = vunpack.c.1.s8 %v3637_v22  ;;  %v674_v54 = vadd.f32 %v666_v36, %v607_v45 }
 0x1ff   :  { %v801_v56 = vmul.f32 %v3706_v19, %v792_v5  ;;  %v868_v59 = vmul.f32 %v3714_v37, %v859_v38  ;;  %v526_v12 = vsub.f32 %v3567_v50, %v3647_v28  ;;  %v733_v32 = vmul.f32 %v3700_v52, %v724_v42 }
 0x200   :  { %v791_v60 = vand.u32 2147483647, %v783_v23  ;;  %v850_v8 = vsub.f32 %v3569_v51, %v3669_v15  ;;  %v585_v21 = vsub.f32 %v3591_v63, %v3650_v29  ;;  %v742_v9 = vadd.f32 %v734_v0, %v675_v35 }
 0x201   :  { %v3788_v27 = vpop.permute.xlu1 %901  ;;  %v1031_v30 = vunpack.c.0.s8 %v3637_v22  ;;  %v534_v1 = vand.u32 2147483647, %v526_v12  ;;  %v652_v38 = vsub.f32 %v3575_v55, %v3653_v10  ;;  %v1041_v39 = vpack.c.b16 %v1032_v53, %v1032_v53 }
 0x202   :  { %v741_v4 = vadd.f32 %v733_v32, %v674_v54  ;;  %v593_v45 = vand.u32 2147483647, %v585_v21  ;;  %v719_v50 = vsub.f32 %v3599_v2, %v3656_v11  ;;  %v917_v51 = vsub.f32 %v3519_v31, %v3688_v61 }
 0x203   :  { %v543_v63 = vmul.f32 %v3671_v16, %v534_v1  ;;  %v660_v5 = vand.u32 2147483647, %v652_v38  ;;  %v786_v36 = vsub.f32 %v3607_v14, %v3660_v18  ;;  %v800_v42 = vmul.f32 %v3706_v19, %v791_v60 }
 0x204   :  { %v858_v55 = vand.u32 2147483647, %v850_v8  ;;  %v602_v23 = vmul.f32 %v3675_v44, %v593_v45  ;;  %v853_v35 = vsub.f32 %v3615_v7, %v3669_v15  ;;  %v809_v2 = vadd.f32 %v801_v56, %v742_v9 }
 0x205   :  { %v935_v0 = vmul.f32 %v3719_v24, %v926_v13  ;;  %v1039_v53 = vpack.c.b16 %v1031_v30, %v1031_v30  ;;  %v727_v54 = vand.u32 2147483647, %v719_v50  ;;  %v808_v31 = vadd.f32 %v800_v42, %v741_v4  ;;  %v1026_v30 = vld [vmem:[%s4761_s3 + $0x8] sm:$0xff] }
 0x206   :  { %v610_v12 = vadd.f32 %v602_v23, %v543_v63  ;;  %v669_v32 = vmul.f32 %v3683_v46, %v660_v5  ;;  %v794_v21 = vand.u32 2147483647, %v786_v36  ;;  %v1042_v1 = vpack.c.b8 %v1041_v39, %v1041_v39 }
 0x207   :  { %v925_v14 = vand.u32 2147483647, %v917_v51  ;;  %v984_v60 = vsub.f32 %v3528_v33, %v3693_v20  ;;  %v920_v8 = vsub.f32 %v3583_v58, %v3688_v61  ;;  %v867_v7 = vmul.f32 %v3714_v37, %v858_v55 }
 0x208   :  { %v677_v56 = vadd.f32 %v669_v32, %v610_v12  ;;  %v736_v13 = vmul.f32 %v3700_v52, %v727_v54  ;;  %v861_v9 = vand.u32 2147483647, %v853_v35  ;;  %v876_v38 = vadd.f32 %v868_v59, %v809_v2 }
 0x209   :  { %v1040_v4 = vpack.c.b8 %v1039_v53, %v1039_v53  ;;  %v987_v39 = vsub.f32 %v3623_v17, %v3693_v20  ;;  %v1034_v33 = vunpack.c.3.s8 %v3637_v22  ;;  %v875_v45 = vadd.f32 %v867_v7, %v808_v31 }
 0x20a   :  { %v3823_v47 = vpop.permute.xlu1 %570  ;;  %v744_v50 = vadd.f32 %v736_v13, %v677_v56  ;;  %v803_v58 = vmul.f32 %v3706_v19, %v794_v21  ;;  %v928_v51 = vand.u32 2147483647, %v920_v8  ;;  %v993_v63 = vand.u32 2147483647, %v985_v48 }
 0x20b   :  { %vm3849_vm5 = vnez %v1042_v1  ;;  %v934_v36 = vmul.f32 %v3719_v24, %v925_v14  ;;  %vm1028_vm6 = vnez %v1026_v30  ;;  %v992_v42 = vand.u32 2147483647, %v984_v60 }
 0x20c   :  { %v811_v55 = vadd.f32 %v803_v58, %v744_v50  ;;  %v870_v17 = vmul.f32 %v3714_v37, %v861_v9  ;;  %v995_v22 = vand.u32 2147483647, %v987_v39  ;;  %v854_v23 = vsub.f32 %v3743_v62, %v3669_v15  ;;  %v4849_v62 = vld [vmem:[#allocation19_spill] sm:$0xff] }
 0x20d   :  { %v943_v35 = vadd.f32 %v935_v0, %v876_v38  ;;  %vm1055_vm7 = vnez %v1040_v4  ;;  %v1045_v48 = vpack.c.b16 %v1034_v33, %v1034_v33  ;;  %v942_v2 = vadd.f32 %v934_v36, %v875_v45  ;;  %v4850_v33 = vld [vmem:[#allocation13_spill] sm:$0xff] }
 0x20e   :  { %v878_v53 = vadd.f32 %v870_v17, %v811_v55  ;;  %v937_v54 = vmul.f32 %v3719_v24, %v928_v51  ;;  %v3861_v31 = vsel %vm1028_vm6, 16843009, %v4840_v3  ;;  %v921_v12 = vsub.f32 %v3788_v27, %v3688_v61 }
 0x20f   :  { %v1002_v32 = vmul.f32 %v3729_v49, %v993_v63  ;;  %v1064_v21 = vsel %vm3849_vm5, 16843009, %v4840_v3  ;;  %v789_v0 = vsub.f32 %v4849_v62, %v3660_v18  ;;  %v1001_v1 = vmul.f32 %v3729_v49, %v992_v42 }
 0x210   :  { %v1063_v14 = vsel %vm1055_vm7, 16843009, %v4840_v3  ;;  %v945_v60 = vadd.f32 %v937_v54, %v878_v53  ;;  %v1004_v8 = vmul.f32 %v3729_v49, %v995_v22  ;;  %v1046_v56 = vpack.c.b8 %v1045_v48, %v1045_v48 }
 0x211   :  { %v1010_v7 = vadd.f32 %v1002_v32, %v943_v35  ;;  %v1035_v27 = vunpack.c.0.s8 %v3861_v31  ;;  %v797_v13 = vand.u32 2147483647, %v789_v0  ;;  %v587_v9 = vsub.f32 %v3823_v47, %v3650_v29  ;;  %v4851_v47 = vld [vmem:[#allocation14_spill] sm:$0xff] }
 0x212   :  { %v1072_v30 = vunpack.c.0.s8 %v1064_v21  ;;  %v1009_v38 = vadd.f32 %v1001_v1, %v942_v2  ;;  %v1012_v4 = vadd.f32 %v1004_v8, %v945_v60  ;;  %v745_v39 = vadd.f32 %v3801_v25, %v3798_v34 }
 0x213   :  { %v3854_v59 = vpop.permute.xlu1 %704  ;;  %v528_v45 = vsub.f32 %v4850_v33, %v3647_v28  ;;  %v1071_v50 = vunpack.c.0.s8 %v1063_v14  ;;  %v3882_v58 = vmul.f32 %v3706_v19, %v797_v13  ;;  %v804_v51 = vmul.f32 %v3706_v19, %v3803_v6 }
 0x214   :  { %v862_v63 = vand.u32 2147483647, %v854_v23  ;;  %v929_v5 = vand.u32 2147483647, %v921_v12  ;;  %v654_v36 = vsub.f32 %v4851_v47, %v3653_v10  ;;  %v1018_v55 = vmax.f32 %v1010_v7, 0.0 }
 0x215   :  { %vm1058_vm8 = vnez %v1046_v56  ;;  %v1047_v17 = vpack.c.b16 %v1035_v27, %v1035_v27  ;;  %v790_v34 = vsub.f32 %v3739_v40, %v3660_v18  ;;  %v595_v25 = vand.u32 2147483647, %v587_v9 }
 0x216   :  { %vm3891_vm9 = vcmp.ne.s32.totalorder %v1072_v30, 0  ;;  %v1017_v6 = vmax.f32 %v1009_v38, 0.0  ;;  %v812_v23 = vadd.f32 %v804_v51, %v745_v39  ;;  %v536_v48 = vand.u32 2147483647, %v528_v45 }
 0x217   :  { %vm3895_vm10 = vcmp.ne.s32.totalorder %v1071_v50, 0  ;;  %v798_v53 = vand.u32 2147483647, %v790_v34  ;;  %v871_v54 = vmul.f32 %v3714_v37, %v862_v63  ;;  %v721_v40 = vsub.f32 %v3854_v59, %v3656_v11  ;;  %v4858_v34 = vld [vmem:[#allocation15_spill] sm:$0xff] }
 0x218   :  { %v3905_v32 = vsel %vm3891_vm9, %v1018_v55, -1e+30  ;;  %v1048_v21 = vpack.c.b8 %v1047_v17, %v1047_v17  ;;  %v1036_v62 = vunpack.c.1.s8 %v3861_v31  ;;  %v938_v1 = vmul.f32 %v3719_v24, %v929_v5 }
 0x219   :  { %v3909_v0 = vmul.f32 %v3706_v19, %v798_v53  ;;  %v604_v14 = vmul.f32 %v3675_v44, %v595_v25  ;;  %v3916_v59 = vsel %vm3895_vm10, %v1017_v6, -1e+30  ;;  %v996_v8 = vand.u32 2147483647, %v988_v26 }
 0x21a   :  { %v662_v7 = vand.u32 2147483647, %v654_v36  ;;  %v879_v27 = vadd.f32 %v871_v54, %v812_v23  ;;  %v545_v13 = vmul.f32 %v3671_v16, %v536_v48  ;;  %v729_v9 = vand.u32 2147483647, %v721_v40 }
 0x21b   :  { %v1099_v30 = vsel %vm1095_vm4, %v3905_v32, -inf  ;;  %vm1059_vm11 = vnez %v1048_v21  ;;  %v1049_v38 = vpack.c.b16 %v1036_v62, %v1036_v62  ;;  %v1020_v57 = vmax.f32 %v1012_v4, 0.0 }
 0x21c   :  { %v772_v42 = vpop.permute.xlu1 %771  ;;  %v946_v39 = vadd.f32 %v938_v1, %v879_v27  ;;  %v612_v33 = vadd.f32 %v604_v14, %v545_v13  ;;  %v1005_v51 = vmul.f32 %v3729_v49, %v996_v8  ;;  %v671_v63 = vmul.f32 %v3683_v46, %v662_v7 }
 0x21d   :  { %v788_v22 = vsub.f32 %v772_v42, %v3660_v18  ;;  %v1066_v18 = vsel %vm1058_vm8, 16843009, %v4840_v3  ;;  %v738_v5 = vmul.f32 %v3700_v52, %v729_v9  ;;  %v1067_v47 = vsel %vm1059_vm11, 16843009, %v4840_v3 }
 0x21e   :  { %v1074_v56 = vunpack.c.0.s8 %v1066_v18  ;;  %v1050_v42 = vpack.c.b8 %v1049_v38, %v1049_v38  ;;  %v679_v55 = vadd.f32 %v671_v63, %v612_v33  ;;  %v1013_v17 = vadd.f32 %v1005_v51, %v946_v39 }
 0x21f   :  { %v796_v12 = vand.u32 2147483647, %v788_v22  ;;  %v922_v25 = vsub.f32 %v4858_v34, %v3688_v61  ;;  %v1075_v22 = vunpack.c.0.s8 %v1067_v47 }
 0x220   :  { %vm3927_vm12 = vcmp.ne.s32.totalorder %v1074_v56, 0  ;;  %v746_v6 = vadd.f32 %v738_v5, %v679_v55  ;;  %vm1060_vm13 = vnez %v1050_v42  ;;  %v1021_v54 = vmax.f32 %v1013_v17, 0.0 }
 0x221   :  { %v805_v60 = vmul.f32 %v3706_v19, %v796_v12  ;;  %v1096_v19 = vsel %vm1095_vm4, %v3916_v59, -inf  ;;  %v3937_v4 = vsel %vm3927_vm12, %v1020_v57, -1e+30  ;;  %v930_v40 = vand.u32 2147483647, %v922_v25 }
 0x222   :  { %v1105_v48 = vsel %vm1095_vm4, %v3937_v4, -inf  ;;  %vm3944_vm14 = vcmp.ne.s32.totalorder %v1075_v22, 0  ;;  %v1068_v1 = vsel %vm1060_vm13, 16843009, %v4840_v3  ;;  %v1037_v5 = vunpack.c.2.s8 %v3861_v31 }
 0x223   :  { %v813_v53 = vadd.f32 %v805_v60, %v746_v6  ;;  %v3952_v8 = vsel %vm3944_vm14, %v1021_v54, -1e+30  ;;  %v939_v60 = vmul.f32 %v3719_v24, %v930_v40  ;;  %v1076_v7 = vunpack.c.0.s8 %v1068_v1 }
 0x224   :  { %1100 = vmax.xlane.f32.xlu2 %v1099_v30  ;;  %v1108_v13 = vsel %vm1095_vm4, %v3952_v8, -inf  ;;  %v1051_v55 = vpack.c.b16 %v1037_v5, %v1037_v5 }
 0x225   :  { %v839_v45 = vpop.permute.xlu1 %838  ;;  %1097 = vmax.xlane.f32.xlu1 %v1096_v19  ;;  %vm3958_vm15 = vcmp.ne.s32.totalorder %v1076_v7, 0 }
 0x226   :  { %v855_v26 = vsub.f32 %v839_v45, %v3669_v15  ;;  %v1052_v54 = vpack.c.b8 %v1051_v55, %v1051_v55 }
 0x228   :  { %v863_v36 = vand.u32 2147483647, %v855_v26  ;;  %v4863_v26 = vld [vmem:[#allocation16_spill] sm:$0xff]  ;;  %vm1061_vm0 = vnez %v1052_v54 }
 0x229   :  { %v588_v51 = vsub.f32 %v4863_v26, %v3650_v29 }
 0x22a   :  { %v872_v23 = vmul.f32 %v3714_v37, %v863_v36 }
 0x22b   :  { %v596_v36 = vand.u32 2147483647, %v588_v51 }
 0x22c   :  { %v880_v21 = vadd.f32 %v872_v23, %v813_v53  ;;  %v4864_v23 = vld [vmem:[#allocation20_spill] sm:$0xff] }
 0x22d   :  { %1106 = vmax.xlane.f32.xlu1 %v1105_v48  ;;  %v605_v25 = vmul.f32 %v3675_v44, %v596_v36  ;;  %v856_v48 = vsub.f32 %v4864_v23, %v3669_v15  ;;  %v1038_v23 = vunpack.c.3.s8 %v3861_v31 }
 0x22e   :  { %v973_v12 = vpop.permute.xlu1 %972  ;;  %v947_v27 = vadd.f32 %v939_v60, %v880_v21  ;;  %v4865_v21 = vld [vmem:[#allocation17_spill] sm:$0xff] }
 0x22f   :  { %v989_v62 = vsub.f32 %v973_v12, %v3693_v20  ;;  %v864_v7 = vand.u32 2147483647, %v856_v48 }
 0x231   :  { %v997_v14 = vand.u32 2147483647, %v989_v62  ;;  %v923_v62 = vsub.f32 %v4865_v21, %v3688_v61 }
 0x233   :  { %v1006_v56 = vmul.f32 %v3729_v49, %v997_v14 }
 0x235   :  { %1109 = vmax.xlane.f32.xlu1 %v1108_v13  ;;  %v1014_v9 = vadd.f32 %v1006_v56, %v947_v27  ;;  %v931_v27 = vand.u32 2147483647, %v923_v62 }
 0x237   :  { %v515_v19 = vpop.permute.xlu1 %514  ;;  %v1022_v38 = vmax.f32 %v1014_v9, 0.0 }
 0x238   :  { %v529_v45 = vsub.f32 %v515_v19, %v3647_v28 }
 0x239   :  { %v3964_v39 = vsel %vm3958_vm15, %v1022_v38, -1e+30  ;;  %v873_v38 = vmul.f32 %v3714_v37, %v864_v7 }
 0x23a   :  { %v1111_v33 = vsel %vm1095_vm4, %v3964_v39, -inf  ;;  %v537_v47 = vand.u32 2147483647, %v529_v45 }
 0x23c   :  { %v546_v17 = vmul.f32 %v3671_v16, %v537_v47 }
 0x23d   :  { %1112 = vmax.xlane.f32.xlu1 %v1111_v33  ;;  %v1069_v33 = vsel %vm1061_vm0, 16843009, %v4840_v3 }
 0x23e   :  { %v613_v40 = vadd.f32 %v605_v25, %v546_v17  ;;  %v1077_v26 = vunpack.c.0.s8 %v1069_v33 }
 0x240   :  { %v642_v57 = vpop.permute.xlu1 %641  ;;  %vm3988_vm1 = vcmp.ne.s32.totalorder %v1077_v26, 0 }
 0x241   :  { %v655_v63 = vsub.f32 %v642_v57, %v3653_v10  ;;  %v940_v57 = vmul.f32 %v3719_v24, %v931_v27 }
 0x243   :  { %v663_v42 = vand.u32 2147483647, %v655_v63  ;;  %v977_v53 = vpop.permute.xlu2 %976 }
 0x244   :  { %v990_v14 = vsub.f32 %v977_v53, %v3693_v20 }
 0x245   :  { %v672_v22 = vmul.f32 %v3683_v46, %v663_v42 }
 0x246   :  { %v998_v13 = vand.u32 2147483647, %v990_v14 }
 0x247   :  { %v680_v1 = vadd.f32 %v672_v22, %v613_v40  ;;  %v1053_v40 = vpack.c.b16 %v1038_v23, %v1038_v23 }
 0x248   :  { %v1007_v51 = vmul.f32 %v3729_v49, %v998_v13 }
 0x249   :  { %v709_v34 = vpop.permute.xlu1 %708 }
 0x24a   :  { %v722_v6 = vsub.f32 %v709_v34, %v3656_v11 }
 0x24c   :  { %v730_v12 = vand.u32 2147483647, %v722_v6  ;;  %v847_v17 = vpop.permute.xlu2 %846 }
 0x24e   :  { %v739_v60 = vmul.f32 %v3700_v52, %v730_v12 }
 0x250   :  { %v747_v56 = vadd.f32 %v739_v60, %v680_v1  ;;  %v857_v1 = vsub.f32 %v847_v17, %v3669_v15  ;;  %v981_v60 = vpop.permute.xlu0 %980 }
 0x251   :  { %v991_v27 = vsub.f32 %v981_v60, %v3693_v20 }
 0x252   :  { %v814_v9 = vadd.f32 %v3882_v58, %v747_v56  ;;  %v520_v19 = vpop.permute.xlu1 %519  ;;  %v865_v13 = vand.u32 2147483647, %v857_v1 }
 0x253   :  { %v530_v22 = vsub.f32 %v520_v19, %v3647_v28 }
 0x254   :  { %v881_v45 = vadd.f32 %v873_v38, %v814_v9 }
 0x255   :  { %v538_v53 = vand.u32 2147483647, %v530_v22  ;;  %v914_v21 = vpop.permute.xlu2 %913 }
 0x256   :  { %v948_v63 = vadd.f32 %v940_v57, %v881_v45  ;;  %v924_v31 = vsub.f32 %v914_v21, %v3688_v61 }
 0x257   :  { %v547_v14 = vmul.f32 %v3671_v16, %v538_v53  ;;  %v999_v16 = vand.u32 2147483647, %v991_v27 }
 0x258   :  { %v1015_v5 = vadd.f32 %v1007_v51, %v948_v63  ;;  %v932_v15 = vand.u32 2147483647, %v924_v31 }
 0x259   :  { %v1008_v20 = vmul.f32 %v3729_v49, %v999_v16 }
 0x25a   :  { %v1023_v36 = vmax.f32 %v1015_v5, 0.0  ;;  %v941_v61 = vmul.f32 %v3719_v24, %v932_v15 }
 0x25b   :  { %v579_v42 = vpop.permute.xlu1 %578 }
 0x25c   :  { %v3994_v58 = vsel %vm3988_vm1, %v1023_v36, -1e+30  ;;  %v589_v34 = vsub.f32 %v579_v42, %v3650_v29 }
 0x25d   :  { %v1114_v55 = vsel %vm1095_vm4, %v3994_v58, -inf }
 0x25e   :  { %1115 = vmax.xlane.f32.xlu2 %v1114_v55  ;;  %v597_v48 = vand.u32 2147483647, %v589_v34 }
 0x260   :  { %v606_v12 = vmul.f32 %v3675_v44, %v597_v48 }
 0x262   :  { %v614_v7 = vadd.f32 %v606_v12, %v547_v14 }
 0x264   :  { %v646_v25 = vpop.permute.xlu1 %645 }
 0x265   :  { %v656_v6 = vsub.f32 %v646_v25, %v3653_v10  ;;  %v1054_v10 = vpack.c.b8 %v1053_v40, %v1053_v40 }
 0x267   :  { %v664_v54 = vand.u32 2147483647, %v656_v6  ;;  %vm1062_vm2 = vnez %v1054_v10 }
 0x268   :  { %v1070_v38 = vsel %vm1062_vm2, 16843009, %v4840_v3 }
 0x269   :  { %v673_v29 = vmul.f32 %v3683_v46, %v664_v54  ;;  %v874_v46 = vmul.f32 %v3714_v37, %v865_v13  ;;  %v1078_v45 = vunpack.c.0.s8 %v1070_v38 }
 0x26b   :  { %v681_v44 = vadd.f32 %v673_v29, %v614_v7  ;;  %vm4015_vm5 = vcmp.ne.s32.totalorder %v1078_v45, 0 }
 0x26d   :  { %v713_v62 = vpop.permute.xlu1 %712 }
 0x26e   :  { %v723_v28 = vsub.f32 %v713_v62, %v3656_v11 }
 0x26f   :  { %v1104_v3 = vpop.xlane.xlu0 %1103 }
 0x270   :  { %v731_v56 = vand.u32 2147483647, %v723_v28  ;;  %v1122_v49 = vsub.f32 %v3761_v41, %v1104_v3 }
 0x272   :  { %v740_v9 = vmul.f32 %v3700_v52, %v731_v56  ;;  %v1132_v17 = vmul.f32 1.442695, %v1122_v49 }
 0x274   :  { %v748_v19 = vadd.f32 %v740_v9, %v681_v44 }
 0x276   :  { %v815_v11 = vadd.f32 %v3909_v0, %v748_v19 }
 0x278   :  { %v882_v33 = vadd.f32 %v874_v46, %v815_v11 }
 0x27a   :  { %v949_v57 = vadd.f32 %v941_v61, %v882_v33 }
 0x27c   :  { %v1016_v26 = vadd.f32 %v1008_v20, %v949_v57 }
 0x27e   :  { %v1024_v51 = vmax.f32 %v1016_v26, 0.0 }
 0x280   :  { %v1094_v37 = vsel %vm4015_vm5, %v1024_v51, -1e+30 }
 0x281   :  { %v1117_v0 = vsel %vm1095_vm4, %v1094_v37, -inf }
 0x282   :  { %1118 = vmax.xlane.f32.xlu2 %v1117_v0 }
 0x297   :  { %v1101_v63 = vpop.xlane.xlu2 %1100 }
 0x298   :  { %v1098_v24 = vpop.xlane.xlu1 %1097  ;;  %v1121_v5 = vsub.f32 %v3905_v32, %v1101_v63 }
 0x299   :  { %v1120_v36 = vsub.f32 %v3916_v59, %v1098_v24 }
 0x29a   :  { %v1130_v42 = vmul.f32 1.442695, %v1121_v5 }
 0x29b   :  { %v1128_v55 = vmul.f32 1.442695, %v1120_v36 }
 0x29c   :  { %3121 = vpow2.f32 %v1130_v42 }
 0x29d   :  { %3123 = vpow2.f32 %v1128_v55 }
 0x29e   :  { %3125 = vpow2.f32 %v1132_v17 }
 0x2a0   :  { %v1107_v34 = vpop.xlane.xlu1 %1106 }
 0x2a1   :  { %v1123_v25 = vsub.f32 %v3937_v4, %v1107_v34 }
 0x2a2   :  { %v3122_v22 = vpop.eup %3121 }
 0x2a3   :  { %v3124_v6 = vpop.eup %3123  ;;  %v1134_v23 = vmul.f32 1.442695, %v1123_v25  ;;  %v4028_v48 = vsel %vm3891_vm9, %v3122_v22, 0.0 }
 0x2a4   :  { %v4032_v41 = vsel %vm3895_vm10, %v3124_v6, 0.0  ;;  %v1155_v32 = vsel %vm1095_vm4, %v4028_v48, 0.0  ;;  %v3126_v4 = vpop.eup %3125 }
 0x2a5   :  { %3127 = vpow2.f32 %v1134_v23  ;;  %v1152_v59 = vsel %vm1095_vm4, %v4032_v41, 0.0  ;;  %1156 = vadd.xlane.f32.xlu0 %v1155_v32  ;;  %v4041_v35 = vsel %vm3745_vm3, %v3126_v4, 0.0 }
 0x2a6   :  { %1153 = vadd.xlane.f32.xlu1 %v1152_v59  ;;  %v1158_v21 = vsel %vm1095_vm4, %v4041_v35, 0.0 }
 0x2a8   :  { %v1110_v53 = vpop.xlane.xlu1 %1109 }
 0x2a9   :  { %v1124_v54 = vsub.f32 %v3952_v8, %v1110_v53 }
 0x2ab   :  { %v3128_v2 = vpop.eup %3127  ;;  %v1136_v40 = vmul.f32 1.442695, %v1124_v54 }
 0x2ac   :  { %v4045_v12 = vsel %vm3927_vm12, %v3128_v2, 0.0 }
 0x2ad   :  { %3129 = vpow2.f32 %v1136_v40  ;;  %v1161_v62 = vsel %vm1095_vm4, %v4045_v12, 0.0 }
 0x2ae   :  { %1159 = vadd.xlane.f32.xlu1 %v1158_v21  ;;  %1162 = vadd.xlane.f32.xlu2 %v1161_v62 }
 0x2b0   :  { %v1113_v8 = vpop.xlane.xlu1 %1112 }
 0x2b1   :  { %v1125_v43 = vsub.f32 %v3964_v39, %v1113_v8 }
 0x2b3   :  { %v3130_v1 = vpop.eup %3129  ;;  %v1138_v14 = vmul.f32 1.442695, %v1125_v43 }
 0x2b4   :  { %v4054_v29 = vsel %vm3944_vm14, %v3130_v1, 0.0 }
 0x2b5   :  { %3131 = vpow2.f32 %v1138_v14  ;;  %v1164_v50 = vsel %vm1095_vm4, %v4054_v29, 0.0 }
 0x2b6   :  { %1165 = vadd.xlane.f32.xlu0 %v1164_v50 }
 0x2bb   :  { %v3132_v28 = vpop.eup %3131 }
 0x2bc   :  { %v4060_v60 = vsel %vm3958_vm15, %v3132_v28, 0.0 }
 0x2bd   :  { %v1167_v10 = vsel %vm1095_vm4, %v4060_v60, 0.0 }
 0x2be   :  { %1168 = vadd.xlane.f32.xlu1 %v1167_v10 }
 0x2d1   :  { %v1116_v39 = vpop.xlane.xlu2 %1115 }
 0x2d2   :  { %v1126_v31 = vsub.f32 %v3994_v58, %v1116_v39 }
 0x2d4   :  { %v1140_v18 = vmul.f32 1.442695, %v1126_v31 }
 0x2d6   :  { %3133 = vpow2.f32 %v1140_v18 }
 0x2dc   :  { %v3134_v7 = vpop.eup %3133 }
 0x2dd   :  { %v4067_v56 = vsel %vm3988_vm1, %v3134_v7, 0.0 }
 0x2de   :  { %v1170_v27 = vsel %vm1095_vm4, %v4067_v56, 0.0 }
 0x2df   :  { %1171 = vadd.xlane.f32.xlu2 %v1170_v27 }
 0x2f5   :  { %v1119_v30 = vpop.xlane.xlu2 %1118 }
 0x2f6   :  { %v1127_v13 = vsub.f32 %v1094_v37, %v1119_v30 }
 0x2f8   :  { %v1142_v44 = vmul.f32 1.442695, %v1127_v13 }
 0x2fa   :  { %3135 = vpow2.f32 %v1142_v44 }
 0x300   :  { %v3136_v9 = vpop.eup %3135 }
 0x301   :  { %v4073_v15 = vsel %vm4015_vm5, %v3136_v9, 0.0 }
 0x302   :  { %v1173_v58 = vsel %vm1095_vm4, %v4073_v15, 0.0 }
 0x303   :  { %1174 = vadd.xlane.f32.xlu0 %v1173_v58 }
 0x318   :  { %v1157_v47 = vpop.xlane.xlu0 %1156 }
 0x319   :  { %v1154_v19 = vpop.xlane.xlu1 %1153  ;;  %v1177_v16 = vmax.f32 %v1157_v47, 1e-12 }
 0x31a   :  { %v1176_v46 = vmax.f32 %v1154_v19, 1e-12 }
 0x31b   :  { %3137 = vrcp.f32 %v1177_v16  ;;  %v1210_v37 = vand.u32 2147483648, %v1177_v16  ;;  %v1208_v63 = vand.u32 2147483647, %v1177_v16  ;;  %vm1204_vm7 = vweird.f32 %v1177_v16 }
 0x31c   :  { %3139 = vrcp.f32 %v1176_v46  ;;  %v1195_v0 = vand.u32 2147483648, %v1176_v46  ;;  %v1193_v5 = vand.u32 2147483647, %v1176_v46  ;;  %vm1189_vm8 = vweird.f32 %v1176_v46 }
 0x31d   :  { %v1211_v42 = vor.u32 1.1754944e-38, %v1210_v37  ;;  %vm1209_vm11 = vcmp.eq.f32.partialorder %v1208_v63, 8.507059e+37 }
 0x31e   :  { %v1196_v34 = vor.u32 1.1754944e-38, %v1195_v0  ;;  %vm1194_vm12 = vcmp.eq.f32.partialorder %v1193_v5, 8.507059e+37 }
 0x321   :  { %v3138_v11 = vpop.eup %3137  ;;  %v1160_v38 = vpop.xlane.xlu1 %1159 }
 0x322   :  { %v1163_v61 = vpop.xlane.xlu2 %1162  ;;  %v3140_v33 = vpop.eup %3139  ;;  %v1200_v45 = vmul.f32 %v3138_v11, %v1177_v16  ;;  %v1178_v20 = vmax.f32 %v1160_v38, 1e-12  ;;  %vm1205_vm3 = vweird.f32 %v3138_v11 }
 0x323   :  { %v4077_v57 = vmax.f32 %v1163_v61, 1e-12  ;;  %v1185_v26 = vmul.f32 %v3140_v33, %v1176_v46  ;;  %vm1190_vm6 = vweird.f32 %v3140_v33  ;;  %vm1206_vm9 = vmor %vm1204_vm7, %vm1205_vm3 }
 0x324   :  { %v1201_v52 = vsub.f32 1.0, %v1200_v45  ;;  %3141 = vrcp.f32 %v1178_v20  ;;  %vm1191_vm10 = vmor %vm1189_vm8, %vm1190_vm6  ;;  %v1225_v21 = vand.u32 2147483648, %v1178_v20  ;;  %v1223_v1 = vand.u32 2147483647, %v1178_v20 }
 0x325   :  { %v1186_v51 = vsub.f32 1.0, %v1185_v26  ;;  %3143 = vrcp.f32 %v4077_v57  ;;  %vm1219_vm14 = vweird.f32 %v1178_v20  ;;  %v1240_v30 = vand.u32 2147483648, %v4077_v57 }
 0x326   :  { %v1202_v3 = vmul.f32 %v3138_v11, %v1201_v52  ;;  %vm1224_vm1 = vcmp.eq.f32.partialorder %v1223_v1, 8.507059e+37  ;;  %vm1234_vm2 = vweird.f32 %v4077_v57  ;;  %v1238_v9 = vand.u32 2147483647, %v4077_v57 }
 0x327   :  { %v1187_v24 = vmul.f32 %v3140_v33, %v1186_v51  ;;  %v1241_v46 = vor.u32 1.1754944e-38, %v1240_v30 }
 0x328   :  { %v1203_v49 = vadd.f32 %v3138_v11, %v1202_v3  ;;  %vm1239_vm3 = vcmp.eq.f32.partialorder %v1238_v9, 8.507059e+37 }
 0x329   :  { %v1188_v36 = vadd.f32 %v3140_v33, %v1187_v24  ;;  %v1166_v55 = vpop.xlane.xlu0 %1165 }
 0x32a   :  { %v3142_v17 = vpop.eup %3141  ;;  %v1207_v25 = vsel %vm1206_vm9, %v3138_v11, %v1203_v49  ;;  %v4080_v22 = vmax.f32 %v1166_v55, 1e-12 }
 0x32b   :  { %v3144_v6 = vpop.eup %3143  ;;  %v1192_v23 = vsel %vm1191_vm10, %v3140_v33, %v1188_v36  ;;  %v1212_v32 = vsel %vm1209_vm11, %v1211_v42, %v1207_v25  ;;  %v1215_v59 = vmul.f32 %v3142_v17, %v1178_v20  ;;  %vm1220_vm13 = vweird.f32 %v3142_v17 }
 0x32c   :  { %v1197_v4 = vsel %vm1194_vm12, %v1196_v34, %v1192_v23  ;;  %v4083_v53 = vmul.f32 %v1212_v32, %v4028_v48  ;;  %v1230_v54 = vmul.f32 %v3144_v6, %v4077_v57  ;;  %3145 = vrcp.f32 %v4080_v22  ;;  %vm1221_vm15 = vmor %vm1219_vm14, %vm1220_vm13 }
 0x32d   :  { %v4087_v2 = vmul.f32 %v1197_v4, %v4032_v41  ;;  %v1216_v40 = vsub.f32 1.0, %v1215_v59  ;;  %v1226_v41 = vor.u32 1.1754944e-38, %v1225_v21  ;;  %vm1235_vm0 = vweird.f32 %v3144_v6 }
 0x32e   :  { %4870 = vst [vmem:[#allocation19_spill] sm:$0xff] %v4083_v53  ;;  %v1231_v62 = vsub.f32 1.0, %v1230_v54  ;;  %v1308_v48 = vsel %vm1095_vm4, %v4083_v53, 0  ;;  %vm1236_vm5 = vmor %vm1234_vm2, %vm1235_vm0  ;;  %v1255_v26 = vand.u32 2147483648, %v4080_v22  ;;  %vm1249_vm7 = vweird.f32 %v4080_v22 }
 0x32f   :  { %4871 = vst [vmem:[#allocation13_spill] sm:$0xff] %v4087_v2  ;;  %v1305_v8 = vsel %vm1095_vm4, %v4087_v2, 0  ;;  %v1217_v43 = vmul.f32 %v3142_v17, %v1216_v40  ;;  %v4103_v13 = vand.u32 4294901760, %v1308_v48  ;;  %v1253_v3 = vand.u32 2147483647, %v4080_v22 }
 0x330   :  { %v1232_v14 = vmul.f32 %v3144_v6, %v1231_v62  ;;  %v4094_v50 = vand.u32 4294901760, %v1305_v8  ;;  %v1256_v49 = vor.u32 1.1754944e-38, %v1255_v26 }
 0x331   :  { %v1218_v28 = vadd.f32 %v3142_v17, %v1217_v43  ;;  %v1169_v10 = vpop.xlane.xlu1 %1168  ;;  %v4118_v38 = vsub.f32 %v1308_v48, %v4103_v13  ;;  %vm1254_vm9 = vcmp.eq.f32.partialorder %v1253_v3, 8.507059e+37 }
 0x332   :  { %v1233_v39 = vadd.f32 %v3144_v6, %v1232_v14  ;;  %v4096_v31 = vmax.f32 %v1169_v10, 1e-12  ;;  %1474 = vmatmul.f32.vlgmr.msrb.gmra.mxu3 %v4094_v50  ;;  %v4100_v18 = vsub.f32 %v1305_v8, %v4094_v50  ;;  %v3146_v7 = vpop.eup %3145 }
 0x333   :  { %v1222_v27 = vsel %vm1221_vm15, %v3142_v17, %v1218_v28  ;;  %v1245_v58 = vmul.f32 %v3146_v7, %v4080_v22  ;;  %vm1250_vm6 = vweird.f32 %v3146_v7  ;;  %v4130_v51 = vand.u32 4294901760, %v4118_v38 }
 0x334   :  { %v1227_v44 = vsel %vm1224_vm1, %v1226_v41, %v1222_v27  ;;  %1540 = vmatmul.f32.vlgmr.msra.gmra.mxu0 %v4100_v18  ;;  %3147 = vrcp.f32 %v4096_v31  ;;  %v1237_v19 = vsel %vm1236_vm5, %v3144_v6, %v1233_v39  ;;  %v4115_v11 = vand.u32 4294901760, %v4100_v18  ;;  %vm1251_vm8 = vmor %vm1249_vm7, %vm1250_vm6 }
 0x335   :  { %v4110_v47 = vmul.f32 %v1227_v44, %v4041_v35  ;;  %v1246_v16 = vsub.f32 1.0, %v1245_v58  ;;  %v1242_v35 = vsel %vm1239_vm3, %v1241_v46, %v1237_v19  ;;  %v1363_v36 = vsub.f32 %v4118_v38, %v4130_v51 }
 0x336   :  { %1606 = vmatmul.f32.vlgmr.msra.gmra.mxu1 %v4115_v11  ;;  %v1355_v45 = vsub.f32 %v4100_v18, %v4115_v11  ;;  %v4135_v0 = vmul.f32 %v1242_v35, %v4045_v12  ;;  %v1270_v25 = vand.u32 2147483648, %v4096_v31  ;;  %vm1264_vm11 = vweird.f32 %v4096_v31 }
 0x337   :  { %4872 = vst [vmem:[#allocation14_spill] sm:$0xff] %v4110_v47  ;;  %v1311_v61 = vsel %vm1095_vm4, %v4110_v47, 0  ;;  %v1247_v33 = vmul.f32 %v3146_v7, %v1246_v16  ;;  %v4152_v22 = vand.u32 4294901760, %v1363_v36  ;;  %v1268_v59 = vand.u32 2147483647, %v4096_v31 }
 0x338   :  { %v4127_v52 = vand.u32 4294901760, %v1355_v45  ;;  %v4132_v37 = vand.u32 4294901760, %v1311_v61  ;;  %4874 = vst [vmem:[#allocation16_spill] sm:$0xff] %v4135_v0  ;;  %v1314_v42 = vsel %vm1095_vm4, %v4135_v0, 0  ;;  %v1271_v54 = vor.u32 1.1754944e-38, %v1270_v25 }
 0x339   :  { %v1248_v20 = vadd.f32 %v3146_v7, %v1247_v33  ;;  %v4157_v23 = vand.u32 4294901760, %v1314_v42  ;;  %vm1269_vm13 = vcmp.eq.f32.partialorder %v1268_v59, 8.507059e+37  ;;  %vm2716_vm7 = vcmask 64512  }
 0x33a   :  { %1478 = vmatmul.f32.gmra.mxu3 %v4103_v13  ;;  %v3148_v57 = vpop.eup %3147  ;;  %4873 = vst [vmem:[#allocation15_spill] sm:$0xff] %v4132_v37  ;;  %1357 = vmatmul.f32.vlgmr.msrb.gmra.mxu2 %v4127_v52  ;;  %v4145_v12 = vsub.f32 %v1311_v61, %v4132_v37 }
 0x33b   :  { %v1260_v63 = vmul.f32 %v3148_v57, %v4096_v31  ;;  %v1252_v24 = vsel %vm1251_vm8, %v3146_v7, %v1248_v20  ;;  %vm1265_vm10 = vweird.f32 %v3148_v57  ;;  %4875 = vst [vmem:[#allocation20_spill] sm:$0xff] %v4157_v23  ;;  %v4169_v21 = vsub.f32 %v1314_v42, %v4157_v23 }
 0x33c   :  { %1545 = vmatmul.f32.gmra.mxu0 %v4118_v38  ;;  %v1257_v17 = vsel %vm1254_vm9, %v1256_v49, %v1252_v24  ;;  %v4155_v6 = vand.u32 4294901760, %v4145_v12  ;;  %vm1266_vm12 = vmor %vm1264_vm11, %vm1265_vm10  ;;  %vm1832_vm8 = vcmask 261120   ;;  %vm2820_vm9 = vcmask 516096  }
 0x33d   :  { %v1261_v5 = vsub.f32 1.0, %v1260_v63  ;;  %v4160_v32 = vmul.f32 %v1257_v17, %v4054_v29  ;;  %4877 = vst [vmem:[#allocation21_spill] sm:$0xff] %v4169_v21  ;;  %v4178_v43 = vand.u32 4294901760, %v4169_v21  ;;  %vm2794_vm10 = vcmask 7168  }
 0x33e   :  { %1612 = vmatmul.f32.gmra.mxu1 %v4130_v51  ;;  %v1371_v40 = vsub.f32 %v4145_v12, %v4155_v6 }
 0x33f   :  { %v1262_v55 = vmul.f32 %v3148_v57, %v1261_v5  ;;  %4876 = vst [vmem:[#allocation17_spill] sm:$0xff] %v4160_v32  ;;  %v1317_v29 = vsel %vm1095_vm4, %v4160_v32, 0  ;;  %v1379_v14 = vsub.f32 %v4169_v21, %v4178_v43 }
 0x340   :  { %v4175_v8 = vand.u32 4294901760, %v1371_v40  ;;  %4878 = vst [vmem:[#allocation22_spill] sm:$0xff] %v4178_v43  ;;  %v4180_v1 = vand.u32 4294901760, %v1317_v29 }
 0x341   :  { %v1263_v34 = vadd.f32 %v3148_v57, %v1262_v55  ;;  %v4196_v39 = vand.u32 4294901760, %v1379_v14 }
 0x342   :  { %1482 = vmatmul.f32.gmra.mxu3 %v4132_v37  ;;  %1365 = vmatmul.f32.gmra.mxu2 %v4152_v22  ;;  %4879 = vst [vmem:[#allocation23_spill] sm:$0xff] %v4180_v1  ;;  %v4190_v28 = vsub.f32 %v1317_v29, %v4180_v1 }
 0x343   :  { %v1267_v4 = vsel %vm1266_vm12, %v3148_v57, %v1263_v34  ;;  %vm2984_vm12 = vcmask 588800  }
 0x344   :  { %1550 = vmatmul.f32.gmra.mxu0 %v4145_v12  ;;  %v1272_v62 = vsel %vm1269_vm13, %v1271_v54, %v1267_v4  ;;  %4881 = vst [vmem:[#allocation25_spill] sm:$0xff] %v4190_v28  ;;  %v4199_v31 = vand.u32 4294901760, %v4190_v28  ;;  %vm2993_vm13 = vcmask 654336  }
 0x345   :  { %v4183_v48 = vmul.f32 %v1272_v62, %v4060_v60 }
 0x346   :  { %1618 = vmatmul.f32.gmra.mxu1 %v4155_v6  ;;  %4882 = vst [vmem:[#allocation26_spill] sm:$0xff] %v4199_v31  ;;  %v1387_v27 = vsub.f32 %v4190_v28, %v4199_v31 }
 0x347   :  { %4880 = vst [vmem:[#allocation24_spill] sm:$0xff] %v4183_v48  ;;  %v1320_v41 = vsel %vm1095_vm4, %v4183_v48, 0 }
 0x348   :  { %v4201_v7 = vand.u32 4294901760, %v1320_v41  ;;  %v4212_v9 = vand.u32 4294901760, %v1387_v27 }
 0x34a   :  { %1486 = vmatmul.f32.gmra.mxu3 %v4157_v23  ;;  %1373 = vmatmul.f32.gmra.mxu2 %v4175_v8  ;;  %4883 = vst [vmem:[#allocation27_spill] sm:$0xff] %v4201_v7  ;;  %v4208_v30 = vsub.f32 %v1320_v41, %v4201_v7 }
 0x34b   :  { %4885 = vst [vmem:[#allocation29_spill] sm:$0xff] %v4212_v9 }
 0x34c   :  { %1555 = vmatmul.f32.gmra.mxu0 %v4169_v21  ;;  %4884 = vst [vmem:[#allocation28_spill] sm:$0xff] %v4208_v30  ;;  %v4215_v58 = vand.u32 4294901760, %v4208_v30 }
 0x34e   :  { %1624 = vmatmul.f32.gmra.mxu1 %v4178_v43  ;;  %4886 = vst [vmem:[#allocation30_spill] sm:$0xff] %v4215_v58  ;;  %v1395_v61 = vsub.f32 %v4208_v30, %v4215_v58 }
 0x350   :  { %v4222_v57 = vand.u32 4294901760, %v1395_v61 }
 0x352   :  { %v1172_v10 = vpop.xlane.xlu2 %1171  ;;  %1490 = vmatmul.f32.gmra.mxu3 %v4180_v1  ;;  %1381 = vmatmul.f32.gmra.mxu2 %v4196_v39  ;;  %4887 = vst [vmem:[#allocation31_spill] sm:$0xff] %v4222_v57 }
 0x353   :  { %v1182_v60 = vmax.f32 %v1172_v10, 1e-12 }
 0x354   :  { %1560 = vmatmul.f32.gmra.mxu0 %v4190_v28 }
 0x355   :  { %3149 = vrcp.f32 %v1182_v60  ;;  %v1285_v46 = vand.u32 2147483648, %v1182_v60  ;;  %v1283_v35 = vand.u32 2147483647, %v1182_v60  ;;  %vm1279_vm15 = vweird.f32 %v1182_v60 }
 0x356   :  { %1630 = vmatmul.f32.gmra.mxu1 %v4199_v31 }
 0x357   :  { %v1286_v20 = vor.u32 1.1754944e-38, %v1285_v46  ;;  %vm1284_vm1 = vcmp.eq.f32.partialorder %v1283_v35, 8.507059e+37  ;;  %v4269_v46 = vld [vmem:[%s4762_s4] ss:$0 sm:$0xff]  ;;  %s3179_s4 = smov 120  }
 0x358   :  { %1785 = vrot.lane.b32.xlu1 %v4269_v46, %s3178_s0 }
 0x35a   :  { %1494 = vmatmul.f32.gmra.mxu3 %v4201_v7  ;;  %1389 = vmatmul.f32.gmra.mxu2 %v4212_v9 }
 0x35b   :  { %v3150_v44 = vpop.eup %3149 }
 0x35c   :  { %v1275_v19 = vmul.f32 %v3150_v44, %v1182_v60  ;;  %1565 = vmatmul.f32.gmra.mxu0 %v4208_v30  ;;  %vm1280_vm14 = vweird.f32 %v3150_v44 }
 0x35d   :  { %vm1281_vm0 = vmor %vm1279_vm15, %vm1280_vm14  ;;  %vm3002_vm14 = vcmask 662528  }
 0x35e   :  { %v1276_v16 = vsub.f32 1.0, %v1275_v19  ;;  %1636 = vmatmul.f32.gmra.mxu1 %v4215_v58 }
 0x360   :  { %v1277_v33 = vmul.f32 %v3150_v44, %v1276_v16 }
 0x362   :  { %v1278_v45 = vadd.f32 %v3150_v44, %v1277_v33  ;;  %1397 = vmatmul.f32.gmra.mxu2 %v4222_v57 }
 0x364   :  { %v1282_v26 = vsel %vm1281_vm0, %v3150_v44, %v1278_v45 }
 0x365   :  { %v1287_v3 = vsel %vm1284_vm1, %v1286_v20, %v1282_v26 }
 0x366   :  { %v4226_v63 = vmul.f32 %v1287_v3, %v4067_v56 }
 0x368   :  { %4888 = vst [vmem:[#allocation32_spill] sm:$0xff] %v4226_v63  ;;  %v1323_v24 = vsel %vm1095_vm4, %v4226_v63, 0 }
 0x369   :  { %v4230_v5 = vand.u32 4294901760, %v1323_v24 }
 0x36b   :  { %4889 = vst [vmem:[#allocation33_spill] sm:$0xff] %v4230_v5  ;;  %1498 = vmatmul.f32.gmra.mxu3 %v4230_v5  ;;  %v4234_v49 = vsub.f32 %v1323_v24, %v4230_v5 }
 0x36d   :  { %4890 = vst [vmem:[#allocation34_spill] sm:$0xff] %v4234_v49  ;;  %1570 = vmatmul.f32.gmra.mxu0 %v4234_v49  ;;  %v4238_v36 = vand.u32 4294901760, %v4234_v49 }
 0x36f   :  { %4891 = vst [vmem:[#allocation35_spill] sm:$0xff] %v4238_v36  ;;  %1642 = vmatmul.f32.gmra.mxu1 %v4238_v36  ;;  %v1403_v56 = vsub.f32 %v4234_v49, %v4238_v36 }
 0x371   :  { %v4243_v42 = vand.u32 4294901760, %v1403_v56 }
 0x373   :  { %4892 = vst [vmem:[#allocation36_spill] sm:$0xff] %v4243_v42  ;;  %1405 = vmatmul.f32.gmra.mxu2 %v4243_v42 }
 0x376   :  { %v1175_v55 = vpop.xlane.xlu0 %1174 }
 0x377   :  { %v1183_v17 = vmax.f32 %v1175_v55, 1e-12 }
 0x379   :  { %3151 = vrcp.f32 %v1183_v17  ;;  %v1300_v4 = vand.u32 2147483648, %v1183_v17  ;;  %v1298_v40 = vand.u32 2147483647, %v1183_v17  ;;  %vm1294_vm5 = vweird.f32 %v1183_v17 }
 0x37b   :  { %v1301_v62 = vor.u32 1.1754944e-38, %v1300_v4  ;;  %vm1299_vm6 = vcmp.eq.f32.partialorder %v1298_v40, 8.507059e+37 }
 0x37f   :  { %v3152_v34 = vpop.eup %3151 }
 0x380   :  { %v1290_v25 = vmul.f32 %v3152_v34, %v1183_v17  ;;  %vm1295_vm2 = vweird.f32 %v3152_v34 }
 0x381   :  { %vm1296_vm3 = vmor %vm1294_vm5, %vm1295_vm2 }
 0x382   :  { %v1291_v59 = vsub.f32 1.0, %v1290_v25 }
 0x384   :  { %v1292_v54 = vmul.f32 %v3152_v34, %v1291_v59 }
 0x386   :  { %v1293_v29 = vadd.f32 %v3152_v34, %v1292_v54 }
 0x388   :  { %v1297_v14 = vsel %vm1296_vm3, %v3152_v34, %v1293_v29 }
 0x389   :  { %v1302_v41 = vsel %vm1299_vm6, %v1301_v62, %v1297_v14 }
 0x38a   :  { %v4247_v10 = vmul.f32 %v1302_v41, %v4073_v15 }
 0x38c   :  { %4893 = vst [vmem:[#allocation37_spill] sm:$0xff] %v4247_v10  ;;  %v1326_v60 = vsel %vm1095_vm4, %v4247_v10, 0 }
 0x38d   :  { %v4251_v27 = vand.u32 4294901760, %v1326_v60 }
 0x38f   :  { %4894 = vst [vmem:[#allocation38_spill] sm:$0xff] %v4251_v27  ;;  %1502 = vmatmul.f32.gmra.mxu3 %v4251_v27  ;;  %v4255_v44 = vsub.f32 %v1326_v60, %v4251_v27 }
 0x391   :  { %4895 = vst [vmem:[#allocation39_spill] sm:$0xff] %v4255_v44  ;;  %1575 = vmatmul.f32.gmra.mxu0 %v4255_v44  ;;  %v4259_v19 = vand.u32 4294901760, %v4255_v44 }
 0x393   :  { %4896 = vst [vmem:[#allocation40_spill] sm:$0xff] %v4259_v19  ;;  %1648 = vmatmul.f32.gmra.mxu1 %v4259_v19  ;;  %v1411_v15 = vsub.f32 %v4255_v44, %v4259_v19 }
 0x395   :  { %v4264_v16 = vand.u32 4294901760, %v1411_v15 }
 0x397   :  { %4897 = vst [vmem:[#allocation41_spill] sm:$0xff] %v4264_v16  ;;  %1413 = vmatmul.f32.gmra.mxu2 %v4264_v16  ;;  %1750 = vmatmul.f32.vlgmr.msra.gmra.mxu3 %v4094_v50 }
 0x39f   :  { %1693 = vmatmul.f32.vlgmr.msra.gmra.mxu2 %v4094_v50  ;;  %1754 = vmatmul.f32.gmra.mxu3 %v4103_v13 }
 0x3a7   :  { %1697 = vmatmul.f32.gmra.mxu2 %v4103_v13  ;;  %1758 = vmatmul.f32.gmra.mxu3 %v4132_v37 }
 0x3af   :  { %1701 = vmatmul.f32.gmra.mxu2 %v4132_v37  ;;  %1762 = vmatmul.f32.gmra.mxu3 %v4157_v23 }
 0x3b1   :  { %v1541_v59 = vpop.f32.mrf.mxu0 }
 0x3b3   :  { %v1607_v40 = vpop.f32.mrf.mxu1 }
 0x3b5   :  { %v1475_v61 = vpop.f32.mrf.mxu3 }
 0x3b7   :  { %1705 = vmatmul.f32.gmra.mxu2 %v4157_v23  ;;  %1766 = vmatmul.f32.gmra.mxu3 %v4180_v1 }
 0x3b9   :  { %v1546_v41 = vpop.f32.mrf.mxu0 }
 0x3bb   :  { %v1613_v15 = vpop.f32.mrf.mxu1 }
 0x3bd   :  { %v1358_v33 = vpop.f32.mrf.mxu2  ;;  %v1479_v35 = vpop.f32.mrf.mxu3 }
 0x3be   :  { %v1476_v29 = vadd.f32 %v1475_v61, %v1358_v33 }
 0x3bf   :  { %1709 = vmatmul.f32.gmra.mxu2 %v4180_v1  ;;  %1770 = vmatmul.f32.gmra.mxu3 %v4201_v7 }
 0x3c0   :  { %v1542_v60 = vadd.f32 %v1541_v59, %v1476_v29 }
 0x3c1   :  { %v1551_v42 = vpop.f32.mrf.mxu0 }
 0x3c2   :  { %v1608_v44 = vadd.f32 %v1607_v40, %v1542_v60  ;;  %v4899_v40 = vld [vmem:[#allocation6_spill] sm:$0xff] }
 0x3c3   :  { %v1619_v58 = vpop.f32.mrf.mxu1 }
 0x3c5   :  { %v1366_v45 = vpop.f32.mrf.mxu2  ;;  %v1483_v20 = vpop.f32.mrf.mxu3 }
 0x3c7   :  { %1713 = vmatmul.f32.gmra.mxu2 %v4201_v7  ;;  %1774 = vmatmul.f32.gmra.mxu3 %v4230_v5 }
 0x3c9   :  { %v1556_v29 = vpop.f32.mrf.mxu0 }
 0x3ca   :  { %v4301_v49 = vpop.permute.xlu1 %1785 }
 0x3cd   :  { %v1374_v26 = vpop.f32.mrf.mxu2  ;;  %v1487_v3 = vpop.f32.mrf.mxu3 }
 0x3ce   :  { %v1484_v61 = vadd.f32 %v1483_v20, %v1374_v26 }
 0x3cf   :  { %1717 = vmatmul.f32.gmra.mxu2 %v4230_v5  ;;  %1778 = vmatmul.f32.gmra.mxu3 %v4251_v27 }
 0x3d5   :  { %v1382_v24 = vpop.f32.mrf.mxu2  ;;  %v1491_v56 = vpop.f32.mrf.mxu3 }
 0x3d7   :  { %1721 = vmatmul.f32.gmra.mxu2 %v4251_v27  ;;  %v1480_v27 = vadd.f32 %v1479_v35, %v1366_v45  ;;  %v1552_v35 = vadd.f32 %v1551_v42, %v1484_v61  ;;  %v4898_v45 = vld [vmem:[#allocation5_spill] sm:$0xff] }
 0x3d9   :  { %v1547_v36 = vadd.f32 %v1546_v41, %v1480_v27  ;;  %v1620_v20 = vadd.f32 %v1619_v58, %v1552_v35  ;;  %v1561_v58 = vpop.f32.mrf.mxu0 }
 0x3db   :  { %v1614_v33 = vadd.f32 %v1613_v15, %v1547_v36  ;;  %v4900_v15 = vld [vmem:[#allocation7_spill] sm:$0xff] }
 0x3dd   :  { %v1390_v55 = vpop.f32.mrf.mxu2  ;;  %v4289_v17 = vpop.f32.mrf.mxu3 }
 0x3e5   :  { %v4291_v34 = vpop.f32.mrf.mxu2 }
 0x3ee   :  { %v4293_v25 = vpop.f32.mrf.mxu3 }
 0x3f6   :  { %v4295_v4 = vpop.f32.mrf.mxu2 }
 0x412   :  { %v4297_v54 = vpop.f32.mrf.mxu3 }
 0x41a   :  { %v4299_v62 = vpop.f32.mrf.mxu2  ;;  %v1751_v14 = vpop.f32.mrf.mxu3 }
 0x422   :  { %v1694_v19 = vpop.f32.mrf.mxu2  ;;  %v1755_v5 = vpop.f32.mrf.mxu3 }
 0x423   :  { %v1695_v16 = vadd.f32 %v1694_v19, %v1608_v44 }
 0x425   :  { %v1752_v7 = vadd.f32 %v1751_v14, %v1695_v16  ;;  %v1488_v14 = vadd.f32 %v1487_v3, %v1382_v24  ;;  %v1492_v24 = vadd.f32 %v1491_v56, %v1390_v55  ;;  %v1496_v56 = vadd.f32 %v4289_v17, %v4291_v34 }
 0x426   :  { %v1500_v17 = vadd.f32 %v4293_v25, %v4295_v4 }
 0x427   :  { %v1788_v30 = vadd.f32 %v4301_v49, %v1752_v7  ;;  %v2833_v44 = vmul.f32 %v1752_v7, %v4898_v45  ;;  %v1625_v7 = vpop.f32.mrf.mxu1  ;;  %v1557_v42 = vadd.f32 %v1556_v29, %v1488_v14 }
 0x429   :  { %v1796_v1 = vmax.f32 %v1788_v30, 0.0  ;;  %v2841_v36 = vsel %vm2716_vm7, %v2833_v44, 0.0 }
 0x42a   :  { %v1698_v57 = vpop.f32.mrf.mxu2  ;;  %v1759_v28 = vpop.f32.mrf.mxu3 }
 0x42b   :  { %v1699_v59 = vadd.f32 %v1698_v57, %v1614_v33  ;;  %1816 = vrot.lane.b32.xlu2 %v1796_v1, %s3179_s4 }
 0x42d   :  { %v1756_v19 = vadd.f32 %v1755_v5, %v1699_v59  ;;  %v1626_v59 = vadd.f32 %v1625_v7, %v1557_v42  ;;  %v1566_v42 = vpop.f32.mrf.mxu0 }
 0x42f   :  { %v2834_v27 = vmul.f32 %v1756_v19, %v4899_v40  ;;  %v1789_v16 = vadd.f32 %v4301_v49, %v1756_v19 }
 0x431   :  { %v2842_v30 = vsel %vm2716_vm7, %v2834_v27, 0.0  ;;  %v1797_v57 = vmax.f32 %v1789_v16, 0.0  ;;  %v1562_v16 = vadd.f32 %v1561_v58, %v1492_v24 }
 0x432   :  { %v2843_v26 = vadd.f32 %v2842_v30, %v2841_v36  ;;  %v1702_v41 = vpop.f32.mrf.mxu2  ;;  %v1763_v5 = vpop.f32.mrf.mxu3 }
 0x433   :  { %v1703_v1 = vadd.f32 %v1702_v41, %v1620_v20  ;;  %1818 = vrot.lane.b32.xlu0 %v1797_v57, %s3179_s4  ;;  %v1631_v30 = vpop.f32.mrf.mxu1 }
 0x434   :  { %v1632_v57 = vadd.f32 %v1631_v30, %v1562_v16 }
 0x435   :  { %v1760_v60 = vadd.f32 %v1759_v28, %v1703_v1  ;;  %v4901_v28 = vld [vmem:[#allocation11_spill] sm:$0xff]  ;;  %v1571_v16 = vpop.f32.mrf.mxu0 }
 0x437   :  { %v2835_v61 = vmul.f32 %v1760_v60, %v4900_v15  ;;  %v1790_v3 = vadd.f32 %v4301_v49, %v1760_v60 }
 0x439   :  { %v2844_v33 = vsel %vm2716_vm7, %v2835_v61, 0.0  ;;  %v1798_v44 = vmax.f32 %v1790_v3, 0.0  ;;  %v4902_v61 = vld [vmem:[#allocation12_spill] sm:$0xff] }
 0x43a   :  { %v2845_v35 = vadd.f32 %v2844_v33, %v2843_v26  ;;  %v1706_v19 = vpop.f32.mrf.mxu2  ;;  %v1767_v29 = vpop.f32.mrf.mxu3 }
 0x43b   :  { %v1707_v27 = vadd.f32 %v1706_v19, %v1626_v59  ;;  %1820 = vrot.lane.b32.xlu1 %v1798_v44, %s3179_s4  ;;  %v1637_v33 = vpop.f32.mrf.mxu1 }
 0x43d   :  { %v1764_v36 = vadd.f32 %v1763_v5, %v1707_v27  ;;  %v1567_v5 = vadd.f32 %v1566_v42, %v1496_v56 }
 0x43f   :  { %v2836_v14 = vmul.f32 %v1764_v36, %v4901_v28  ;;  %v1791_v20 = vadd.f32 %v4301_v49, %v1764_v36  ;;  %v1638_v44 = vadd.f32 %v1637_v33, %v1567_v5  ;;  %v1572_v36 = vadd.f32 %v1571_v16, %v1500_v17  ;;  %v1807_v33 = vld [vmem:[%s4763_s5 + $0x18] sm:$0xff]  ;;  %v4903_v16 = vld [vmem:[#allocation9_spill] sm:$0xff] }
 0x440   :  { %v1861_v17 = vand.u32 4294901760, %v1807_v33 }
 0x441   :  { %v2846_v55 = vsel %vm2716_vm7, %v2836_v14, 0.0  ;;  %v1799_v41 = vmax.f32 %v1791_v20, 0.0  ;;  %v1504_v20 = vadd.f32 %v4297_v54, %v4299_v62 }
 0x442   :  { %v2847_v26 = vadd.f32 %v2846_v55, %v2845_v35  ;;  %v1710_v1 = vpop.f32.mrf.mxu2  ;;  %v1771_v59 = vpop.f32.mrf.mxu3  ;;  %2081 = vmatpush.msrb.mxu3 %v1861_v17  ;;  %1862 = vmatpush.msrb.mxu0 %v1861_v17 }
 0x443   :  { %v1711_v7 = vadd.f32 %v1710_v1, %v1632_v57  ;;  %1822 = vrot.lane.b32.xlu0 %v1799_v41, %s3179_s4  ;;  %v1643_v14 = vpop.f32.mrf.mxu1  ;;  %v1576_v41 = vpop.f32.mrf.mxu0 }
 0x444   :  { %v1644_v56 = vadd.f32 %v1643_v14, %v1572_v36 }
 0x445   :  { %v1768_v60 = vadd.f32 %v1767_v29, %v1711_v7 }
 0x447   :  { %v2837_v3 = vmul.f32 %v1768_v60, %v4902_v61  ;;  %v1792_v24 = vadd.f32 %v4301_v49, %v1768_v60 }
 0x449   :  { %v2848_v34 = vsel %vm2716_vm7, %v2837_v3, 0.0  ;;  %v1800_v58 = vmax.f32 %v1792_v24, 0.0 }
 0x44a   :  { %v2849_v35 = vadd.f32 %v2848_v34, %v2847_v26  ;;  %v1714_v19 = vpop.f32.mrf.mxu2  ;;  %v1775_v4 = vpop.f32.mrf.mxu3  ;;  %v1577_v26 = vadd.f32 %v1576_v41, %v1504_v20 }
 0x44b   :  { %v1715_v27 = vadd.f32 %v1714_v19, %v1638_v44  ;;  %1824 = vrot.lane.b32.xlu2 %v1800_v58, %s3179_s4  ;;  %v1649_v42 = vpop.f32.mrf.mxu1  ;;  %v1947_v58 = vsub.f32 %v1807_v33, %v1861_v17 }
 0x44c   :  { %v1650_v5 = vadd.f32 %v1649_v42, %v1577_v26  ;;  %v1804_v26 = vld [vmem:[%s4763_s5] sm:$0xff] }
 0x44d   :  { %v1772_v30 = vadd.f32 %v1771_v59, %v1715_v27  ;;  %v1806_v59 = vld [vmem:[%s4763_s5 + $0x10] sm:$0xff]  ;;  %2017 = vmatpush.msrb.mxu2 %v1947_v58  ;;  %v1867_v42 = vand.u32 4294901760, %v1804_v26 }
 0x44e   :  { %v1863_v34 = vand.u32 4294901760, %v1806_v59 }
 0x44f   :  { %v1793_v29 = vadd.f32 %v4301_v49, %v1772_v30  ;;  %v2838_v36 = vmul.f32 %v1772_v30, %v4903_v16  ;;  %v1805_v30 = vld [vmem:[%s4763_s5 + $0x8] sm:$0xff]  ;;  %s3180_s5 = smov 64  }
 0x450   :  { %v1953_v19 = vsub.f32 %v1806_v59, %v1863_v34  ;;  %2083 = vmatpush.msrb.mxu3 %v1863_v34  ;;  %1864 = vmatpush.msrb.mxu0 %v1863_v34 }
 0x451   :  { %v1801_v25 = vmax.f32 %v1793_v29, 0.0  ;;  %v1948_v29 = vand.u32 4294901760, %v1947_v58 }
 0x452   :  { %v1718_v55 = vpop.f32.mrf.mxu2  ;;  %v1779_v54 = vpop.f32.mrf.mxu3  ;;  %v1954_v14 = vand.u32 4294901760, %v1953_v19  ;;  %2020 = vmatpush.msrb.mxu2 %v1953_v19 }
 0x453   :  { %v1719_v57 = vadd.f32 %v1718_v55, %v1644_v56  ;;  %1826 = vrot.lane.b32.xlu1 %v1801_v25, %s3179_s4  ;;  %v1949_v20 = vsub.f32 %v1947_v58, %v1948_v29  ;;  %v2850_v25 = vsel %vm2716_vm7, %v2838_v36, 0.0  ;;  %v2708_v58 = vmul.f32 %v4898_v45, %v4898_v45 }
 0x454   :  { %v1955_v56 = vsub.f32 %v1953_v19, %v1954_v14  ;;  %v2851_v55 = vadd.f32 %v2850_v25, %v2849_v35  ;;  %v4905_v35 = vld [vmem:[#allocation10_spill] sm:$0xff] }
 0x455   :  { %v1776_v1 = vadd.f32 %v1775_v4, %v1719_v57  ;;  %v4904_v57 = vld [vmem:[#allocation8_spill] sm:$0xff] }
 0x456   :  { %v1956_v4 = vand.u32 4294901760, %v1955_v56  ;;  %v2752_v56 = vsel %vm1095_vm4, %v4083_v53, 0.0 }
 0x457   :  { %v1794_v7 = vadd.f32 %v4301_v49, %v1776_v1  ;;  %v2839_v41 = vmul.f32 %v1776_v1, %v4904_v57 }
 0x459   :  { %v1802_v60 = vmax.f32 %v1794_v7, 0.0  ;;  %v1865_v7 = vand.u32 4294901760, %v1805_v30 }
 0x45a   :  { %v1722_v3 = vpop.f32.mrf.mxu2 }
 0x45b   :  { %v1723_v24 = vadd.f32 %v1722_v3, %v1650_v5  ;;  %1828 = vrot.lane.b32.xlu0 %v1802_v60, %s3179_s4  ;;  %v2852_v5 = vsel %vm2716_vm7, %v2839_v41, 0.0  ;;  %v1959_v3 = vsub.f32 %v1805_v30, %v1865_v7  ;;  %2085 = vmatpush.msrb.mxu3 %v1865_v7  ;;  %v2711_v30 = vmul.f32 %v4901_v28, %v4901_v28 }
 0x45c   :  { %v2853_v60 = vadd.f32 %v2852_v5, %v2851_v55  ;;  %1866 = vmatpush.msrb.mxu0 %v1865_v7  ;;  %v2758_v5 = vsel %vm1095_vm4, %v4135_v0, 0.0 }
 0x45d   :  { %v1780_v62 = vadd.f32 %v1779_v54, %v1723_v24  ;;  %v1965_v24 = vsub.f32 %v1804_v26, %v1867_v42  ;;  %v1960_v1 = vand.u32 4294901760, %v1959_v3  ;;  %2023 = vmatpush.msrb.mxu2 %v1959_v3  ;;  %2087 = vmatpush.msrb.mxu3 %v1867_v42  ;;  %v2710_v26 = vmul.f32 %v4900_v15, %v4900_v15 }
 0x45e   :  { %1868 = vmatpush.msrb.mxu0 %v1867_v42 }
 0x45f   :  { %v1795_v44 = vadd.f32 %v4301_v49, %v1780_v62  ;;  %v1950_v49 = vand.u32 4294901760, %v1949_v20  ;;  %v2840_v54 = vmul.f32 %v1780_v62, %v4905_v35  ;;  %v1966_v33 = vand.u32 4294901760, %v1965_v24  ;;  %2026 = vmatpush.msrb.mxu2 %v1965_v24 }
 0x460   :  { %v1961_v59 = vsub.f32 %v1959_v3, %v1960_v1  ;;  %2152 = vmatpush.msra.mxu0 %v1948_v29  ;;  %v2717_v62 = vsel %vm2716_vm7, %v2708_v58, 0.0  ;;  %v2709_v29 = vmul.f32 %v4899_v40, %v4899_v40 }
 0x461   :  { %v1803_v27 = vmax.f32 %v1795_v44, 0.0  ;;  %1951 = vmatpush.msrb.mxu1 %v1950_v49  ;;  %v1967_v44 = vsub.f32 %v1965_v24, %v1966_v33  ;;  %v2854_v36 = vsel %vm2716_vm7, %v2840_v54, 0.0  ;;  %v2755_v49 = vsel %vm1095_vm4, %v4110_v47, 0.0 }
 0x462   :  { %v1962_v19 = vand.u32 4294901760, %v1961_v59  ;;  %2156 = vmatpush.msra.mxu0 %v1954_v14  ;;  %v4355_v20 = vadd.f32 %v2854_v36, %v2853_v60  ;;  %v2749_v14 = vsel %vm1095_vm4, %v4087_v2, 0.0  ;;  %v2720_v25 = vsel %vm2716_vm7, %v2709_v29, 0.0 }
 0x463   :  { %1830 = vrot.lane.b32.xlu2 %v1803_v27, %s3179_s4  ;;  %1957 = vmatpush.msrb.mxu1 %v1956_v4  ;;  %v1968_v27 = vand.u32 4294901760, %v1967_v44  ;;  %v2726_v24 = vsel %vm2716_vm7, %v2711_v30, 0.0  ;;  %v2723_v54 = vsel %vm2716_vm7, %v2710_v26, 0.0  ;;  %v2767_v44 = vsel %vm1095_vm4, %v4226_v63, 0.0 }
 0x464   :  { %2160 = vmatpush.msra.mxu0 %v1960_v1  ;;  %v2764_v1 = vsel %vm1095_vm4, %v4183_v48, 0.0 }
 0x465   :  { %1963 = vmatpush.msrb.mxu1 %v1962_v19 }
 0x466   :  { %2164 = vmatpush.msra.mxu0 %v1966_v33 }
 0x467   :  { %1969 = vmatpush.msrb.mxu1 %v1968_v27  ;;  %v2770_v27 = vsel %vm1095_vm4, %v4247_v10, 0.0 }
 0x469   :  { %2211 = vmatpush.msra.mxu1 %v1861_v17 }
 0x46b   :  { %2213 = vmatpush.msra.mxu1 %v1863_v34  ;;  %v2773_v34 = vadd.f32 %v2752_v56, %v2749_v14 }
 0x46d   :  { %2215 = vmatpush.msra.mxu1 %v1865_v7  ;;  %v2774_v41 = vadd.f32 %v2773_v34, %v2755_v49  ;;  %v2714_v34 = vmul.f32 %v4904_v57, %v4904_v57 }
 0x46f   :  { %2217 = vmatpush.msra.mxu1 %v1867_v42  ;;  %v2761_v42 = vsel %vm1095_vm4, %v4160_v32, 0.0  ;;  %v2775_v3 = vadd.f32 %v2774_v41, %v2758_v5 }
 0x471   :  { %v2776_v59 = vadd.f32 %v2775_v3, %v2761_v42 }
 0x473   :  { %v2777_v19 = vadd.f32 %v2776_v59, %v2764_v1 }
 0x475   :  { %v2778_v36 = vadd.f32 %v2777_v19, %v2767_v44 }
 0x47d   :  { %2718 = vadd.xlane.f32.xlu1 %v2717_v62  ;;  %v4906_v62 = vld [vmem:[#allocation18_spill] sm:$0xff] }
 0x47e   :  { %v2741_v29 = vmul.f32 %v4906_v62, %v4906_v62 }
 0x485   :  { %2753 = vadd.xlane.f32.xlu1 %v2752_v56  ;;  %2721 = vadd.xlane.f32.xlu0 %v2720_v25  ;;  %v1817_v17 = vpop.permute.xlu2 %1816  ;;  %v2779_v56 = vadd.f32 %v2778_v36, %v2770_v27  ;;  %v2712_v25 = vmul.f32 %v4902_v61, %v4902_v61 }
 0x486   :  { %v1833_v4 = vsel %vm1832_vm8, %v1817_v17, 0 }
 0x487   :  { %v4368_v55 = vand.u32 4294901760, %v1833_v4  ;;  %v2780_v17 = vrot.slane %v2779_v56, 4  ;;  %v2729_v30 = vsel %vm2716_vm7, %v2712_v25, 0.0 }
 0x489   :  { %v1870_v7 = vsub.f32 %v1833_v4, %v4368_v55  ;;  %1971 = vmatmul.f32.vlgmr.msrb.gmra.mxu1 %v4368_v55  ;;  %v2713_v4 = vmul.f32 %v4903_v16, %v4903_v16  ;;  %v2781_v26 = vadd.f32 %v2780_v17, %v2779_v56 }
 0x48b   :  { %v1871_v60 = vand.u32 4294901760, %v1870_v7  ;;  %2029 = vmatmul.f32.vlgmr.msrb.gmra.mxu2 %v1870_v7 }
 0x48c   :  { %2750 = vadd.xlane.f32.xlu2 %v2749_v14  ;;  %v2742_v14 = vsel %vm1095_vm4, %v2741_v29, 0.0 }
 0x48d   :  { %v1872_v33 = vsub.f32 %v1870_v7, %v1871_v60  ;;  %2727 = vadd.xlane.f32.xlu1 %v2726_v24  ;;  %2724 = vadd.xlane.f32.xlu0 %v2723_v54  ;;  %v2743_v41 = vrot.slane %v2742_v14, 4  ;;  %v2732_v7 = vsel %vm2716_vm7, %v2713_v4, 0.0 }
 0x48e   :  { %2091 = vmatmul.f32.vlgmr.msrb.gmra.mxu3 %v1871_v60 }
 0x48f   :  { %v1873_v58 = vand.u32 4294901760, %v1872_v33 }
 0x491   :  { %1874 = vmatmul.f32.vlgmr.msrb.gmra.mxu0 %v1873_v58  ;;  %v2715_v58 = vmul.f32 %v4905_v35, %v4905_v35 }
 0x494   :  { %2756 = vadd.xlane.f32.xlu2 %v2755_v49  ;;  %v2735_v49 = vsel %vm2716_vm7, %v2714_v34, 0.0 }
 0x495   :  { %2762 = vadd.xlane.f32.xlu1 %v2761_v42  ;;  %2759 = vadd.xlane.f32.xlu0 %v2758_v5  ;;  %v2744_v42 = vadd.f32 %v2743_v41, %v2742_v14  ;;  %v2782_v5 = vrot.slane %v2781_v26, 2 }
 0x497   :  { %v2745_v60 = vrot.slane %v2744_v42, 2  ;;  %v2783_v3 = vadd.f32 %v2782_v5, %v2781_v26 }
 0x499   :  { %v2746_v54 = vadd.f32 %v2745_v60, %v2744_v42  ;;  %v2784_v19 = vrot.slane %v2783_v3, 1 }
 0x49b   :  { %v2747_v62 = vrot.slane %v2746_v54, 1 }
 0x49c   :  { %2730 = vadd.xlane.f32.xlu2 %v2729_v30 }
 0x49d   :  { %2736 = vadd.xlane.f32.xlu1 %v2735_v49  ;;  %2733 = vadd.xlane.f32.xlu0 %v2732_v7  ;;  %v2748_v14 = vadd.f32 %v2747_v62, %v2746_v54 }
 0x4a4   :  { %2765 = vadd.xlane.f32.xlu2 %v2764_v1  ;;  %v2738_v1 = vsel %vm2716_vm7, %v2715_v58, 0.0 }
 0x4a5   :  { %2771 = vadd.xlane.f32.xlu1 %v2770_v27  ;;  %2768 = vadd.xlane.f32.xlu0 %v2767_v44  ;;  %v1819_v24 = vpop.permute.xlu0 %1818  ;;  %v2785_v44 = vadd.f32 %v2784_v19, %v2783_v3  ;;  %v1825_v41 = vpop.permute.xlu2 %1824 }
 0x4a6   :  { %v1835_v33 = vsel %vm1832_vm8, %v1819_v24, 0 }
 0x4a7   :  { %v4401_v59 = vand.u32 4294901760, %v1835_v33  ;;  %v2819_v4 = vmul.f32 %v2785_v44, %v2748_v14 }
 0x4a9   :  { %v1878_v36 = vsub.f32 %v1835_v33, %v4401_v59  ;;  %1975 = vmatmul.f32.gmra.mxu1 %v4401_v59  ;;  %v2821_v26 = vsel %vm2820_vm9, %v2819_v4, 0.0 }
 0x4ab   :  { %2034 = vmatmul.f32.gmra.mxu2 %v1878_v36  ;;  %v1879_v27 = vand.u32 4294901760, %v1878_v36 }
 0x4ac   :  { %2739 = vadd.xlane.f32.xlu2 %v2738_v1 }
 0x4ad   :  { %v1821_v29 = vpop.permute.xlu1 %1820  ;;  %2097 = vmatmul.f32.gmra.mxu3 %v1879_v27  ;;  %2856 = vadd.xlane.f32.xlu1 %v4355_v20  ;;  %v1880_v56 = vsub.f32 %v1878_v36, %v1879_v27  ;;  %v1841_v20 = vsel %vm1832_vm8, %v1825_v41, 0 }
 0x4ae   :  { %v1837_v25 = vsel %vm1832_vm8, %v1821_v29, 0  ;;  %v4416_v60 = vand.u32 4294901760, %v1841_v20 }
 0x4af   :  { %v4410_v17 = vand.u32 4294901760, %v1837_v25  ;;  %v1881_v34 = vand.u32 4294901760, %v1880_v56 }
 0x4b0   :  { %v1902_v33 = vsub.f32 %v1841_v20, %v4416_v60 }
 0x4b1   :  { %v1886_v30 = vsub.f32 %v1837_v25, %v4410_v17  ;;  %1882 = vmatmul.f32.gmra.mxu0 %v1881_v34  ;;  %1979 = vmatmul.f32.gmra.mxu1 %v4410_v17 }
 0x4b2   :  { %v1903_v62 = vand.u32 4294901760, %v1902_v33 }
 0x4b3   :  { %2039 = vmatmul.f32.gmra.mxu2 %v1886_v30  ;;  %v1887_v49 = vand.u32 4294901760, %v1886_v30 }
 0x4b4   :  { %2822 = vadd.xlane.f32.xlu2 %v2821_v26  ;;  %v1904_v1 = vsub.f32 %v1902_v33, %v1903_v62 }
 0x4b5   :  { %v1823_v7 = vpop.permute.xlu0 %1822  ;;  %2103 = vmatmul.f32.gmra.mxu3 %v1887_v49  ;;  %v1888_v42 = vsub.f32 %v1886_v30, %v1887_v49 }
 0x4b6   :  { %v1839_v5 = vsel %vm1832_vm8, %v1823_v7, 0  ;;  %v1905_v56 = vand.u32 4294901760, %v1904_v1 }
 0x4b7   :  { %v4418_v3 = vand.u32 4294901760, %v1839_v5  ;;  %v1889_v24 = vand.u32 4294901760, %v1888_v42 }
 0x4b9   :  { %v1894_v54 = vsub.f32 %v1839_v5, %v4418_v3  ;;  %1890 = vmatmul.f32.gmra.mxu0 %v1889_v24  ;;  %1983 = vmatmul.f32.gmra.mxu1 %v4418_v3 }
 0x4bb   :  { %2044 = vmatmul.f32.gmra.mxu2 %v1894_v54  ;;  %v1895_v58 = vand.u32 4294901760, %v1894_v54 }
 0x4bd   :  { %2109 = vmatmul.f32.gmra.mxu3 %v1895_v58  ;;  %v1896_v19 = vsub.f32 %v1894_v54, %v1895_v58  ;;  %v1831_v14 = vpop.permute.xlu2 %1830 }
 0x4be   :  { %v1847_v4 = vsel %vm1832_vm8, %v1831_v14, 0 }
 0x4bf   :  { %v1897_v36 = vand.u32 4294901760, %v1896_v19  ;;  %v4436_v26 = vand.u32 4294901760, %v1847_v4 }
 0x4c1   :  { %1898 = vmatmul.f32.gmra.mxu0 %v1897_v36  ;;  %1987 = vmatmul.f32.gmra.mxu1 %v4416_v60 }
 0x4c3   :  { %2049 = vmatmul.f32.gmra.mxu2 %v1902_v33 }
 0x4c5   :  { %v1827_v27 = vpop.permute.xlu1 %1826  ;;  %2115 = vmatmul.f32.gmra.mxu3 %v1903_v62 }
 0x4c6   :  { %v1843_v44 = vsel %vm1832_vm8, %v1827_v27, 0  ;;  %2920 = vrot.lane.b32.xlu1 %v4898_v45, %s3180_s5 }
 0x4c7   :  { %v4427_v29 = vand.u32 4294901760, %v1843_v44 }
 0x4c9   :  { %v1910_v25 = vsub.f32 %v1843_v44, %v4427_v29  ;;  %1906 = vmatmul.f32.gmra.mxu0 %v1905_v56  ;;  %1991 = vmatmul.f32.gmra.mxu1 %v4427_v29 }
 0x4cb   :  { %2054 = vmatmul.f32.gmra.mxu2 %v1910_v25  ;;  %v1911_v34 = vand.u32 4294901760, %v1910_v25 }
 0x4cc   :  { %2251 = vrot.lane.b32.xlu2 %v4269_v46, %s3181_s14  ;;  %v1926_v46 = vsub.f32 %v1847_v4, %v4436_v26 }
 0x4cd   :  { %v1829_v41 = vpop.permute.xlu0 %1828  ;;  %2121 = vmatmul.f32.gmra.mxu3 %v1911_v34  ;;  %v1912_v30 = vsub.f32 %v1910_v25, %v1911_v34 }
 0x4ce   :  { %v1845_v45 = vsel %vm1832_vm8, %v1829_v41, 0  ;;  %2928 = vrot.lane.b32.xlu1 %v4902_v61, %s3180_s5  ;;  %v1927_v24 = vand.u32 4294901760, %v1926_v46 }
 0x4cf   :  { %v4438_v49 = vand.u32 4294901760, %v1845_v45  ;;  %v1913_v20 = vand.u32 4294901760, %v1912_v30 }
 0x4d0   :  { %v1928_v54 = vsub.f32 %v1926_v46, %v1927_v24 }
 0x4d1   :  { %v1918_v7 = vsub.f32 %v1845_v45, %v4438_v49  ;;  %1914 = vmatmul.f32.gmra.mxu0 %v1913_v20  ;;  %1995 = vmatmul.f32.gmra.mxu1 %v4438_v49 }
 0x4d2   :  { %v1929_v33 = vand.u32 4294901760, %v1928_v54  ;;  %v2875_v54 = vmul.f32 %v4087_v2, %v4087_v2 }
 0x4d3   :  { %2059 = vmatmul.f32.gmra.mxu2 %v1918_v7  ;;  %v1919_v42 = vand.u32 4294901760, %v1918_v7 }
 0x4d4   :  { %2924 = vrot.lane.b32.xlu2 %v4900_v15, %s3180_s5 }
 0x4d5   :  { %2127 = vmatmul.f32.gmra.mxu3 %v1919_v42  ;;  %v1920_v5 = vsub.f32 %v1918_v7, %v1919_v42 }
 0x4d6   :  { %2934 = vrot.lane.b32.xlu1 %v4905_v35, %s3180_s5 }
 0x4d7   :  { %v1921_v61 = vand.u32 4294901760, %v1920_v5 }
 0x4d9   :  { %1922 = vmatmul.f32.gmra.mxu0 %v1921_v61  ;;  %1999 = vmatmul.f32.gmra.mxu1 %v4436_v26 }
 0x4db   :  { %2064 = vmatmul.f32.gmra.mxu2 %v1926_v46 }
 0x4dc   :  { %2930 = vrot.lane.b32.xlu2 %v4903_v16, %s3180_s5 }
 0x4dd   :  { %2133 = vmatmul.f32.gmra.mxu3 %v1927_v24 }
 0x4e1   :  { %1930 = vmatmul.f32.gmra.mxu0 %v1929_v33  ;;  %2219 = vmatmul.f32.vlgmr.msra.gmra.mxu1 %v4368_v55 }
 0x4e9   :  { %2166 = vmatmul.f32.vlgmr.msra.gmra.mxu0 %v4368_v55  ;;  %2223 = vmatmul.f32.gmra.mxu1 %v4401_v59 }
 0x4f0   :  { %v2719_v15 = vpop.xlane.xlu1 %2718 }
 0x4f1   :  { %2170 = vmatmul.f32.gmra.mxu0 %v4401_v59  ;;  %2227 = vmatmul.f32.gmra.mxu1 %v4410_v17 }
 0x4f8   :  { %v2754_v35 = vpop.xlane.xlu1 %2753  ;;  %v2722_v58 = vpop.xlane.xlu0 %2721 }
 0x4f9   :  { %2174 = vmatmul.f32.gmra.mxu0 %v4410_v17  ;;  %2231 = vmatmul.f32.gmra.mxu1 %v4418_v3  ;;  %v2787_v27 = vmul.f32 %v2754_v35, %v2722_v58 }
 0x4ff   :  { %v2751_v16 = vpop.xlane.xlu2 %2750 }
 0x500   :  { %v2725_v19 = vpop.xlane.xlu0 %2724  ;;  %v2728_v36 = vpop.xlane.xlu1 %2727  ;;  %v2786_v1 = vmul.f32 %v2751_v16, %v2719_v15  ;;  %v2877_v16 = vmul.f32 %v4110_v47, %v4110_v47 }
 0x501   :  { %2178 = vmatmul.f32.gmra.mxu0 %v4418_v3  ;;  %2235 = vmatmul.f32.gmra.mxu1 %v4416_v60 }
 0x502   :  { %v2795_v34 = vsel %vm2794_vm10, %v2786_v1, 0.0 }
 0x506   :  { %v1972_v44 = vpop.f32.mrf.mxu1 }
 0x507   :  { %v2757_v55 = vpop.xlane.xlu2 %2756 }
 0x508   :  { %v2760_v62 = vpop.xlane.xlu0 %2759  ;;  %v2763_v59 = vpop.xlane.xlu1 %2762  ;;  %v2788_v17 = vmul.f32 %v2757_v55, %v2725_v19 }
 0x509   :  { %2182 = vmatmul.f32.gmra.mxu0 %v4416_v60  ;;  %2239 = vmatmul.f32.gmra.mxu1 %v4427_v29  ;;  %v2796_v60 = vsel %vm2794_vm10, %v2787_v27, 0.0  ;;  %v2789_v45 = vmul.f32 %v2760_v62, %v2728_v36  ;;  %v2883_v62 = vsel %vm1095_vm4, %v2875_v54, 0.0  ;;  %v2886_v27 = vsel %vm1095_vm4, %v2877_v16, 0.0 }
 0x50a   :  { %v2798_v30 = vsel %vm2794_vm10, %v2788_v17, 0.0  ;;  %v2797_v7 = vadd.f32 %v2796_v60, %v2795_v34 }
 0x50b   :  { %v2800_v24 = vsel %vm2794_vm10, %v2789_v45, 0.0  ;;  %v2881_v45 = vmul.f32 %v4226_v63, %v4226_v63 }
 0x50c   :  { %v2799_v5 = vadd.f32 %v2798_v30, %v2797_v7 }
 0x50e   :  { %v1875_v56 = vpop.f32.mrf.mxu0  ;;  %v2030_v3 = vpop.f32.mrf.mxu2  ;;  %v2801_v19 = vadd.f32 %v2800_v24, %v2799_v5 }
 0x50f   :  { %v1973_v14 = vadd.f32 %v1972_v44, %v1875_v56  ;;  %v2731_v25 = vpop.xlane.xlu2 %2730 }
 0x510   :  { %v2734_v4 = vpop.xlane.xlu0 %2733  ;;  %v2790_v42 = vmul.f32 %v2763_v59, %v2731_v25  ;;  %v2737_v61 = vpop.xlane.xlu1 %2736 }
 0x511   :  { %v2031_v41 = vadd.f32 %v2030_v3, %v1973_v14  ;;  %2186 = vmatmul.f32.gmra.mxu0 %v4427_v29  ;;  %2243 = vmatmul.f32.gmra.mxu1 %v4438_v49  ;;  %v2092_v20 = vpop.f32.mrf.mxu3  ;;  %v2876_v29 = vmul.f32 %v4083_v53, %v4083_v53  ;;  %v2878_v14 = vmul.f32 %v4135_v0, %v4135_v0 }
 0x512   :  { %v2802_v15 = vsel %vm2794_vm10, %v2790_v42, 0.0 }
 0x513   :  { %v4466_v46 = vadd.f32 %v2092_v20, %v2031_v41  ;;  %v2884_v59 = vsel %vm1095_vm4, %v2876_v29, 0.0  ;;  %v2803_v1 = vadd.f32 %v2802_v15, %v2801_v19  ;;  %v2880_v41 = vmul.f32 %v4183_v48, %v4183_v48 }
 0x514   :  { %v2885_v17 = vadd.f32 %v2884_v59, %v2883_v62  ;;  %v2888_v20 = vsel %vm1095_vm4, %v2878_v14, 0.0  ;;  %v2894_v29 = vsel %vm1095_vm4, %v2881_v45, 0.0 }
 0x515   :  { %v2892_v24 = vsel %vm1095_vm4, %v2880_v41, 0.0 }
 0x516   :  { %v2887_v3 = vadd.f32 %v2886_v27, %v2885_v17 }
 0x517   :  { %v2766_v33 = vpop.xlane.xlu2 %2765 }
 0x518   :  { %v2791_v35 = vmul.f32 %v2766_v33, %v2734_v4  ;;  %v2769_v58 = vpop.xlane.xlu0 %2768  ;;  %v2772_v25 = vpop.xlane.xlu1 %2771  ;;  %v2889_v5 = vadd.f32 %v2888_v20, %v2887_v3 }
 0x519   :  { %2190 = vmatmul.f32.gmra.mxu0 %v4438_v49  ;;  %2247 = vmatmul.f32.gmra.mxu1 %v4436_v26  ;;  %v2792_v55 = vmul.f32 %v2769_v58, %v2737_v61  ;;  %v2879_v49 = vmul.f32 %v4160_v32, %v4160_v32  ;;  %v2882_v61 = vmul.f32 %v4247_v10, %v4247_v10 }
 0x51a   :  { %v2804_v36 = vsel %vm2794_vm10, %v2791_v35, 0.0 }
 0x51b   :  { %v2805_v44 = vadd.f32 %v2804_v36, %v2803_v1  ;;  %v2806_v56 = vsel %vm2794_vm10, %v2792_v55, 0.0  ;;  %v2890_v7 = vsel %vm1095_vm4, %v2879_v49, 0.0  ;;  %v2896_v15 = vsel %vm1095_vm4, %v2882_v61, 0.0 }
 0x51c   :  { %v2891_v54 = vadd.f32 %v2890_v7, %v2889_v5 }
 0x51d   :  { %v2807_v60 = vadd.f32 %v2806_v56, %v2805_v44 }
 0x51e   :  { %v2893_v33 = vadd.f32 %v2892_v24, %v2891_v54 }
 0x51f   :  { %v2740_v34 = vpop.xlane.xlu2 %2739 }
 0x520   :  { %v2793_v4 = vmul.f32 %v2772_v25, %v2740_v34  ;;  %v2895_v35 = vadd.f32 %v2894_v29, %v2893_v33 }
 0x521   :  { %2194 = vmatmul.f32.gmra.mxu0 %v4436_v26 }
 0x522   :  { %v2808_v30 = vsel %vm2794_vm10, %v2793_v4, 0.0  ;;  %v2897_v58 = vadd.f32 %v2896_v15, %v2895_v35 }
 0x523   :  { %v2809_v42 = vadd.f32 %v2808_v30, %v2807_v60 }
 0x525   :  { %2810 = vadd.xlane.f32.xlu0 %v2809_v42 }
 0x526   :  { %v1976_v26 = vpop.f32.mrf.mxu1 }
 0x52d   :  { %2898 = vadd.xlane.f32.xlu0 %v2897_v58 }
 0x52e   :  { %v1883_v16 = vpop.f32.mrf.mxu0  ;;  %v1980_v19 = vpop.f32.mrf.mxu1 }
 0x52f   :  { %v4500_v36 = vadd.f32 %v1976_v26, %v1883_v16  ;;  %v2035_v60 = vpop.f32.mrf.mxu2 }
 0x530   :  { %v4510_v20 = vpop.f32.mrf.mxu3 }
 0x536   :  { %v1891_v55 = vpop.f32.mrf.mxu0  ;;  %v1984_v62 = vpop.f32.mrf.mxu1 }
 0x537   :  { %v4502_v59 = vadd.f32 %v1980_v19, %v1891_v55 }
 0x538   :  { %v2104_v61 = vpop.f32.mrf.mxu3 }
 0x53e   :  { %v1899_v1 = vpop.f32.mrf.mxu0  ;;  %v1988_v27 = vpop.f32.mrf.mxu1 }
 0x53f   :  { %v1985_v44 = vadd.f32 %v1984_v62, %v1899_v1  ;;  %v2823_v1 = vpop.xlane.xlu2 %2822 }
 0x540   :  { %v2110_v26 = vpop.f32.mrf.mxu3 }
 0x541   :  { %2922 = vrot.lane.b32.xlu0 %v4899_v40, %s3180_s5  ;;  %v2040_v40 = vpop.f32.mrf.mxu2 }
 0x546   :  { %v1907_v17 = vpop.f32.mrf.mxu0  ;;  %v1992_v56 = vpop.f32.mrf.mxu1 }
 0x547   :  { %v1989_v14 = vadd.f32 %v1988_v27, %v1907_v17  ;;  %v3182_v17 = vmov 4096.0  }
 0x548   :  { %v2116_v35 = vpop.f32.mrf.mxu3  ;;  %3153 = vrcp.f32 %v3182_v17 }
 0x549   :  { %2926 = vrot.lane.b32.xlu0 %v4901_v28, %s3180_s5  ;;  %v2045_v54 = vpop.f32.mrf.mxu2 }
 0x54a   :  { %v2046_v23 = vadd.f32 %v2045_v54, %v1985_v44 }
 0x54e   :  { %v1915_v49 = vpop.f32.mrf.mxu0  ;;  %v1996_v25 = vpop.f32.mrf.mxu1 }
 0x54f   :  { %v1993_v34 = vadd.f32 %v1992_v56, %v1915_v49  ;;  %v4523_v32 = vpop.eup %3153 }
 0x550   :  { %v2122_v62 = vpop.f32.mrf.mxu3  ;;  %v2867_v47 = vmul.f32 4096.0, %v4523_v32  ;;  %vm2871_vm11 = vweird.f32 %v4523_v32 }
 0x551   :  { %2932 = vrot.lane.b32.xlu0 %v4904_v57, %s3180_s5  ;;  %v2050_v15 = vpop.f32.mrf.mxu2 }
 0x552   :  { %v2051_v10 = vadd.f32 %v2050_v15, %v1989_v14 }
 0x554   :  { %v2117_v17 = vadd.f32 %v2116_v35, %v2051_v10 }
 0x556   :  { %v1923_v3 = vpop.f32.mrf.mxu0  ;;  %v2000_v4 = vpop.f32.mrf.mxu1 }
 0x557   :  { %v1997_v41 = vadd.f32 %v1996_v25, %v1923_v3  ;;  %v2824_v3 = vrot.slane %v2823_v1, 4 }
 0x558   :  { %v2128_v48 = vpop.f32.mrf.mxu3 }
 0x559   :  { %v2055_v19 = vpop.f32.mrf.mxu2  ;;  %v2825_v63 = vadd.f32 %v2824_v3, %v2823_v1 }
 0x55b   :  { %v2826_v43 = vrot.slane %v2825_v63, 2 }
 0x55d   :  { %v2827_v54 = vadd.f32 %v2826_v43, %v2825_v63 }
 0x55e   :  { %v1931_v30 = vpop.f32.mrf.mxu0  ;;  %v2220_v45 = vpop.f32.mrf.mxu1 }
 0x55f   :  { %v2001_v2 = vadd.f32 %v2000_v4, %v1931_v30  ;;  %v2111_v4 = vadd.f32 %v2110_v26, %v2046_v23  ;;  %v2828_v43 = vrot.slane %v2827_v54, 1 }
 0x561   :  { %v2060_v49 = vpop.f32.mrf.mxu2 }
 0x566   :  { %v2167_v7 = vpop.f32.mrf.mxu0  ;;  %v4512_v42 = vpop.f32.mrf.mxu1 }
 0x567   :  { %v2168_v28 = vadd.f32 %v2167_v7, %v4466_v46  ;;  %v2857_v46 = vpop.xlane.xlu1 %2856  ;;  %v2061_v7 = vadd.f32 %v2060_v49, %v1997_v41  ;;  %v2041_v41 = vadd.f32 %v2040_v40, %v4502_v59 }
 0x568   :  { %v2858_v56 = vrot.slane %v2857_v46, 4 }
 0x569   :  { %v4515_v5 = vadd.f32 %v2220_v45, %v2168_v28  ;;  %v2056_v45 = vadd.f32 %v2055_v19, %v1993_v34  ;;  %v2129_v0 = vadd.f32 %v2128_v48, %v2061_v7  ;;  %v2065_v14 = vpop.f32.mrf.mxu2  ;;  %v2036_v48 = vadd.f32 %v2035_v60, %v4500_v36 }
 0x56a   :  { %v2859_v28 = vadd.f32 %v2858_v56, %v2857_v46  ;;  %v2868_v46 = vsub.f32 1.0, %v2867_v47  ;;  %v2066_v1 = vadd.f32 %v2065_v14, %v2001_v2  ;;  %v2105_v35 = vadd.f32 %v2104_v61, %v2041_v41 }
 0x56b   :  { %v2123_v53 = vadd.f32 %v2122_v62, %v2056_v45  ;;  %v2134_v62 = vpop.f32.mrf.mxu3  ;;  %v2099_v2 = vadd.f32 %v4510_v20, %v2036_v48  ;;  %v2829_v41 = vadd.f32 %v2828_v43, %v2827_v54  ;;  %v4582_v54 = vand.u32 4294901760, %v4515_v5 }
 0x56c   :  { %v2860_v31 = vrot.slane %v2859_v28, 2  ;;  %v2135_v59 = vadd.f32 %v2134_v62, %v2066_v1 }
 0x56e   :  { %v4517_v24 = vpop.f32.mrf.mxu0  ;;  %v4519_v57 = vpop.f32.mrf.mxu1  ;;  %v2861_v30 = vadd.f32 %v2860_v31, %v2859_v28 }
 0x56f   :  { %v2172_v63 = vadd.f32 %v4517_v24, %v2099_v2 }
 0x570   :  { %v2862_v36 = vrot.slane %v2861_v30, 1 }
 0x572   :  { %v2863_v45 = vadd.f32 %v2862_v36, %v2861_v30 }
 0x576   :  { %v2175_v29 = vpop.f32.mrf.mxu0  ;;  %v4521_v33 = vpop.f32.mrf.mxu1 }
 0x57e   :  { %v2179_v58 = vpop.f32.mrf.mxu0  ;;  %v2236_v16 = vpop.f32.mrf.mxu1 }
 0x586   :  { %v2183_v55 = vpop.f32.mrf.mxu0  ;;  %v2240_v27 = vpop.f32.mrf.mxu1 }
 0x587   :  { %v2184_v15 = vadd.f32 %v2183_v55, %v2117_v17  ;;  %v2225_v17 = vadd.f32 %v4512_v42, %v2172_v63 }
 0x589   :  { %v4568_v48 = vand.u32 4294901760, %v2225_v17 }
 0x58b   :  { %v2388_v2 = vsub.f32 %v2225_v17, %v4568_v48 }
 0x58d   :  { %v2389_v43 = vand.u32 4294901760, %v2388_v2 }
 0x58e   :  { %v2187_v25 = vpop.f32.mrf.mxu0  ;;  %v2244_v9 = vpop.f32.mrf.mxu1 }
 0x58f   :  { %v2188_v37 = vadd.f32 %v2187_v25, %v2123_v53  ;;  %v2180_v53 = vadd.f32 %v2179_v58, %v2111_v4 }
 0x591   :  { %v2241_v44 = vadd.f32 %v2240_v27, %v2188_v37  ;;  %v2233_v60 = vadd.f32 %v4521_v33, %v2180_v53 }
 0x593   :  { %v4532_v23 = vand.u32 4294901760, %v2241_v44 }
 0x595   :  { %v4547_v28 = vsub.f32 %v2241_v44, %v4532_v23 }
 0x596   :  { %v2191_v21 = vpop.f32.mrf.mxu0  ;;  %v2248_v26 = vpop.f32.mrf.mxu1 }
 0x597   :  { %v2192_v34 = vadd.f32 %v2191_v21, %v2129_v0  ;;  %v2237_v0 = vadd.f32 %v2236_v16, %v2184_v15  ;;  %v2869_v21 = vmul.f32 %v4523_v32, %v2868_v46 }
 0x598   :  { %v2811_v19 = vpop.xlane.xlu0 %2810 }
 0x599   :  { %v2245_v56 = vadd.f32 %v2244_v9, %v2192_v34  ;;  %v2812_v49 = vrot.slane %v2811_v19, 4  ;;  %v2176_v9 = vadd.f32 %v2175_v29, %v2105_v35  ;;  %v4536_v61 = vand.u32 4294901760, %v2237_v0 }
 0x59a   :  { %v2870_v16 = vadd.f32 %v4523_v32, %v2869_v21  ;;  %v4550_v34 = vand.u32 4294901760, %v2233_v60 }
 0x59b   :  { %v2813_v10 = vadd.f32 %v2812_v49, %v2811_v19  ;;  %v4529_v40 = vand.u32 4294901760, %v2245_v56  ;;  %v2229_v3 = vadd.f32 %v4519_v57, %v2176_v9  ;;  %v4553_v14 = vsub.f32 %v2237_v0, %v4536_v61 }
 0x59c   :  { %v2872_v19 = vsel %vm2871_vm11, %v4523_v32, %v2870_v16  ;;  %v2365_v49 = vand.u32 4294901760, %v4547_v28  ;;  %v4572_v32 = vsub.f32 %v2233_v60, %v4550_v34 }
 0x59d   :  { %v2814_v47 = vrot.slane %v2813_v10, 2  ;;  %v4540_v25 = vsub.f32 %v2245_v56, %v4529_v40  ;;  %v4562_v42 = vand.u32 4294901760, %v2229_v3 }
 0x59e   :  { %v2195_v55 = vpop.f32.mrf.mxu0  ;;  %v2366_v53 = vsub.f32 %v4547_v28, %v2365_v49  ;;  %v2377_v21 = vand.u32 4294901760, %v4572_v32 }
 0x59f   :  { %v2196_v37 = vadd.f32 %v2195_v55, %v2135_v59  ;;  %v2815_v31 = vadd.f32 %v2814_v47, %v2813_v10  ;;  %v2359_v46 = vand.u32 4294901760, %v4540_v25  ;;  %v2371_v10 = vand.u32 4294901760, %v4553_v14 }
 0x5a0   :  { %v2899_v58 = vpop.xlane.xlu0 %2898  ;;  %v2382_v0 = vsub.f32 %v2229_v3, %v4562_v42  ;;  %v2367_v9 = vand.u32 4294901760, %v2366_v53  ;;  %v2394_v55 = vsub.f32 %v4515_v5, %v4582_v54  ;;  %v4922_v3 = vld [vmem:[#allocation41_spill] sm:$0xff] }
 0x5a1   :  { %v2249_v27 = vadd.f32 %v2248_v26, %v2196_v37  ;;  %v2900_v20 = vrot.slane %v2899_v58, 4  ;;  %v2816_v29 = vrot.slane %v2815_v31, 1  ;;  %v2360_v44 = vsub.f32 %v4540_v25, %v2359_v46 }
 0x5a2   :  { %v2372_v47 = vsub.f32 %v4553_v14, %v2371_v10  ;;  %v2383_v36 = vand.u32 4294901760, %v2382_v0  ;;  %v2378_v37 = vsub.f32 %v4572_v32, %v2377_v21  ;;  %v2395_v5 = vand.u32 4294901760, %v2394_v55 }
 0x5a3   :  { %v4544_v24 = vand.u32 4294901760, %v2249_v27  ;;  %v2901_v33 = vadd.f32 %v2900_v20, %v2899_v58  ;;  %v2817_v7 = vadd.f32 %v2816_v29, %v2815_v31  ;;  %v2361_v59 = vand.u32 4294901760, %v2360_v44  ;;  %v4920_v29 = vld [vmem:[#allocation35_spill] sm:$0xff] }
 0x5a4   :  { %v2373_v31 = vand.u32 4294901760, %v2372_v47  ;;  %v2384_v63 = vsub.f32 %v2382_v0, %v2383_v36  ;;  %v2379_v60 = vand.u32 4294901760, %v2378_v37  ;;  %v2390_v26 = vsub.f32 %v2388_v2, %v2389_v43 }
 0x5a5   :  { %v4556_v57 = vsub.f32 %v2249_v27, %v4544_v24  ;;  %v2902_v15 = vrot.slane %v2901_v33, 2  ;;  %2263 = vmatpush.msra.mxu2 %v4544_v24  ;;  %2514 = vmatpush.msrb.mxu1 %v4544_v24  ;;  %3031 = vpush %v2817_v7  ;;  %v2396_v16 = vsub.f32 %v2394_v55, %v2395_v5  ;;  %v4926_v7 = vld [vmem:[#allocation38_spill] sm:$0xff] }
 0x5a6   :  { %3033 = vpush %v2829_v41  ;;  %v2385_v58 = vand.u32 4294901760, %v2384_v63  ;;  %v2391_v27 = vand.u32 4294901760, %v2390_v26 }
 0x5a7   :  { %v2353_v1 = vand.u32 4294901760, %v4556_v57  ;;  %3035 = vpush %v2863_v45  ;;  %2265 = vmatpush.msra.mxu2 %v4529_v40  ;;  %2442 = vmatpush.msrb.mxu0 %v4556_v57  ;;  %v2903_v56 = vadd.f32 %v2902_v15, %v2901_v33  ;;  %v2397_v20 = vand.u32 4294901760, %v2396_v16  ;;  %v4923_v45 = vld [vmem:[#allocation33_spill] sm:$0xff]  ;;  %v4925_v33 = vld [vmem:[#allocation39_spill] sm:$0xff] }
 0x5a8   :  { %2516 = vmatpush.msrb.mxu1 %v4529_v40  ;;  %3037 = vpush %v2872_v19 }
 0x5a9   :  { %2267 = vmatpush.msra.mxu2 %v4532_v23  ;;  %2445 = vmatpush.msrb.mxu0 %v4540_v25  ;;  %v2354_v4 = vsub.f32 %v4556_v57, %v2353_v1  ;;  %v2904_v30 = vrot.slane %v2903_v56, 1  ;;  %v4921_v25 = vld [vmem:[#allocation34_spill] sm:$0xff] }
 0x5aa   :  { %2518 = vmatpush.msrb.mxu1 %v4532_v23 }
 0x5ab   :  { %2269 = vmatpush.msra.mxu2 %v4536_v61  ;;  %2448 = vmatpush.msrb.mxu0 %v4547_v28  ;;  %v2355_v35 = vand.u32 4294901760, %v2354_v4  ;;  %v2905_v62 = vadd.f32 %v2904_v30, %v2903_v56  ;;  %v4670_v4 = vpop.permute.xlu2 %2251 }
 0x5ac   :  { %2520 = vmatpush.msrb.mxu1 %v4536_v61 }
 0x5ad   :  { %2271 = vmatpush.msra.mxu2 %v4550_v34  ;;  %2356 = vmatpush.msra.mxu3 %v2355_v35  ;;  %3039 = vpush %v2905_v62 }
 0x5ae   :  { %2451 = vmatpush.msrb.mxu0 %v4553_v14  ;;  %2522 = vmatpush.msrb.mxu1 %v4550_v34 }
 0x5af   :  { %2273 = vmatpush.msra.mxu2 %v4562_v42  ;;  %2362 = vmatpush.msra.mxu3 %v2361_v59 }
 0x5b0   :  { %2454 = vmatpush.msrb.mxu0 %v4572_v32  ;;  %2524 = vmatpush.msrb.mxu1 %v4562_v42 }
 0x5b1   :  { %2275 = vmatpush.msra.mxu2 %v4568_v48  ;;  %2368 = vmatpush.msra.mxu3 %v2367_v9 }
 0x5b2   :  { %2457 = vmatpush.msrb.mxu0 %v2382_v0  ;;  %2526 = vmatpush.msrb.mxu1 %v4568_v48 }
 0x5b3   :  { %2277 = vmatpush.msra.mxu2 %v4582_v54  ;;  %2374 = vmatpush.msra.mxu3 %v2373_v31 }
 0x5b4   :  { %2460 = vmatpush.msrb.mxu0 %v2388_v2  ;;  %2528 = vmatpush.msrb.mxu1 %v4582_v54 }
 0x5b5   :  { %2283 = vmatmul.f32.vlgmr.msra.gmra.mxu2 %v4127_v52  ;;  %2532 = vmatmul.f32.vlgmr.msrb.gmra.mxu1 %v4115_v11  ;;  %v4908_v11 = vld [vmem:[#allocation22_spill] sm:$0xff]  ;;  %v4910_v52 = vld [vmem:[#allocation29_spill] sm:$0xff] }
 0x5b6   :  { %2589 = vmatpush.msrb.mxu2 %v2353_v1  ;;  %2380 = vmatpush.msra.mxu3 %v2379_v60 }
 0x5b7   :  { %2463 = vmatpush.msrb.mxu0 %v2394_v55 }
 0x5b8   :  { %2466 = vmatmul.f32.vlgmr.msrb.gmra.mxu0 %v4100_v18  ;;  %2593 = vmatpush.msrb.mxu2 %v2359_v46  ;;  %v4907_v18 = vld [vmem:[#allocation15_spill] sm:$0xff] }
 0x5b9   :  { %2386 = vmatpush.msra.mxu3 %v2385_v58 }
 0x5ba   :  { %2597 = vmatpush.msrb.mxu2 %v2365_v49 }
 0x5bb   :  { %2392 = vmatpush.msra.mxu3 %v2391_v27 }
 0x5bc   :  { %2601 = vmatpush.msrb.mxu2 %v2371_v10 }
 0x5bd   :  { %2398 = vmatpush.msra.mxu3 %v2397_v20  ;;  %2291 = vmatmul.f32.gmra.mxu2 %v4152_v22  ;;  %v4912_v22 = vld [vmem:[#allocation26_spill] sm:$0xff] }
 0x5be   :  { %2400 = vmatmul.f32.vlgmr.msra.gmra.mxu3 %v4094_v50  ;;  %2538 = vmatmul.f32.gmra.mxu1 %v4130_v51  ;;  %v4911_v51 = vld [vmem:[#allocation20_spill] sm:$0xff] }
 0x5bf   :  { %2605 = vmatpush.msrb.mxu2 %v2377_v21  ;;  %2660 = vmatpush.msrb.mxu3 %v4544_v24  ;;  %v4924_v24 = vld [vmem:[#allocation40_spill] sm:$0xff] }
 0x5c0   :  { %2471 = vmatmul.f32.gmra.mxu0 %v4118_v38  ;;  %v4909_v38 = vld [vmem:[#allocation21_spill] sm:$0xff] }
 0x5c1   :  { %2609 = vmatpush.msrb.mxu2 %v2383_v36  ;;  %2662 = vmatpush.msrb.mxu3 %v4529_v40  ;;  %v4916_v40 = vld [vmem:[#allocation30_spill] sm:$0xff] }
 0x5c3   :  { %2613 = vmatpush.msrb.mxu2 %v2389_v43  ;;  %2664 = vmatpush.msrb.mxu3 %v4532_v23  ;;  %v4918_v23 = vld [vmem:[#allocation36_spill] sm:$0xff] }
 0x5c5   :  { %2617 = vmatpush.msrb.mxu2 %v2395_v5  ;;  %2666 = vmatpush.msrb.mxu3 %v4536_v61  ;;  %v4919_v61 = vld [vmem:[#allocation27_spill] sm:$0xff] }
 0x5c6   :  { %2299 = vmatmul.f32.gmra.mxu2 %v4175_v8  ;;  %2404 = vmatmul.f32.gmra.mxu3 %v4103_v13  ;;  %v4915_v8 = vld [vmem:[#allocation23_spill] sm:$0xff] }
 0x5c7   :  { %2544 = vmatmul.f32.gmra.mxu1 %v4155_v6  ;;  %2668 = vmatpush.msrb.mxu3 %v4550_v34  ;;  %v4914_v6 = vld [vmem:[#allocation31_spill] sm:$0xff] }
 0x5c8   :  { %2476 = vmatmul.f32.gmra.mxu0 %v4145_v12  ;;  %v4913_v12 = vld [vmem:[#allocation25_spill] sm:$0xff] }
 0x5c9   :  { %2670 = vmatpush.msrb.mxu3 %v4562_v42 }
 0x5cb   :  { %2672 = vmatpush.msrb.mxu3 %v4568_v48 }
 0x5cd   :  { %2674 = vmatpush.msrb.mxu3 %v4582_v54 }
 0x5ce   :  { %2307 = vmatmul.f32.gmra.mxu2 %v4196_v39  ;;  %2408 = vmatmul.f32.gmra.mxu3 %v4907_v18  ;;  %v4917_v39 = vld [vmem:[#allocation28_spill] sm:$0xff] }
 0x5cf   :  { %2550 = vmatmul.f32.gmra.mxu1 %v4908_v11 }
 0x5d0   :  { %2481 = vmatmul.f32.gmra.mxu0 %v4909_v38 }
 0x5d6   :  { %2315 = vmatmul.f32.gmra.mxu2 %v4910_v52  ;;  %2412 = vmatmul.f32.gmra.mxu3 %v4911_v51  ;;  %s3032_s16 = spop %3031 }
 0x5d7   :  { %2556 = vmatmul.f32.gmra.mxu1 %v4912_v22  ;;  %s3034_s17 = spop %3033 }
 0x5d8   :  { %2486 = vmatmul.f32.gmra.mxu0 %v4913_v12  ;;  %s2831_s18 = sadd.f32 %s3034_s17, %s3032_s16  ;;  %s3036_s19 = spop %3035 }
 0x5d9   :  { %s3038_s20 = spop %3037 }
 0x5da   :  { %s2832_s1 = smul.f32 0.5, %s2831_s18 }
 0x5dc   :  { %s2865_s22 = ssub.f32 %s2832_s1, %s3036_s19 }
 0x5de   :  { %2323 = vmatmul.f32.gmra.mxu2 %v4914_v6  ;;  %2416 = vmatmul.f32.gmra.mxu3 %v4915_v8  ;;  %s3040_s21 = spop %3039  ;;  %s2874_s24 = smul.f32 %s3038_s20, %s2865_s22 }
 0x5df   :  { %2562 = vmatmul.f32.gmra.mxu1 %v4916_v40  ;;  %s2915_s23 = smul.f32 %s3040_s21, %s3038_s20 }
 0x5e0   :  { %2491 = vmatmul.f32.gmra.mxu0 %v4917_v39  ;;  %s2916_s26 = smul.f32 0.1, %s2874_s24 }
 0x5e1   :  { %s2917_s25 = smul.f32 0.01, %s2915_s23 }
 0x5e3   :  { %s2918_s27 = sadd.f32 %s2917_s25, %s2916_s26 }
 0x5e6   :  { %2331 = vmatmul.f32.gmra.mxu2 %v4918_v23  ;;  %2420 = vmatmul.f32.gmra.mxu3 %v4919_v61 }
 0x5e7   :  { %2568 = vmatmul.f32.gmra.mxu1 %v4920_v29 }
 0x5e8   :  { %2496 = vmatmul.f32.gmra.mxu0 %v4921_v25 }
 0x5ee   :  { %2339 = vmatmul.f32.gmra.mxu2 %v4922_v3  ;;  %2424 = vmatmul.f32.gmra.mxu3 %v4923_v45 }
 0x5ef   :  { %2574 = vmatmul.f32.gmra.mxu1 %v4924_v24 }
 0x5f0   :  { %2501 = vmatmul.f32.gmra.mxu0 %v4925_v33 }
 0x5f6   :  { %2428 = vmatmul.f32.gmra.mxu3 %v4926_v7  ;;  %2619 = vmatmul.f32.vlgmr.msrb.gmra.mxu2 %v4094_v50 }
 0x5fe   :  { %2623 = vmatmul.f32.gmra.mxu2 %v4103_v13  ;;  %2676 = vmatmul.f32.vlgmr.msrb.gmra.mxu3 %v4094_v50 }
 0x606   :  { %2627 = vmatmul.f32.gmra.mxu2 %v4907_v18  ;;  %2680 = vmatmul.f32.gmra.mxu3 %v4103_v13 }
 0x60e   :  { %2631 = vmatmul.f32.gmra.mxu2 %v4911_v51  ;;  %2684 = vmatmul.f32.gmra.mxu3 %v4907_v18 }
 0x616   :  { %2635 = vmatmul.f32.gmra.mxu2 %v4915_v8  ;;  %2688 = vmatmul.f32.gmra.mxu3 %v4911_v51 }
 0x61e   :  { %2639 = vmatmul.f32.gmra.mxu2 %v4919_v61  ;;  %2692 = vmatmul.f32.gmra.mxu3 %v4915_v8 }
 0x626   :  { %2643 = vmatmul.f32.gmra.mxu2 %v4923_v45  ;;  %2696 = vmatmul.f32.gmra.mxu3 %v4919_v61 }
 0x62e   :  { %2647 = vmatmul.f32.gmra.mxu2 %v4926_v7  ;;  %2700 = vmatmul.f32.gmra.mxu3 %v4923_v45 }
 0x632   :  { %v2533_v49 = vpop.f32.mrf.mxu1 }
 0x635   :  { %v2467_v56 = vpop.f32.mrf.mxu0 }
 0x636   :  { %2704 = vmatmul.f32.gmra.mxu3 %v4926_v7 }
 0x638   :  { %v2284_v50 = vpop.f32.mrf.mxu2 }
 0x639   :  { %v2285_v30 = vadd.f32 %v2284_v50, %v4670_v4 }
 0x63b   :  { %v2539_v54 = vpop.f32.mrf.mxu1 }
 0x63d   :  { %v2472_v44 = vpop.f32.mrf.mxu0 }
 0x640   :  { %v2292_v13 = vpop.f32.mrf.mxu2 }
 0x641   :  { %v2401_v28 = vpop.f32.mrf.mxu3  ;;  %v2293_v0 = vadd.f32 %v2292_v13, %v4670_v4 }
 0x642   :  { %v2402_v10 = vadd.f32 %v2401_v28, %v2285_v30 }
 0x644   :  { %v2468_v53 = vadd.f32 %v2467_v56, %v2402_v10  ;;  %v2545_v36 = vpop.f32.mrf.mxu1 }
 0x645   :  { %v2477_v21 = vpop.f32.mrf.mxu0 }
 0x646   :  { %v2534_v47 = vadd.f32 %v2533_v49, %v2468_v53 }
 0x649   :  { %v2300_v17 = vpop.f32.mrf.mxu2  ;;  %v2405_v34 = vpop.f32.mrf.mxu3 }
 0x64a   :  { %v2406_v59 = vadd.f32 %v2405_v34, %v2293_v0  ;;  %v2301_v43 = vadd.f32 %v2300_v17, %v4670_v4 }
 0x64c   :  { %v2473_v37 = vadd.f32 %v2472_v44, %v2406_v59  ;;  %v2551_v18 = vpop.f32.mrf.mxu1 }
 0x64d   :  { %v2482_v60 = vpop.f32.mrf.mxu0 }
 0x64e   :  { %v2540_v5 = vadd.f32 %v2539_v54, %v2473_v37 }
 0x651   :  { %v2308_v41 = vpop.f32.mrf.mxu2  ;;  %v2409_v14 = vpop.f32.mrf.mxu3 }
 0x652   :  { %v2410_v63 = vadd.f32 %v2409_v14, %v2301_v43  ;;  %v2309_v11 = vadd.f32 %v2308_v41, %v4670_v4 }
 0x654   :  { %v2478_v27 = vadd.f32 %v2477_v21, %v2410_v63  ;;  %v2557_v23 = vpop.f32.mrf.mxu1  ;;  %v4927_v63 = vld [vmem:[#allocation13_spill] sm:$0xff] }
 0x655   :  { %v2487_v40 = vpop.f32.mrf.mxu0 }
 0x656   :  { %v2546_v52 = vadd.f32 %v2545_v36, %v2478_v27 }
 0x659   :  { %v2316_v57 = vpop.f32.mrf.mxu2  ;;  %v2413_v15 = vpop.f32.mrf.mxu3 }
 0x65a   :  { %v2414_v38 = vadd.f32 %v2413_v15, %v2309_v11  ;;  %v2317_v39 = vadd.f32 %v2316_v57, %v4670_v4 }
 0x65c   :  { %v2483_v6 = vadd.f32 %v2482_v60, %v2414_v38  ;;  %v2563_v17 = vpop.f32.mrf.mxu1  ;;  %v4928_v38 = vld [vmem:[#allocation16_spill] sm:$0xff] }
 0x65d   :  { %v2492_v50 = vpop.f32.mrf.mxu0 }
 0x65e   :  { %v2552_v29 = vadd.f32 %v2551_v18, %v2483_v6 }
 0x661   :  { %v2324_v19 = vpop.f32.mrf.mxu2  ;;  %v2417_v46 = vpop.f32.mrf.mxu3 }
 0x662   :  { %v2418_v61 = vadd.f32 %v2417_v46, %v2317_v39  ;;  %v2325_v7 = vadd.f32 %v2324_v19, %v4670_v4  ;;  %v4929_v39 = vld [vmem:[#allocation19_spill] sm:$0xff] }
 0x664   :  { %v2488_v24 = vadd.f32 %v2487_v40, %v2418_v61  ;;  %v2569_v54 = vpop.f32.mrf.mxu1 }
 0x665   :  { %v2497_v19 = vpop.f32.mrf.mxu0 }
 0x666   :  { %v2558_v28 = vadd.f32 %v2557_v23, %v2488_v24 }
 0x669   :  { %v4664_v42 = vpop.f32.mrf.mxu2  ;;  %v2421_v1 = vpop.f32.mrf.mxu3 }
 0x66a   :  { %v2422_v13 = vadd.f32 %v2421_v1, %v2325_v7  ;;  %v2333_v46 = vadd.f32 %v4664_v42, %v4670_v4 }
 0x66c   :  { %v2493_v57 = vadd.f32 %v2492_v50, %v2422_v13 }
 0x66d   :  { %v2502_v59 = vpop.f32.mrf.mxu0 }
 0x66e   :  { %v2564_v49 = vadd.f32 %v2563_v17, %v2493_v57 }
 0x671   :  { %v4666_v48 = vpop.f32.mrf.mxu2  ;;  %v4668_v32 = vpop.f32.mrf.mxu3 }
 0x672   :  { %v2426_v56 = vadd.f32 %v4668_v32, %v2333_v46  ;;  %v2341_v53 = vadd.f32 %v4666_v48, %v4670_v4  ;;  %v2925_v48 = vpop.permute.xlu2 %2924 }
 0x674   :  { %v2498_v10 = vadd.f32 %v2497_v19, %v2426_v56 }
 0x676   :  { %v2570_v42 = vadd.f32 %v2569_v54, %v2498_v10 }
 0x679   :  { %v4673_v35 = vpop.f32.mrf.mxu3  ;;  %v2620_v62 = vpop.f32.mrf.mxu2 }
 0x67a   :  { %v2621_v2 = vadd.f32 %v2620_v62, %v2534_v47  ;;  %v2430_v0 = vadd.f32 %v4673_v35, %v2341_v53  ;;  %v2931_v4 = vpop.permute.xlu2 %2930  ;;  %v2921_v35 = vpop.permute.xlu1 %2920 }
 0x67c   :  { %v2503_v32 = vadd.f32 %v2502_v59, %v2430_v0  ;;  %v4934_v0 = vld [vmem:[#allocation37_spill] sm:$0xff] }
 0x681   :  { %v2624_v9 = vpop.f32.mrf.mxu2  ;;  %v2677_v55 = vpop.f32.mrf.mxu3 }
 0x682   :  { %v2678_v31 = vadd.f32 %v2677_v55, %v2621_v2  ;;  %v2625_v26 = vadd.f32 %v2624_v9, %v2540_v5  ;;  %v2575_v9 = vpop.f32.mrf.mxu1  ;;  %v2976_v5 = vsel %vm1095_vm4, %v4927_v63, %v2921_v35  ;;  %v2929_v11 = vpop.permute.xlu1 %2928 }
 0x683   :  { %v2576_v36 = vadd.f32 %v2575_v9, %v2503_v32 }
 0x684   :  { %2952 = vrot.lane.b32.xlu2 %v2678_v31, %s3183_s15 }
 0x689   :  { %v2628_v58 = vpop.f32.mrf.mxu2  ;;  %v2681_v16 = vpop.f32.mrf.mxu3 }
 0x68a   :  { %v2682_v20 = vadd.f32 %v2681_v16, %v2625_v26  ;;  %v2629_v51 = vadd.f32 %v2628_v58, %v2546_v52  ;;  %v2919_v26 = vstv %s2918_s27  ;;  %v2935_v40 = vpop.permute.xlu1 %2934 }
 0x68c   :  { %2954 = vrot.lane.b32.xlu0 %v2682_v20, %s3183_s15  ;;  %v2923_v20 = vpop.permute.xlu0 %2922 }
 0x68d   :  { %v2977_v23 = vsel %vm1095_vm4, %v4929_v39, %v2923_v20 }
 0x691   :  { %v2632_v22 = vpop.f32.mrf.mxu2  ;;  %v2685_v12 = vpop.f32.mrf.mxu3 }
 0x692   :  { %v2686_v8 = vadd.f32 %v2685_v12, %v2629_v51  ;;  %v2633_v25 = vadd.f32 %v2632_v22, %v2552_v29 }
 0x694   :  { %2956 = vrot.lane.b32.xlu1 %v2686_v8, %s3183_s15  ;;  %v2927_v18 = vpop.permute.xlu0 %2926 }
 0x695   :  { %v2979_v52 = vsel %vm1095_vm4, %v4928_v38, %v2927_v18 }
 0x699   :  { %v2636_v3 = vpop.f32.mrf.mxu2  ;;  %v2689_v45 = vpop.f32.mrf.mxu3 }
 0x69a   :  { %v2690_v33 = vadd.f32 %v2689_v45, %v2633_v25  ;;  %v2637_v34 = vadd.f32 %v2636_v3, %v2558_v28  ;;  %v4930_v45 = vld [vmem:[#allocation14_spill] sm:$0xff]  ;;  %v4931_v28 = vld [vmem:[#allocation32_spill] sm:$0xff] }
 0x69b   :  { %v2978_v24 = vsel %vm1095_vm4, %v4930_v45, %v2925_v48 }
 0x69c   :  { %2958 = vrot.lane.b32.xlu2 %v2690_v33, %s3183_s15  ;;  %v2933_v51 = vpop.permute.xlu0 %2932 }
 0x69d   :  { %v2982_v17 = vsel %vm1095_vm4, %v4931_v28, %v2933_v51 }
 0x6a1   :  { %v2640_v41 = vpop.f32.mrf.mxu2  ;;  %v2693_v14 = vpop.f32.mrf.mxu3 }
 0x6a2   :  { %v2694_v15 = vadd.f32 %v2693_v14, %v2637_v34  ;;  %v2641_v30 = vadd.f32 %v2640_v41, %v2564_v49 }
 0x6a4   :  { %2960 = vrot.lane.b32.xlu0 %v2694_v15, %s3183_s15  ;;  %v4932_v15 = vld [vmem:[#allocation17_spill] sm:$0xff] }
 0x6a5   :  { %v2980_v46 = vsel %vm1095_vm4, %v4932_v15, %v2929_v11 }
 0x6a9   :  { %v2697_v44 = vpop.f32.mrf.mxu3  ;;  %v2644_v62 = vpop.f32.mrf.mxu2 }
 0x6aa   :  { %v2698_v1 = vadd.f32 %v2697_v44, %v2641_v30  ;;  %v2645_v21 = vadd.f32 %v2644_v62, %v2570_v42  ;;  %v4933_v44 = vld [vmem:[#allocation24_spill] sm:$0xff]  ;;  %v2983_v42 = vsel %vm1095_vm4, %v4934_v0, %v2935_v40 }
 0x6ab   :  { %v2981_v10 = vsel %vm1095_vm4, %v4933_v44, %v2931_v4 }
 0x6ac   :  { %2962 = vrot.lane.b32.xlu1 %v2698_v1, %s3183_s15 }
 0x6b1   :  { %v2701_v47 = vpop.f32.mrf.mxu3  ;;  %v2648_v55 = vpop.f32.mrf.mxu2 }
 0x6b2   :  { %v2702_v2 = vadd.f32 %v2701_v47, %v2645_v21  ;;  %v2649_v37 = vadd.f32 %v2648_v55, %v2576_v36 }
 0x6b4   :  { %2964 = vrot.lane.b32.xlu2 %v2702_v2, %s3183_s15 }
 0x6b9   :  { %v2705_v31 = vpop.f32.mrf.mxu3 }
 0x6ba   :  { %v2706_v43 = vadd.f32 %v2705_v31, %v2649_v37 }
 0x6bc   :  { %2966 = vrot.lane.b32.xlu0 %v2706_v43, %s3183_s15 }
 0x6de   :  { %v2953_v60 = vpop.permute.xlu2 %2952 }
 0x6df   :  { %v2985_v58 = vsel %vm2984_vm12, %v2976_v5, %v2953_v60 }
 0x6e0   :  { %v2994_v16 = vsel %vm2993_vm13, %v2985_v58, %v2919_v26 }
 0x6e1   :  { %v3003_v27 = vsel %vm3002_vm14, %v2994_v16, 0.0 }
 0x6e2   :  { %3011 = vst [vmem:[%s4764_s6] sm:$0xff] %v3003_v27 }
 0x6f6   :  { %v2959_v22 = vpop.permute.xlu2 %2958 }
 0x6f7   :  { %v2988_v12 = vsel %vm2984_vm12, %v2979_v52, %v2959_v22 }
 0x6f8   :  { %v2997_v6 = vsel %vm2993_vm13, %v2988_v12, %v2919_v26 }
 0x6f9   :  { %v3006_v8 = vsel %vm3002_vm14, %v2997_v6, 0.0 }
 0x6fa   :  { %3014 = vst [vmem:[%s4764_s6 + $0x18] sm:$0xff] %v3006_v8 }
 0x6fe   :  { %v2955_v61 = vpop.permute.xlu0 %2954 }
 0x6ff   :  { %v2986_v29 = vsel %vm2984_vm12, %v2977_v23, %v2955_v61 }
 0x700   :  { %v2995_v25 = vsel %vm2993_vm13, %v2986_v29, %v2919_v26 }
 0x701   :  { %v3004_v3 = vsel %vm3002_vm14, %v2995_v25, 0.0 }
 0x702   :  { %3012 = vst [vmem:[%s4764_s6 + $0x8] sm:$0xff] %v3004_v3 }
 0x706   :  { %v2957_v33 = vpop.permute.xlu1 %2956 }
 0x707   :  { %v2987_v7 = vsel %vm2984_vm12, %v2978_v24, %v2957_v33 }
 0x708   :  { %v2996_v50 = vsel %vm2993_vm13, %v2987_v7, %v2919_v26 }
 0x709   :  { %v3005_v13 = vsel %vm3002_vm14, %v2996_v50, 0.0 }
 0x70a   :  { %3013 = vst [vmem:[%s4764_s6 + $0x10] sm:$0xff] %v3005_v13 }
 0x70e   :  { %v2965_v34 = vpop.permute.xlu2 %2964 }
 0x70f   :  { %v2991_v41 = vsel %vm2984_vm12, %v2982_v17, %v2965_v34 }
 0x710   :  { %v3000_v14 = vsel %vm2993_vm13, %v2991_v41, %v2919_v26 }
 0x711   :  { %v3009_v57 = vsel %vm3002_vm14, %v3000_v14, 0.0 }
 0x712   :  { %3017 = vst [vmem:[%s4764_s6 + $0x30] sm:$0xff] %v3009_v57 }
 0x716   :  { %v2961_v56 = vpop.permute.xlu0 %2960 }
 0x717   :  { %v2989_v49 = vsel %vm2984_vm12, %v2980_v46, %v2961_v56 }
 0x718   :  { %v2998_v19 = vsel %vm2993_vm13, %v2989_v49, %v2919_v26 }
 0x719   :  { %v3007_v30 = vsel %vm3002_vm14, %v2998_v19, 0.0 }
 0x71a   :  { %3015 = vst [vmem:[%s4764_s6 + $0x20] sm:$0xff] %v3007_v30 }
 0x71e   :  { %v2963_v1 = vpop.permute.xlu1 %2962 }
 0x71f   :  { %v2990_v54 = vsel %vm2984_vm12, %v2981_v10, %v2963_v1 }
 0x720   :  { %v2999_v62 = vsel %vm2993_vm13, %v2990_v54, %v2919_v26 }
 0x721   :  { %v3008_v53 = vsel %vm3002_vm14, %v2999_v62, 0.0 }
 0x722   :  { %3016 = vst [vmem:[%s4764_s6 + $0x28] sm:$0xff] %v3008_v53 }
 0x72e   :  { %v2967_v21 = vpop.permute.xlu0 %2966 }
 0x72f   :  { %v2992_v59 = vsel %vm2984_vm12, %v2983_v42, %v2967_v21 }
 0x730   :  { %v3001_v47 = vsel %vm2993_vm13, %v2992_v59, %v2919_v26 }
 0x731   :  { %v3010_v32 = vsel %vm3002_vm14, %v3001_v47, 0.0 }
 0x732   :  { %3018 = vst [vmem:[%s4764_s6 + $0x38] sm:$0xff] %v3010_v32 }
 0x733   :  { %3023 = vsyncpa [#allocation3], 1 }

</bundles_post_ra>
